<compile_context>
chip_gen: v6e
topology: v6e:2x2x1
jax: 0.10.0
libtpu: 0.0.40
codegen_flags: <defaults>
</compile_context>

<pallas_src>
import functools

import numpy as np
import jax
import jax.numpy as jnp
from jax import lax
from jax.experimental import pallas as pl
from jax.experimental.pallas import tpu as pltpu

_INV_SQRT2 = 0.7071067811865476
_BN_EPS = 1e-5


def _gelu(x):
    # exact GELU (matches torch.nn.GELU(), approximate='none')
    # TODO(synk): on v6e/v7x a tanh-approx GELU would route through the EUP
    # slot and free VALU, but changes numerics vs PyTorch's exact-erf default.
    return 0.5 * x * (1.0 + lax.erf(x * _INV_SQRT2))


# -------------------- fused kernel --------------------

def _fused_block_kernel(x_ref, w1_ref, b1_ref, mw_ref, b2_ref, w3_ref, b3_ref,
                        o_ref, *, H, W, Nb):
    # Layout: channels on sublanes, flattened spatial (H*W) on lanes.
    M = H * W
    Cout, Cmid = w3_ref.shape

    # Unrolled loop over the Nb images packed into this grid step: amortizes
    # the ~600-cycle fixed per-step cost over Nb*(Cin+Cout)*M*4 bytes of DMA.
    for i in range(Nb):
        # --- conv1 (1x1, BN1 folded into weights) + GELU : MXU, K = Cin ---
        h1 = jnp.dot(w1_ref[...], x_ref[i],
                     preferred_element_type=jnp.float32)          # (Cmid, M)
        h1 = _gelu(h1 + b1_ref[...])

        # --- depthwise 3x3, pad=1 (BN2 + conv bias folded) + GELU ---
        # Shift along the flat H*W lane axis with pltpu.roll (XLU slot).
        # mw_ref[k] = tap_weight[:,k] * boundary_mask[k,:] precomputed at
        # trace time, so each tap is a single VPU multiply-accumulate; the
        # mask zeroes wrapped / out-of-image positions.
        acc = h1 * mw_ref[4]                                       # center tap
        for kh in range(3):
            for kw in range(3):
                if kh == 1 and kw == 1:
                    continue
                dh, dw = kh - 1, kw - 1
                k = kh * 3 + kw
                shift = (-(dh * W + dw)) % M                       # static
                acc = acc + pltpu.roll(h1, shift, axis=1) * mw_ref[k]
        h2 = _gelu(acc + b2_ref[...])

        # --- conv3 (1x1, BN3 folded) + residual + GELU ---
        # K = Cmid is tiny -> Cmid rank-1 VPU FMAs instead of an MXU dot.
        # Residual is re-read from VMEM here (not kept live in vregs since
        # the conv1 read), so it does not pin vregs across the dw loop.
        y = b3_ref[...] + x_ref[i].astype(jnp.float32)             # (Cout, M)
        for c in range(Cmid):
            y = y + w3_ref[:, c:c + 1] * h2[c:c + 1, :]
        o_ref[i] = _gelu(y).astype(o_ref.dtype)


def _dw_valid_masks(H, W):
    # (9, H*W) float mask: 1.0 where the shifted tap reads inside the image.
    h = np.arange(H * W) // W
    w = np.arange(H * W) % W
    rows = []
    for kh in range(3):
        for kw in range(3):
            dh, dw = kh - 1, kw - 1
            valid = ((h + dh >= 0) & (h + dh <= H - 1) &
                     (w + dw >= 0) & (w + dw <= W - 1))
            rows.append(valid)
    return jnp.asarray(np.stack(rows).astype(np.float32))


def _choose_nb(N, per_img_bytes, target_bytes=1 << 18):
    # Smallest divisor of N whose block moves >= target_bytes per step, while
    # keeping >= 2 grid steps when N >= 2 (pipelining depth / v7x dual-TC).
    best = 1
    for nb in range(1, N + 1):
        if N % nb:
            continue
        if N >= 2 and (N // nb) < 2:
            continue
        best = nb
        if nb * per_img_bytes >= target_bytes:
            break
    return best


def fused_block(x_flat, w1f, b1f, mwf, b2f, w3f, b3f, H, W, nb=None):
    N, Cin, M = x_flat.shape
    Cmid = w1f.shape[0]
    Cout = w3f.shape[0]
    if nb is None:
        nb = _choose_nb(N, (Cin + Cout) * M * 4)
    assert N % nb == 0
    steps = N // nb
    kern = functools.partial(_fused_block_kernel, H=H, W=W, Nb=nb)
    # TODO(synk): for large H*W, additionally tile over spatial row-bands
    # (1-row halo via manual DMA), generate the boundary masks in-kernel with
    # broadcasted_iota, and size bands against pltpu.get_tpu_info() VMEM
    # (64 MiB physical on v7x) + an explicit vmem_limit_bytes. At these shapes
    # the per-step footprint (~0.7 MiB double-buffered) fits every default.
    return pl.pallas_call(
        kern,
        out_shape=jax.ShapeDtypeStruct((N, Cout, M), x_flat.dtype),
        grid_spec=pltpu.PrefetchScalarGridSpec(
            num_scalar_prefetch=0,
            grid=(steps,),
            in_specs=[
                pl.BlockSpec((nb, Cin, M), lambda n: (n, 0, 0)),
                pl.BlockSpec((Cmid, Cin), lambda n: (0, 0)),
                pl.BlockSpec((Cmid, 1), lambda n: (0, 0)),
                pl.BlockSpec((9, Cmid, M), lambda n: (0, 0, 0)),
                pl.BlockSpec((Cmid, 1), lambda n: (0, 0)),
                pl.BlockSpec((Cout, Cmid), lambda n: (0, 0)),
                pl.BlockSpec((Cout, 1), lambda n: (0, 0)),
            ],
            out_specs=pl.BlockSpec((nb, Cout, M), lambda n: (n, 0, 0)),
        ),
        compiler_params=pltpu.CompilerParams(
            dimension_semantics=("parallel",)),
    )(x_flat, w1f, b1f, mwf, b2f, w3f, b3f)


# -------------------- parameter init & forward --------------------

def init_params(key, cin, cmid):
    cexp = cmid * 4
    ks = jax.random.split(key, 16)
    n = jax.random.normal
    return {
        # conv1: 1x1, no bias, stored (Cmid, Cin) (= PyTorch (out, in))
        "w1": 0.1 * n(ks[0], (cmid, cin), jnp.float32),
        "bn1_g": 1.0 + 0.1 * n(ks[1], (cmid,), jnp.float32),
        "bn1_b": 0.1 * n(ks[2], (cmid,), jnp.float32),
        "bn1_m": 0.05 * n(ks[3], (cmid,), jnp.float32),
        "bn1_v": 1.0 + 0.1 * jnp.abs(n(ks[4], (cmid,), jnp.float32)),
        # conv2: depthwise 3x3 (groups=Cmid), with bias; taps (Cmid, 9)
        "w2": 0.1 * n(ks[5], (cmid, 9), jnp.float32),
        "b2": 0.05 * n(ks[6], (cmid,), jnp.float32),
        "bn2_g": 1.0 + 0.1 * n(ks[7], (cmid,), jnp.float32),
        "bn2_b": 0.1 * n(ks[8], (cmid,), jnp.float32),
        "bn2_m": 0.05 * n(ks[9], (cmid,), jnp.float32),
        "bn2_v": 1.0 + 0.1 * jnp.abs(n(ks[10], (cmid,), jnp.float32)),
        # conv3: 1x1, no bias, (Cout=4*Cmid, Cmid)
        "w3": 0.1 * n(ks[11], (cexp, cmid), jnp.float32),
        "bn3_g": 1.0 + 0.1 * n(ks[12], (cexp,), jnp.float32),
        "bn3_b": 0.1 * n(ks[13], (cexp,), jnp.float32),
        "bn3_m": 0.05 * n(ks[14], (cexp,), jnp.float32),
        "bn3_v": 1.0 + 0.1 * jnp.abs(n(ks[15], (cexp,), jnp.float32)),
    }


def _fold_bn(g, b, m, v):
    s = g * lax.rsqrt(v + _BN_EPS)
    return s, b - m * s


def block_forward(x_nchw, p):
    # TODO(synk): Involution2d branch (type='inv') not implemented — the class
    # is not defined in the source file; this is the depthwise-conv branch.
    # TODO(synk): stride>1 / identity_downsample paths not implemented
    # (the residual-add only type-checks for stride=1, downsample=None anyway).
    N, Cin, H, W = x_nchw.shape
    Cmid = p["w1"].shape[0]
    Cout = p["w3"].shape[0]
    assert Cout == Cin, "residual add requires in_channels == 4*intermediate"

    s1, t1 = _fold_bn(p["bn1_g"], p["bn1_b"], p["bn1_m"], p["bn1_v"])
    s2, t2 = _fold_bn(p["bn2_g"], p["bn2_b"], p["bn2_m"], p["bn2_v"])
    s3, t3 = _fold_bn(p["bn3_g"], p["bn3_b"], p["bn3_m"], p["bn3_v"])

    # Fold BN scale/shift (and the dw-conv bias) into the conv weights/biases.
    w1f = p["w1"] * s1[:, None]            # (Cmid, Cin)
    b1f = t1[:, None]                      # (Cmid, 1)
    w2f = p["w2"] * s2[:, None]            # (Cmid, 9)
    b2f = (s2 * p["b2"] + t2)[:, None]     # (Cmid, 1)
    w3f = p["w3"] * s3[:, None]            # (Cout, Cmid)
    b3f = t3[:, None]                      # (Cout, 1)

    # Per-tap (mask * weight) product: (9, Cmid, H*W), built once at trace time.
    masks = _dw_valid_masks(H, W)                              # (9, H*W)
    mwf = w2f.T[:, :, None] * masks[:, None, :]                # (9, Cmid, M)

    xf = x_nchw.reshape(N, Cin, H * W)     # free view; no transpose, no pad
    out = fused_block(xf, w1f, b1f, mwf, b2f, w3f, b3f, H, W)
    return out.reshape(N, Cout, H, W)


# -------------------- pure-JAX reference (NCHW, unfused) --------------------

def block_reference(x, p):
    def bn(y, g, b, m, v):
        sh = (1, -1, 1, 1)
        return ((y - m.reshape(sh)) * lax.rsqrt(v + _BN_EPS).reshape(sh)
                * g.reshape(sh) + b.reshape(sh))

    identity = x
    h = jnp.einsum("nchw,dc->ndhw", x, p["w1"],
                   precision=lax.Precision.HIGHEST)
    h = _gelu(bn(h, p["bn1_g"], p["bn1_b"], p["bn1_m"], p["bn1_v"]))
    C = h.shape[1]
    rhs = p["w2"].reshape(C, 1, 3, 3)
    h = lax.conv_general_dilated(
        h, rhs, window_strides=(1, 1), padding=((1, 1), (1, 1)),
        dimension_numbers=("NCHW", "OIHW", "NCHW"),
        feature_group_count=C, precision=lax.Precision.HIGHEST)
    h = h + p["b2"].reshape(1, -1, 1, 1)
    h = _gelu(bn(h, p["bn2_g"], p["bn2_b"], p["bn2_m"], p["bn2_v"]))
    h = jnp.einsum("nchw,dc->ndhw", h, p["w3"],
                   precision=lax.Precision.HIGHEST)
    h = bn(h, p["bn3_g"], p["bn3_b"], p["bn3_m"], p["bn3_v"])
    return _gelu(h + identity)


# -------------------- main --------------------

if __name__ == "__main__":
    N, H, W = 8, 16, 16
    Cmid = 8                 # intermediate_channels
    Cin = Cmid * 4           # in_channels == expansion * intermediate

    key = jax.random.PRNGKey(0)
    kx, kp = jax.random.split(key)
    x = jax.random.normal(kx, (N, Cin, H, W), jnp.float32)   # NCHW, like PyTorch
    params = init_params(kp, Cin, Cmid)

    fwd = jax.jit(block_forward)
    out = jax.block_until_ready(fwd(x, params))

    ref = block_reference(x, params)
    err = float(jnp.max(jnp.abs(out - ref)))
    assert out.shape == (N, Cin, H, W) and out.dtype == jnp.float32
    # conv1 runs at default MXU precision while the reference uses HIGHEST;
    # conv3 is exact f32 on the VPU, so 3e-3 gives comfortable headroom.
    assert err < 3e-3, f"mismatch vs reference: max abs err = {err}"
    print("KERNEL_OK")
</pallas_src>

<mosaic_0001>
module attributes {stable_mosaic.version = 11 : i64} {
  func.func @_fused_block_kernel(%arg0: i32, %arg1: memref<4x32x256xf32, #tpu.memory_space<vmem>>, %arg2: memref<8x32xf32, #tpu.memory_space<vmem>>, %arg3: memref<8x1xf32, #tpu.memory_space<vmem>>, %arg4: memref<9x8x256xf32, #tpu.memory_space<vmem>>, %arg5: memref<8x1xf32, #tpu.memory_space<vmem>>, %arg6: memref<32x8xf32, #tpu.memory_space<vmem>>, %arg7: memref<32x1xf32, #tpu.memory_space<vmem>>, %arg8: memref<4x32x256xf32, #tpu.memory_space<vmem>>) attributes {dimension_semantics = [#tpu.dimension_semantics<parallel>], iteration_bounds = array<i64: 2>, scalar_prefetch = 0 : i64, scratch_operands = 0 : i64, tpu.core_type = #tpu.core_type<tc>, window_params = [{transform_indices = @transform_0, window_bounds = array<i64: 4, 32, 256>}, {pipeline_mode = #tpu.pipeline_mode<synchronous>, transform_indices = @transform_1, window_bounds = array<i64: 8, 32>}, {pipeline_mode = #tpu.pipeline_mode<synchronous>, transform_indices = @transform_2, window_bounds = array<i64: 8, 1>}, {pipeline_mode = #tpu.pipeline_mode<synchronous>, transform_indices = @transform_3, window_bounds = array<i64: 9, 8, 256>}, {pipeline_mode = #tpu.pipeline_mode<synchronous>, transform_indices = @transform_4, window_bounds = array<i64: 8, 1>}, {pipeline_mode = #tpu.pipeline_mode<synchronous>, transform_indices = @transform_5, window_bounds = array<i64: 32, 8>}, {pipeline_mode = #tpu.pipeline_mode<synchronous>, transform_indices = @transform_6, window_bounds = array<i64: 32, 1>}, {transform_indices = @transform_7, window_bounds = array<i64: 4, 32, 256>}]} {
    %c0 = arith.constant 0 : index
    %c0_0 = arith.constant 0 : index
    %0 = vector.load %arg2[%c0, %c0_0] : memref<8x32xf32, #tpu.memory_space<vmem>>, vector<8x32xf32>
    %c0_1 = arith.constant 0 : index
    %c0_2 = arith.constant 0 : index
    %c0_3 = arith.constant 0 : index
    %1 = vector.load %arg1[%c0_1, %c0_2, %c0_3] : memref<4x32x256xf32, #tpu.memory_space<vmem>>, vector<1x32x256xf32>
    %2 = vector.shape_cast %1 : vector<1x32x256xf32> to vector<32x256xf32>
    %cst = arith.constant dense<0.000000e+00> : vector<8x256xf32>
    %3 = tpu.matmul %0, %2, %cst {dimension_numbers = #tpu.dot_dimension_numbers<[1], [0], [0], [1], [0, 0, 1, 1], [], []>} : vector<8x32xf32>, vector<32x256xf32>, vector<8x256xf32> -> vector<8x256xf32>
    %c0_4 = arith.constant 0 : index
    %c0_5 = arith.constant 0 : index
    %4 = vector.load %arg3[%c0_4, %c0_5] : memref<8x1xf32, #tpu.memory_space<vmem>>, vector<8x1xf32>
    %5 = vector.broadcast %4 : vector<8x1xf32> to vector<8x256xf32>
    %6 = arith.addf %3, %5 : vector<8x256xf32>
    %cst_6 = arith.constant 5.000000e-01 : f32
    %7 = vector.broadcast %cst_6 : f32 to vector<8x256xf32>
    %8 = arith.mulf %7, %6 : vector<8x256xf32>
    %cst_7 = arith.constant 0.707106769 : f32
    %9 = vector.broadcast %cst_7 : f32 to vector<8x256xf32>
    %10 = arith.mulf %6, %9 : vector<8x256xf32>
    %11 = math.erf %10 : vector<8x256xf32>
    %cst_8 = arith.constant 1.000000e+00 : f32
    %12 = vector.broadcast %cst_8 : f32 to vector<8x256xf32>
    %13 = arith.addf %12, %11 : vector<8x256xf32>
    %14 = arith.mulf %8, %13 : vector<8x256xf32>
    %c4 = arith.constant 4 : index
    %c0_9 = arith.constant 0 : index
    %c0_10 = arith.constant 0 : index
    %15 = vector.load %arg4[%c4, %c0_9, %c0_10] : memref<9x8x256xf32, #tpu.memory_space<vmem>>, vector<1x8x256xf32>
    %16 = vector.shape_cast %15 : vector<1x8x256xf32> to vector<8x256xf32>
    %17 = arith.mulf %14, %16 : vector<8x256xf32>
    %c17_i32 = arith.constant 17 : i32
    %18 = tpu.dynamic_rotate %14 by %c17_i32 dim 1 : vector<8x256xf32>, i32 -> vector<8x256xf32>
    %c0_11 = arith.constant 0 : index
    %c0_12 = arith.constant 0 : index
    %c0_13 = arith.constant 0 : index
    %19 = vector.load %arg4[%c0_11, %c0_12, %c0_13] : memref<9x8x256xf32, #tpu.memory_space<vmem>>, vector<1x8x256xf32>
    %20 = vector.shape_cast %19 : vector<1x8x256xf32> to vector<8x256xf32>
    %21 = arith.mulf %18, %20 : vector<8x256xf32>
    %22 = arith.addf %17, %21 : vector<8x256xf32>
    %c16_i32 = arith.constant 16 : i32
    %23 = tpu.dynamic_rotate %14 by %c16_i32 dim 1 : vector<8x256xf32>, i32 -> vector<8x256xf32>
    %c1 = arith.constant 1 : index
    %c0_14 = arith.constant 0 : index
    %c0_15 = arith.constant 0 : index
    %24 = vector.load %arg4[%c1, %c0_14, %c0_15] : memref<9x8x256xf32, #tpu.memory_space<vmem>>, vector<1x8x256xf32>
    %25 = vector.shape_cast %24 : vector<1x8x256xf32> to vector<8x256xf32>
    %26 = arith.mulf %23, %25 : vector<8x256xf32>
    %27 = arith.addf %22, %26 : vector<8x256xf32>
    %c15_i32 = arith.constant 15 : i32
    %28 = tpu.dynamic_rotate %14 by %c15_i32 dim 1 : vector<8x256xf32>, i32 -> vector<8x256xf32>
    %c2 = arith.constant 2 : index
    %c0_16 = arith.constant 0 : index
    %c0_17 = arith.constant 0 : index
    %29 = vector.load %arg4[%c2, %c0_16, %c0_17] : memref<9x8x256xf32, #tpu.memory_space<vmem>>, vector<1x8x256xf32>
    %30 = vector.shape_cast %29 : vector<1x8x256xf32> to vector<8x256xf32>
    %31 = arith.mulf %28, %30 : vector<8x256xf32>
    %32 = arith.addf %27, %31 : vector<8x256xf32>
    %c1_i32 = arith.constant 1 : i32
    %33 = tpu.dynamic_rotate %14 by %c1_i32 dim 1 : vector<8x256xf32>, i32 -> vector<8x256xf32>
    %c3 = arith.constant 3 : index
    %c0_18 = arith.constant 0 : index
    %c0_19 = arith.constant 0 : index
    %34 = vector.load %arg4[%c3, %c0_18, %c0_19] : memref<9x8x256xf32, #tpu.memory_space<vmem>>, vector<1x8x256xf32>
    %35 = vector.shape_cast %34 : vector<1x8x256xf32> to vector<8x256xf32>
    %36 = arith.mulf %33, %35 : vector<8x256xf32>
    %37 = arith.addf %32, %36 : vector<8x256xf32>
    %c255_i32 = arith.constant 255 : i32
    %38 = tpu.dynamic_rotate %14 by %c255_i32 dim 1 : vector<8x256xf32>, i32 -> vector<8x256xf32>
    %c5 = arith.constant 5 : index
    %c0_20 = arith.constant 0 : index
    %c0_21 = arith.constant 0 : index
    %39 = vector.load %arg4[%c5, %c0_20, %c0_21] : memref<9x8x256xf32, #tpu.memory_space<vmem>>, vector<1x8x256xf32>
    %40 = vector.shape_cast %39 : vector<1x8x256xf32> to vector<8x256xf32>
    %41 = arith.mulf %38, %40 : vector<8x256xf32>
    %42 = arith.addf %37, %41 : vector<8x256xf32>
    %c241_i32 = arith.constant 241 : i32
    %43 = tpu.dynamic_rotate %14 by %c241_i32 dim 1 : vector<8x256xf32>, i32 -> vector<8x256xf32>
    %c6 = arith.constant 6 : index
    %c0_22 = arith.constant 0 : index
    %c0_23 = arith.constant 0 : index
    %44 = vector.load %arg4[%c6, %c0_22, %c0_23] : memref<9x8x256xf32, #tpu.memory_space<vmem>>, vector<1x8x256xf32>
    %45 = vector.shape_cast %44 : vector<1x8x256xf32> to vector<8x256xf32>
    %46 = arith.mulf %43, %45 : vector<8x256xf32>
    %47 = arith.addf %42, %46 : vector<8x256xf32>
    %c240_i32 = arith.constant 240 : i32
    %48 = tpu.dynamic_rotate %14 by %c240_i32 dim 1 : vector<8x256xf32>, i32 -> vector<8x256xf32>
    %c7 = arith.constant 7 : index
    %c0_24 = arith.constant 0 : index
    %c0_25 = arith.constant 0 : index
    %49 = vector.load %arg4[%c7, %c0_24, %c0_25] : memref<9x8x256xf32, #tpu.memory_space<vmem>>, vector<1x8x256xf32>
    %50 = vector.shape_cast %49 : vector<1x8x256xf32> to vector<8x256xf32>
    %51 = arith.mulf %48, %50 : vector<8x256xf32>
    %52 = arith.addf %47, %51 : vector<8x256xf32>
    %c239_i32 = arith.constant 239 : i32
    %53 = tpu.dynamic_rotate %14 by %c239_i32 dim 1 : vector<8x256xf32>, i32 -> vector<8x256xf32>
    %c8 = arith.constant 8 : index
    %c0_26 = arith.constant 0 : index
    %c0_27 = arith.constant 0 : index
    %54 = vector.load %arg4[%c8, %c0_26, %c0_27] : memref<9x8x256xf32, #tpu.memory_space<vmem>>, vector<1x8x256xf32>
    %55 = vector.shape_cast %54 : vector<1x8x256xf32> to vector<8x256xf32>
    %56 = arith.mulf %53, %55 : vector<8x256xf32>
    %57 = arith.addf %52, %56 : vector<8x256xf32>
    %c0_28 = arith.constant 0 : index
    %c0_29 = arith.constant 0 : index
    %58 = vector.load %arg5[%c0_28, %c0_29] : memref<8x1xf32, #tpu.memory_space<vmem>>, vector<8x1xf32>
    %59 = vector.broadcast %58 : vector<8x1xf32> to vector<8x256xf32>
    %60 = arith.addf %57, %59 : vector<8x256xf32>
    %cst_30 = arith.constant 5.000000e-01 : f32
    %61 = vector.broadcast %cst_30 : f32 to vector<8x256xf32>
    %62 = arith.mulf %61, %60 : vector<8x256xf32>
    %cst_31 = arith.constant 0.707106769 : f32
    %63 = vector.broadcast %cst_31 : f32 to vector<8x256xf32>
    %64 = arith.mulf %60, %63 : vector<8x256xf32>
    %65 = math.erf %64 : vector<8x256xf32>
    %cst_32 = arith.constant 1.000000e+00 : f32
    %66 = vector.broadcast %cst_32 : f32 to vector<8x256xf32>
    %67 = arith.addf %66, %65 : vector<8x256xf32>
    %68 = arith.mulf %62, %67 : vector<8x256xf32>
    %c0_33 = arith.constant 0 : index
    %c0_34 = arith.constant 0 : index
    %69 = vector.load %arg7[%c0_33, %c0_34] : memref<32x1xf32, #tpu.memory_space<vmem>>, vector<32x1xf32>
    %c0_35 = arith.constant 0 : index
    %c0_36 = arith.constant 0 : index
    %c0_37 = arith.constant 0 : index
    %70 = vector.load %arg1[%c0_35, %c0_36, %c0_37] : memref<4x32x256xf32, #tpu.memory_space<vmem>>, vector<1x32x256xf32>
    %71 = vector.shape_cast %70 : vector<1x32x256xf32> to vector<32x256xf32>
    %72 = vector.broadcast %69 : vector<32x1xf32> to vector<32x256xf32>
    %73 = arith.addf %72, %71 : vector<32x256xf32>
    %c0_38 = arith.constant 0 : index
    %c0_39 = arith.constant 0 : index
    %74 = vector.load %arg6[%c0_38, %c0_39] : memref<32x8xf32, #tpu.memory_space<vmem>>, vector<32x1xf32>
    %75 = vector.extract_strided_slice %68 {offsets = [0, 0], sizes = [1, 256], strides = [1, 1]} : vector<8x256xf32> to vector<1x256xf32>
    %76 = vector.broadcast %74 : vector<32x1xf32> to vector<32x256xf32>
    %77 = vector.broadcast %75 : vector<1x256xf32> to vector<32x256xf32>
    %78 = arith.mulf %76, %77 : vector<32x256xf32>
    %79 = arith.addf %73, %78 : vector<32x256xf32>
    %c0_40 = arith.constant 0 : index
    %c1_41 = arith.constant 1 : index
    %80 = vector.load %arg6[%c0_40, %c1_41] : memref<32x8xf32, #tpu.memory_space<vmem>>, vector<32x1xf32>
    %81 = vector.extract_strided_slice %68 {offsets = [1, 0], sizes = [1, 256], strides = [1, 1]} : vector<8x256xf32> to vector<1x256xf32>
    %82 = vector.broadcast %80 : vector<32x1xf32> to vector<32x256xf32>
    %83 = vector.broadcast %81 : vector<1x256xf32> to vector<32x256xf32>
    %84 = arith.mulf %82, %83 : vector<32x256xf32>
    %85 = arith.addf %79, %84 : vector<32x256xf32>
    %c0_42 = arith.constant 0 : index
    %c2_43 = arith.constant 2 : index
    %86 = vector.load %arg6[%c0_42, %c2_43] : memref<32x8xf32, #tpu.memory_space<vmem>>, vector<32x1xf32>
    %87 = vector.extract_strided_slice %68 {offsets = [2, 0], sizes = [1, 256], strides = [1, 1]} : vector<8x256xf32> to vector<1x256xf32>
    %88 = vector.broadcast %86 : vector<32x1xf32> to vector<32x256xf32>
    %89 = vector.broadcast %87 : vector<1x256xf32> to vector<32x256xf32>
    %90 = arith.mulf %88, %89 : vector<32x256xf32>
    %91 = arith.addf %85, %90 : vector<32x256xf32>
    %c0_44 = arith.constant 0 : index
    %c3_45 = arith.constant 3 : index
    %92 = vector.load %arg6[%c0_44, %c3_45] : memref<32x8xf32, #tpu.memory_space<vmem>>, vector<32x1xf32>
    %93 = vector.extract_strided_slice %68 {offsets = [3, 0], sizes = [1, 256], strides = [1, 1]} : vector<8x256xf32> to vector<1x256xf32>
    %94 = vector.broadcast %92 : vector<32x1xf32> to vector<32x256xf32>
    %95 = vector.broadcast %93 : vector<1x256xf32> to vector<32x256xf32>
    %96 = arith.mulf %94, %95 : vector<32x256xf32>
    %97 = arith.addf %91, %96 : vector<32x256xf32>
    %c0_46 = arith.constant 0 : index
    %c4_47 = arith.constant 4 : index
    %98 = vector.load %arg6[%c0_46, %c4_47] : memref<32x8xf32, #tpu.memory_space<vmem>>, vector<32x1xf32>
    %99 = vector.extract_strided_slice %68 {offsets = [4, 0], sizes = [1, 256], strides = [1, 1]} : vector<8x256xf32> to vector<1x256xf32>
    %100 = vector.broadcast %98 : vector<32x1xf32> to vector<32x256xf32>
    %101 = vector.broadcast %99 : vector<1x256xf32> to vector<32x256xf32>
    %102 = arith.mulf %100, %101 : vector<32x256xf32>
    %103 = arith.addf %97, %102 : vector<32x256xf32>
    %c0_48 = arith.constant 0 : index
    %c5_49 = arith.constant 5 : index
    %104 = vector.load %arg6[%c0_48, %c5_49] : memref<32x8xf32, #tpu.memory_space<vmem>>, vector<32x1xf32>
    %105 = vector.extract_strided_slice %68 {offsets = [5, 0], sizes = [1, 256], strides = [1, 1]} : vector<8x256xf32> to vector<1x256xf32>
    %106 = vector.broadcast %104 : vector<32x1xf32> to vector<32x256xf32>
    %107 = vector.broadcast %105 : vector<1x256xf32> to vector<32x256xf32>
    %108 = arith.mulf %106, %107 : vector<32x256xf32>
    %109 = arith.addf %103, %108 : vector<32x256xf32>
    %c0_50 = arith.constant 0 : index
    %c6_51 = arith.constant 6 : index
    %110 = vector.load %arg6[%c0_50, %c6_51] : memref<32x8xf32, #tpu.memory_space<vmem>>, vector<32x1xf32>
    %111 = vector.extract_strided_slice %68 {offsets = [6, 0], sizes = [1, 256], strides = [1, 1]} : vector<8x256xf32> to vector<1x256xf32>
    %112 = vector.broadcast %110 : vector<32x1xf32> to vector<32x256xf32>
    %113 = vector.broadcast %111 : vector<1x256xf32> to vector<32x256xf32>
    %114 = arith.mulf %112, %113 : vector<32x256xf32>
    %115 = arith.addf %109, %114 : vector<32x256xf32>
    %c0_52 = arith.constant 0 : index
    %c7_53 = arith.constant 7 : index
    %116 = vector.load %arg6[%c0_52, %c7_53] : memref<32x8xf32, #tpu.memory_space<vmem>>, vector<32x1xf32>
    %117 = vector.extract_strided_slice %68 {offsets = [7, 0], sizes = [1, 256], strides = [1, 1]} : vector<8x256xf32> to vector<1x256xf32>
    %118 = vector.broadcast %116 : vector<32x1xf32> to vector<32x256xf32>
    %119 = vector.broadcast %117 : vector<1x256xf32> to vector<32x256xf32>
    %120 = arith.mulf %118, %119 : vector<32x256xf32>
    %121 = arith.addf %115, %120 : vector<32x256xf32>
    %cst_54 = arith.constant 5.000000e-01 : f32
    %122 = vector.broadcast %cst_54 : f32 to vector<32x256xf32>
    %123 = arith.mulf %122, %121 : vector<32x256xf32>
    %cst_55 = arith.constant 0.707106769 : f32
    %124 = vector.broadcast %cst_55 : f32 to vector<32x256xf32>
    %125 = arith.mulf %121, %124 : vector<32x256xf32>
    %126 = math.erf %125 : vector<32x256xf32>
    %cst_56 = arith.constant 1.000000e+00 : f32
    %127 = vector.broadcast %cst_56 : f32 to vector<32x256xf32>
    %128 = arith.addf %127, %126 : vector<32x256xf32>
    %129 = arith.mulf %123, %128 : vector<32x256xf32>
    %c0_57 = arith.constant 0 : index
    %c0_58 = arith.constant 0 : index
    %c0_59 = arith.constant 0 : index
    %130 = vector.load %arg8[%c0_57, %c0_58, %c0_59] : memref<4x32x256xf32, #tpu.memory_space<vmem>>, vector<1x32x256xf32>
    %131 = vector.shape_cast %130 : vector<1x32x256xf32> to vector<32x256xf32>
    %132 = vector.shape_cast %129 : vector<32x256xf32> to vector<1x32x256xf32>
    tpu.vector_store %arg8[%c0_57, %c0_58, %c0_59], %132 {strides = array<i32>} : memref<4x32x256xf32, #tpu.memory_space<vmem>>, vector<1x32x256xf32>,
    %c0_60 = arith.constant 0 : index
    %c0_61 = arith.constant 0 : index
    %133 = vector.load %arg2[%c0_60, %c0_61] : memref<8x32xf32, #tpu.memory_space<vmem>>, vector<8x32xf32>
    %c1_62 = arith.constant 1 : index
    %c0_63 = arith.constant 0 : index
    %c0_64 = arith.constant 0 : index
    %134 = vector.load %arg1[%c1_62, %c0_63, %c0_64] : memref<4x32x256xf32, #tpu.memory_space<vmem>>, vector<1x32x256xf32>
    %135 = vector.shape_cast %134 : vector<1x32x256xf32> to vector<32x256xf32>
    %cst_65 = arith.constant dense<0.000000e+00> : vector<8x256xf32>
    %136 = tpu.matmul %133, %135, %cst_65 {dimension_numbers = #tpu.dot_dimension_numbers<[1], [0], [0], [1], [0, 0, 1, 1], [], []>} : vector<8x32xf32>, vector<32x256xf32>, vector<8x256xf32> -> vector<8x256xf32>
    %c0_66 = arith.constant 0 : index
    %c0_67 = arith.constant 0 : index
    %137 = vector.load %arg3[%c0_66, %c0_67] : memref<8x1xf32, #tpu.memory_space<vmem>>, vector<8x1xf32>
    %138 = vector.broadcast %137 : vector<8x1xf32> to vector<8x256xf32>
    %139 = arith.addf %136, %138 : vector<8x256xf32>
    %cst_68 = arith.constant 5.000000e-01 : f32
    %140 = vector.broadcast %cst_68 : f32 to vector<8x256xf32>
    %141 = arith.mulf %140, %139 : vector<8x256xf32>
    %cst_69 = arith.constant 0.707106769 : f32
    %142 = vector.broadcast %cst_69 : f32 to vector<8x256xf32>
    %143 = arith.mulf %139, %142 : vector<8x256xf32>
    %144 = math.erf %143 : vector<8x256xf32>
    %cst_70 = arith.constant 1.000000e+00 : f32
    %145 = vector.broadcast %cst_70 : f32 to vector<8x256xf32>
    %146 = arith.addf %145, %144 : vector<8x256xf32>
    %147 = arith.mulf %141, %146 : vector<8x256xf32>
    %c4_71 = arith.constant 4 : index
    %c0_72 = arith.constant 0 : index
    %c0_73 = arith.constant 0 : index
    %148 = vector.load %arg4[%c4_71, %c0_72, %c0_73] : memref<9x8x256xf32, #tpu.memory_space<vmem>>, vector<1x8x256xf32>
    %149 = vector.shape_cast %148 : vector<1x8x256xf32> to vector<8x256xf32>
    %150 = arith.mulf %147, %149 : vector<8x256xf32>
    %c17_i32_74 = arith.constant 17 : i32
    %151 = tpu.dynamic_rotate %147 by %c17_i32_74 dim 1 : vector<8x256xf32>, i32 -> vector<8x256xf32>
    %c0_75 = arith.constant 0 : index
    %c0_76 = arith.constant 0 : index
    %c0_77 = arith.constant 0 : index
    %152 = vector.load %arg4[%c0_75, %c0_76, %c0_77] : memref<9x8x256xf32, #tpu.memory_space<vmem>>, vector<1x8x256xf32>
    %153 = vector.shape_cast %152 : vector<1x8x256xf32> to vector<8x256xf32>
    %154 = arith.mulf %151, %153 : vector<8x256xf32>
    %155 = arith.addf %150, %154 : vector<8x256xf32>
    %c16_i32_78 = arith.constant 16 : i32
    %156 = tpu.dynamic_rotate %147 by %c16_i32_78 dim 1 : vector<8x256xf32>, i32 -> vector<8x256xf32>
    %c1_79 = arith.constant 1 : index
    %c0_80 = arith.constant 0 : index
    %c0_81 = arith.constant 0 : index
    %157 = vector.load %arg4[%c1_79, %c0_80, %c0_81] : memref<9x8x256xf32, #tpu.memory_space<vmem>>, vector<1x8x256xf32>
    %158 = vector.shape_cast %157 : vector<1x8x256xf32> to vector<8x256xf32>
    %159 = arith.mulf %156, %158 : vector<8x256xf32>
    %160 = arith.addf %155, %159 : vector<8x256xf32>
    %c15_i32_82 = arith.constant 15 : i32
    %161 = tpu.dynamic_rotate %147 by %c15_i32_82 dim 1 : vector<8x256xf32>, i32 -> vector<8x256xf32>
    %c2_83 = arith.constant 2 : index
    %c0_84 = arith.constant 0 : index
    %c0_85 = arith.constant 0 : index
    %162 = vector.load %arg4[%c2_83, %c0_84, %c0_85] : memref<9x8x256xf32, #tpu.memory_space<vmem>>, vector<1x8x256xf32>
    %163 = vector.shape_cast %162 : vector<1x8x256xf32> to vector<8x256xf32>
    %164 = arith.mulf %161, %163 : vector<8x256xf32>
    %165 = arith.addf %160, %164 : vector<8x256xf32>
    %c1_i32_86 = arith.constant 1 : i32
    %166 = tpu.dynamic_rotate %147 by %c1_i32_86 dim 1 : vector<8x256xf32>, i32 -> vector<8x256xf32>
    %c3_87 = arith.constant 3 : index
    %c0_88 = arith.constant 0 : index
    %c0_89 = arith.constant 0 : index
    %167 = vector.load %arg4[%c3_87, %c0_88, %c0_89] : memref<9x8x256xf32, #tpu.memory_space<vmem>>, vector<1x8x256xf32>
    %168 = vector.shape_cast %167 : vector<1x8x256xf32> to vector<8x256xf32>
    %169 = arith.mulf %166, %168 : vector<8x256xf32>
    %170 = arith.addf %165, %169 : vector<8x256xf32>
    %c255_i32_90 = arith.constant 255 : i32
    %171 = tpu.dynamic_rotate %147 by %c255_i32_90 dim 1 : vector<8x256xf32>, i32 -> vector<8x256xf32>
    %c5_91 = arith.constant 5 : index
    %c0_92 = arith.constant 0 : index
    %c0_93 = arith.constant 0 : index
    %172 = vector.load %arg4[%c5_91, %c0_92, %c0_93] : memref<9x8x256xf32, #tpu.memory_space<vmem>>, vector<1x8x256xf32>
    %173 = vector.shape_cast %172 : vector<1x8x256xf32> to vector<8x256xf32>
    %174 = arith.mulf %171, %173 : vector<8x256xf32>
    %175 = arith.addf %170, %174 : vector<8x256xf32>
    %c241_i32_94 = arith.constant 241 : i32
    %176 = tpu.dynamic_rotate %147 by %c241_i32_94 dim 1 : vector<8x256xf32>, i32 -> vector<8x256xf32>
    %c6_95 = arith.constant 6 : index
    %c0_96 = arith.constant 0 : index
    %c0_97 = arith.constant 0 : index
    %177 = vector.load %arg4[%c6_95, %c0_96, %c0_97] : memref<9x8x256xf32, #tpu.memory_space<vmem>>, vector<1x8x256xf32>
    %178 = vector.shape_cast %177 : vector<1x8x256xf32> to vector<8x256xf32>
    %179 = arith.mulf %176, %178 : vector<8x256xf32>
    %180 = arith.addf %175, %179 : vector<8x256xf32>
    %c240_i32_98 = arith.constant 240 : i32
    %181 = tpu.dynamic_rotate %147 by %c240_i32_98 dim 1 : vector<8x256xf32>, i32 -> vector<8x256xf32>
    %c7_99 = arith.constant 7 : index
    %c0_100 = arith.constant 0 : index
    %c0_101 = arith.constant 0 : index
    %182 = vector.load %arg4[%c7_99, %c0_100, %c0_101] : memref<9x8x256xf32, #tpu.memory_space<vmem>>, vector<1x8x256xf32>
    %183 = vector.shape_cast %182 : vector<1x8x256xf32> to vector<8x256xf32>
    %184 = arith.mulf %181, %183 : vector<8x256xf32>
    %185 = arith.addf %180, %184 : vector<8x256xf32>
    %c239_i32_102 = arith.constant 239 : i32
    %186 = tpu.dynamic_rotate %147 by %c239_i32_102 dim 1 : vector<8x256xf32>, i32 -> vector<8x256xf32>
    %c8_103 = arith.constant 8 : index
    %c0_104 = arith.constant 0 : index
    %c0_105 = arith.constant 0 : index
    %187 = vector.load %arg4[%c8_103, %c0_104, %c0_105] : memref<9x8x256xf32, #tpu.memory_space<vmem>>, vector<1x8x256xf32>
    %188 = vector.shape_cast %187 : vector<1x8x256xf32> to vector<8x256xf32>
    %189 = arith.mulf %186, %188 : vector<8x256xf32>
    %190 = arith.addf %185, %189 : vector<8x256xf32>
    %c0_106 = arith.constant 0 : index
    %c0_107 = arith.constant 0 : index
    %191 = vector.load %arg5[%c0_106, %c0_107] : memref<8x1xf32, #tpu.memory_space<vmem>>, vector<8x1xf32>
    %192 = vector.broadcast %191 : vector<8x1xf32> to vector<8x256xf32>
    %193 = arith.addf %190, %192 : vector<8x256xf32>
    %cst_108 = arith.constant 5.000000e-01 : f32
    %194 = vector.broadcast %cst_108 : f32 to vector<8x256xf32>
    %195 = arith.mulf %194, %193 : vector<8x256xf32>
    %cst_109 = arith.constant 0.707106769 : f32
    %196 = vector.broadcast %cst_109 : f32 to vector<8x256xf32>
    %197 = arith.mulf %193, %196 : vector<8x256xf32>
    %198 = math.erf %197 : vector<8x256xf32>
    %cst_110 = arith.constant 1.000000e+00 : f32
    %199 = vector.broadcast %cst_110 : f32 to vector<8x256xf32>
    %200 = arith.addf %199, %198 : vector<8x256xf32>
    %201 = arith.mulf %195, %200 : vector<8x256xf32>
    %c0_111 = arith.constant 0 : index
    %c0_112 = arith.constant 0 : index
    %202 = vector.load %arg7[%c0_111, %c0_112] : memref<32x1xf32, #tpu.memory_space<vmem>>, vector<32x1xf32>
    %c1_113 = arith.constant 1 : index
    %c0_114 = arith.constant 0 : index
    %c0_115 = arith.constant 0 : index
    %203 = vector.load %arg1[%c1_113, %c0_114, %c0_115] : memref<4x32x256xf32, #tpu.memory_space<vmem>>, vector<1x32x256xf32>
    %204 = vector.shape_cast %203 : vector<1x32x256xf32> to vector<32x256xf32>
    %205 = vector.broadcast %202 : vector<32x1xf32> to vector<32x256xf32>
    %206 = arith.addf %205, %204 : vector<32x256xf32>
    %c0_116 = arith.constant 0 : index
    %c0_117 = arith.constant 0 : index
    %207 = vector.load %arg6[%c0_116, %c0_117] : memref<32x8xf32, #tpu.memory_space<vmem>>, vector<32x1xf32>
    %208 = vector.extract_strided_slice %201 {offsets = [0, 0], sizes = [1, 256], strides = [1, 1]} : vector<8x256xf32> to vector<1x256xf32>
    %209 = vector.broadcast %207 : vector<32x1xf32> to vector<32x256xf32>
    %210 = vector.broadcast %208 : vector<1x256xf32> to vector<32x256xf32>
    %211 = arith.mulf %209, %210 : vector<32x256xf32>
    %212 = arith.addf %206, %211 : vector<32x256xf32>
    %c0_118 = arith.constant 0 : index
    %c1_119 = arith.constant 1 : index
    %213 = vector.load %arg6[%c0_118, %c1_119] : memref<32x8xf32, #tpu.memory_space<vmem>>, vector<32x1xf32>
    %214 = vector.extract_strided_slice %201 {offsets = [1, 0], sizes = [1, 256], strides = [1, 1]} : vector<8x256xf32> to vector<1x256xf32>
    %215 = vector.broadcast %213 : vector<32x1xf32> to vector<32x256xf32>
    %216 = vector.broadcast %214 : vector<1x256xf32> to vector<32x256xf32>
    %217 = arith.mulf %215, %216 : vector<32x256xf32>
    %218 = arith.addf %212, %217 : vector<32x256xf32>
    %c0_120 = arith.constant 0 : index
    %c2_121 = arith.constant 2 : index
    %219 = vector.load %arg6[%c0_120, %c2_121] : memref<32x8xf32, #tpu.memory_space<vmem>>, vector<32x1xf32>
    %220 = vector.extract_strided_slice %201 {offsets = [2, 0], sizes = [1, 256], strides = [1, 1]} : vector<8x256xf32> to vector<1x256xf32>
    %221 = vector.broadcast %219 : vector<32x1xf32> to vector<32x256xf32>
    %222 = vector.broadcast %220 : vector<1x256xf32> to vector<32x256xf32>
    %223 = arith.mulf %221, %222 : vector<32x256xf32>
    %224 = arith.addf %218, %223 : vector<32x256xf32>
    %c0_122 = arith.constant 0 : index
    %c3_123 = arith.constant 3 : index
    %225 = vector.load %arg6[%c0_122, %c3_123] : memref<32x8xf32, #tpu.memory_space<vmem>>, vector<32x1xf32>
    %226 = vector.extract_strided_slice %201 {offsets = [3, 0], sizes = [1, 256], strides = [1, 1]} : vector<8x256xf32> to vector<1x256xf32>
    %227 = vector.broadcast %225 : vector<32x1xf32> to vector<32x256xf32>
    %228 = vector.broadcast %226 : vector<1x256xf32> to vector<32x256xf32>
    %229 = arith.mulf %227, %228 : vector<32x256xf32>
    %230 = arith.addf %224, %229 : vector<32x256xf32>
    %c0_124 = arith.constant 0 : index
    %c4_125 = arith.constant 4 : index
    %231 = vector.load %arg6[%c0_124, %c4_125] : memref<32x8xf32, #tpu.memory_space<vmem>>, vector<32x1xf32>
    %232 = vector.extract_strided_slice %201 {offsets = [4, 0], sizes = [1, 256], strides = [1, 1]} : vector<8x256xf32> to vector<1x256xf32>
    %233 = vector.broadcast %231 : vector<32x1xf32> to vector<32x256xf32>
    %234 = vector.broadcast %232 : vector<1x256xf32> to vector<32x256xf32>
    %235 = arith.mulf %233, %234 : vector<32x256xf32>
    %236 = arith.addf %230, %235 : vector<32x256xf32>
    %c0_126 = arith.constant 0 : index
    %c5_127 = arith.constant 5 : index
    %237 = vector.load %arg6[%c0_126, %c5_127] : memref<32x8xf32, #tpu.memory_space<vmem>>, vector<32x1xf32>
    %238 = vector.extract_strided_slice %201 {offsets = [5, 0], sizes = [1, 256], strides = [1, 1]} : vector<8x256xf32> to vector<1x256xf32>
    %239 = vector.broadcast %237 : vector<32x1xf32> to vector<32x256xf32>
    %240 = vector.broadcast %238 : vector<1x256xf32> to vector<32x256xf32>
    %241 = arith.mulf %239, %240 : vector<32x256xf32>
    %242 = arith.addf %236, %241 : vector<32x256xf32>
    %c0_128 = arith.constant 0 : index
    %c6_129 = arith.constant 6 : index
    %243 = vector.load %arg6[%c0_128, %c6_129] : memref<32x8xf32, #tpu.memory_space<vmem>>, vector<32x1xf32>
    %244 = vector.extract_strided_slice %201 {offsets = [6, 0], sizes = [1, 256], strides = [1, 1]} : vector<8x256xf32> to vector<1x256xf32>
    %245 = vector.broadcast %243 : vector<32x1xf32> to vector<32x256xf32>
    %246 = vector.broadcast %244 : vector<1x256xf32> to vector<32x256xf32>
    %247 = arith.mulf %245, %246 : vector<32x256xf32>
    %248 = arith.addf %242, %247 : vector<32x256xf32>
    %c0_130 = arith.constant 0 : index
    %c7_131 = arith.constant 7 : index
    %249 = vector.load %arg6[%c0_130, %c7_131] : memref<32x8xf32, #tpu.memory_space<vmem>>, vector<32x1xf32>
    %250 = vector.extract_strided_slice %201 {offsets = [7, 0], sizes = [1, 256], strides = [1, 1]} : vector<8x256xf32> to vector<1x256xf32>
    %251 = vector.broadcast %249 : vector<32x1xf32> to vector<32x256xf32>
    %252 = vector.broadcast %250 : vector<1x256xf32> to vector<32x256xf32>
    %253 = arith.mulf %251, %252 : vector<32x256xf32>
    %254 = arith.addf %248, %253 : vector<32x256xf32>
    %cst_132 = arith.constant 5.000000e-01 : f32
    %255 = vector.broadcast %cst_132 : f32 to vector<32x256xf32>
    %256 = arith.mulf %255, %254 : vector<32x256xf32>
    %cst_133 = arith.constant 0.707106769 : f32
    %257 = vector.broadcast %cst_133 : f32 to vector<32x256xf32>
    %258 = arith.mulf %254, %257 : vector<32x256xf32>
    %259 = math.erf %258 : vector<32x256xf32>
    %cst_134 = arith.constant 1.000000e+00 : f32
    %260 = vector.broadcast %cst_134 : f32 to vector<32x256xf32>
    %261 = arith.addf %260, %259 : vector<32x256xf32>
    %262 = arith.mulf %256, %261 : vector<32x256xf32>
    %c1_135 = arith.constant 1 : index
    %c0_136 = arith.constant 0 : index
    %c0_137 = arith.constant 0 : index
    %263 = vector.load %arg8[%c1_135, %c0_136, %c0_137] : memref<4x32x256xf32, #tpu.memory_space<vmem>>, vector<1x32x256xf32>
    %264 = vector.shape_cast %263 : vector<1x32x256xf32> to vector<32x256xf32>
    %265 = vector.shape_cast %262 : vector<32x256xf32> to vector<1x32x256xf32>
    tpu.vector_store %arg8[%c1_135, %c0_136, %c0_137], %265 {strides = array<i32>} : memref<4x32x256xf32, #tpu.memory_space<vmem>>, vector<1x32x256xf32>,
    %c0_138 = arith.constant 0 : index
    %c0_139 = arith.constant 0 : index
    %266 = vector.load %arg2[%c0_138, %c0_139] : memref<8x32xf32, #tpu.memory_space<vmem>>, vector<8x32xf32>
    %c2_140 = arith.constant 2 : index
    %c0_141 = arith.constant 0 : index
    %c0_142 = arith.constant 0 : index
    %267 = vector.load %arg1[%c2_140, %c0_141, %c0_142] : memref<4x32x256xf32, #tpu.memory_space<vmem>>, vector<1x32x256xf32>
    %268 = vector.shape_cast %267 : vector<1x32x256xf32> to vector<32x256xf32>
    %cst_143 = arith.constant dense<0.000000e+00> : vector<8x256xf32>
    %269 = tpu.matmul %266, %268, %cst_143 {dimension_numbers = #tpu.dot_dimension_numbers<[1], [0], [0], [1], [0, 0, 1, 1], [], []>} : vector<8x32xf32>, vector<32x256xf32>, vector<8x256xf32> -> vector<8x256xf32>
    %c0_144 = arith.constant 0 : index
    %c0_145 = arith.constant 0 : index
    %270 = vector.load %arg3[%c0_144, %c0_145] : memref<8x1xf32, #tpu.memory_space<vmem>>, vector<8x1xf32>
    %271 = vector.broadcast %270 : vector<8x1xf32> to vector<8x256xf32>
    %272 = arith.addf %269, %271 : vector<8x256xf32>
    %cst_146 = arith.constant 5.000000e-01 : f32
    %273 = vector.broadcast %cst_146 : f32 to vector<8x256xf32>
    %274 = arith.mulf %273, %272 : vector<8x256xf32>
    %cst_147 = arith.constant 0.707106769 : f32
    %275 = vector.broadcast %cst_147 : f32 to vector<8x256xf32>
    %276 = arith.mulf %272, %275 : vector<8x256xf32>
    %277 = math.erf %276 : vector<8x256xf32>
    %cst_148 = arith.constant 1.000000e+00 : f32
    %278 = vector.broadcast %cst_148 : f32 to vector<8x256xf32>
    %279 = arith.addf %278, %277 : vector<8x256xf32>
    %280 = arith.mulf %274, %279 : vector<8x256xf32>
    %c4_149 = arith.constant 4 : index
    %c0_150 = arith.constant 0 : index
    %c0_151 = arith.constant 0 : index
    %281 = vector.load %arg4[%c4_149, %c0_150, %c0_151] : memref<9x8x256xf32, #tpu.memory_space<vmem>>, vector<1x8x256xf32>
    %282 = vector.shape_cast %281 : vector<1x8x256xf32> to vector<8x256xf32>
    %283 = arith.mulf %280, %282 : vector<8x256xf32>
    %c17_i32_152 = arith.constant 17 : i32
    %284 = tpu.dynamic_rotate %280 by %c17_i32_152 dim 1 : vector<8x256xf32>, i32 -> vector<8x256xf32>
    %c0_153 = arith.constant 0 : index
    %c0_154 = arith.constant 0 : index
    %c0_155 = arith.constant 0 : index
    %285 = vector.load %arg4[%c0_153, %c0_154, %c0_155] : memref<9x8x256xf32, #tpu.memory_space<vmem>>, vector<1x8x256xf32>
    %286 = vector.shape_cast %285 : vector<1x8x256xf32> to vector<8x256xf32>
    %287 = arith.mulf %284, %286 : vector<8x256xf32>
    %288 = arith.addf %283, %287 : vector<8x256xf32>
    %c16_i32_156 = arith.constant 16 : i32
    %289 = tpu.dynamic_rotate %280 by %c16_i32_156 dim 1 : vector<8x256xf32>, i32 -> vector<8x256xf32>
    %c1_157 = arith.constant 1 : index
    %c0_158 = arith.constant 0 : index
    %c0_159 = arith.constant 0 : index
    %290 = vector.load %arg4[%c1_157, %c0_158, %c0_159] : memref<9x8x256xf32, #tpu.memory_space<vmem>>, vector<1x8x256xf32>
    %291 = vector.shape_cast %290 : vector<1x8x256xf32> to vector<8x256xf32>
    %292 = arith.mulf %289, %291 : vector<8x256xf32>
    %293 = arith.addf %288, %292 : vector<8x256xf32>
    %c15_i32_160 = arith.constant 15 : i32
    %294 = tpu.dynamic_rotate %280 by %c15_i32_160 dim 1 : vector<8x256xf32>, i32 -> vector<8x256xf32>
    %c2_161 = arith.constant 2 : index
    %c0_162 = arith.constant 0 : index
    %c0_163 = arith.constant 0 : index
    %295 = vector.load %arg4[%c2_161, %c0_162, %c0_163] : memref<9x8x256xf32, #tpu.memory_space<vmem>>, vector<1x8x256xf32>
    %296 = vector.shape_cast %295 : vector<1x8x256xf32> to vector<8x256xf32>
    %297 = arith.mulf %294, %296 : vector<8x256xf32>
    %298 = arith.addf %293, %297 : vector<8x256xf32>
    %c1_i32_164 = arith.constant 1 : i32
    %299 = tpu.dynamic_rotate %280 by %c1_i32_164 dim 1 : vector<8x256xf32>, i32 -> vector<8x256xf32>
    %c3_165 = arith.constant 3 : index
    %c0_166 = arith.constant 0 : index
    %c0_167 = arith.constant 0 : index
    %300 = vector.load %arg4[%c3_165, %c0_166, %c0_167] : memref<9x8x256xf32, #tpu.memory_space<vmem>>, vector<1x8x256xf32>
    %301 = vector.shape_cast %300 : vector<1x8x256xf32> to vector<8x256xf32>
    %302 = arith.mulf %299, %301 : vector<8x256xf32>
    %303 = arith.addf %298, %302 : vector<8x256xf32>
    %c255_i32_168 = arith.constant 255 : i32
    %304 = tpu.dynamic_rotate %280 by %c255_i32_168 dim 1 : vector<8x256xf32>, i32 -> vector<8x256xf32>
    %c5_169 = arith.constant 5 : index
    %c0_170 = arith.constant 0 : index
    %c0_171 = arith.constant 0 : index
    %305 = vector.load %arg4[%c5_169, %c0_170, %c0_171] : memref<9x8x256xf32, #tpu.memory_space<vmem>>, vector<1x8x256xf32>
    %306 = vector.shape_cast %305 : vector<1x8x256xf32> to vector<8x256xf32>
    %307 = arith.mulf %304, %306 : vector<8x256xf32>
    %308 = arith.addf %303, %307 : vector<8x256xf32>
    %c241_i32_172 = arith.constant 241 : i32
    %309 = tpu.dynamic_rotate %280 by %c241_i32_172 dim 1 : vector<8x256xf32>, i32 -> vector<8x256xf32>
    %c6_173 = arith.constant 6 : index
    %c0_174 = arith.constant 0 : index
    %c0_175 = arith.constant 0 : index
    %310 = vector.load %arg4[%c6_173, %c0_174, %c0_175] : memref<9x8x256xf32, #tpu.memory_space<vmem>>, vector<1x8x256xf32>
    %311 = vector.shape_cast %310 : vector<1x8x256xf32> to vector<8x256xf32>
    %312 = arith.mulf %309, %311 : vector<8x256xf32>
    %313 = arith.addf %308, %312 : vector<8x256xf32>
    %c240_i32_176 = arith.constant 240 : i32
    %314 = tpu.dynamic_rotate %280 by %c240_i32_176 dim 1 : vector<8x256xf32>, i32 -> vector<8x256xf32>
    %c7_177 = arith.constant 7 : index
    %c0_178 = arith.constant 0 : index
    %c0_179 = arith.constant 0 : index
    %315 = vector.load %arg4[%c7_177, %c0_178, %c0_179] : memref<9x8x256xf32, #tpu.memory_space<vmem>>, vector<1x8x256xf32>
    %316 = vector.shape_cast %315 : vector<1x8x256xf32> to vector<8x256xf32>
    %317 = arith.mulf %314, %316 : vector<8x256xf32>
    %318 = arith.addf %313, %317 : vector<8x256xf32>
    %c239_i32_180 = arith.constant 239 : i32
    %319 = tpu.dynamic_rotate %280 by %c239_i32_180 dim 1 : vector<8x256xf32>, i32 -> vector<8x256xf32>
    %c8_181 = arith.constant 8 : index
    %c0_182 = arith.constant 0 : index
    %c0_183 = arith.constant 0 : index
    %320 = vector.load %arg4[%c8_181, %c0_182, %c0_183] : memref<9x8x256xf32, #tpu.memory_space<vmem>>, vector<1x8x256xf32>
    %321 = vector.shape_cast %320 : vector<1x8x256xf32> to vector<8x256xf32>
    %322 = arith.mulf %319, %321 : vector<8x256xf32>
    %323 = arith.addf %318, %322 : vector<8x256xf32>
    %c0_184 = arith.constant 0 : index
    %c0_185 = arith.constant 0 : index
    %324 = vector.load %arg5[%c0_184, %c0_185] : memref<8x1xf32, #tpu.memory_space<vmem>>, vector<8x1xf32>
    %325 = vector.broadcast %324 : vector<8x1xf32> to vector<8x256xf32>
    %326 = arith.addf %323, %325 : vector<8x256xf32>
    %cst_186 = arith.constant 5.000000e-01 : f32
    %327 = vector.broadcast %cst_186 : f32 to vector<8x256xf32>
    %328 = arith.mulf %327, %326 : vector<8x256xf32>
    %cst_187 = arith.constant 0.707106769 : f32
    %329 = vector.broadcast %cst_187 : f32 to vector<8x256xf32>
    %330 = arith.mulf %326, %329 : vector<8x256xf32>
    %331 = math.erf %330 : vector<8x256xf32>
    %cst_188 = arith.constant 1.000000e+00 : f32
    %332 = vector.broadcast %cst_188 : f32 to vector<8x256xf32>
    %333 = arith.addf %332, %331 : vector<8x256xf32>
    %334 = arith.mulf %328, %333 : vector<8x256xf32>
    %c0_189 = arith.constant 0 : index
    %c0_190 = arith.constant 0 : index
    %335 = vector.load %arg7[%c0_189, %c0_190] : memref<32x1xf32, #tpu.memory_space<vmem>>, vector<32x1xf32>
    %c2_191 = arith.constant 2 : index
    %c0_192 = arith.constant 0 : index
    %c0_193 = arith.constant 0 : index
    %336 = vector.load %arg1[%c2_191, %c0_192, %c0_193] : memref<4x32x256xf32, #tpu.memory_space<vmem>>, vector<1x32x256xf32>
    %337 = vector.shape_cast %336 : vector<1x32x256xf32> to vector<32x256xf32>
    %338 = vector.broadcast %335 : vector<32x1xf32> to vector<32x256xf32>
    %339 = arith.addf %338, %337 : vector<32x256xf32>
    %c0_194 = arith.constant 0 : index
    %c0_195 = arith.constant 0 : index
    %340 = vector.load %arg6[%c0_194, %c0_195] : memref<32x8xf32, #tpu.memory_space<vmem>>, vector<32x1xf32>
    %341 = vector.extract_strided_slice %334 {offsets = [0, 0], sizes = [1, 256], strides = [1, 1]} : vector<8x256xf32> to vector<1x256xf32>
    %342 = vector.broadcast %340 : vector<32x1xf32> to vector<32x256xf32>
    %343 = vector.broadcast %341 : vector<1x256xf32> to vector<32x256xf32>
    %344 = arith.mulf %342, %343 : vector<32x256xf32>
    %345 = arith.addf %339, %344 : vector<32x256xf32>
    %c0_196 = arith.constant 0 : index
    %c1_197 = arith.constant 1 : index
    %346 = vector.load %arg6[%c0_196, %c1_197] : memref<32x8xf32, #tpu.memory_space<vmem>>, vector<32x1xf32>
    %347 = vector.extract_strided_slice %334 {offsets = [1, 0], sizes = [1, 256], strides = [1, 1]} : vector<8x256xf32> to vector<1x256xf32>
    %348 = vector.broadcast %346 : vector<32x1xf32> to vector<32x256xf32>
    %349 = vector.broadcast %347 : vector<1x256xf32> to vector<32x256xf32>
    %350 = arith.mulf %348, %349 : vector<32x256xf32>
    %351 = arith.addf %345, %350 : vector<32x256xf32>
    %c0_198 = arith.constant 0 : index
    %c2_199 = arith.constant 2 : index
    %352 = vector.load %arg6[%c0_198, %c2_199] : memref<32x8xf32, #tpu.memory_space<vmem>>, vector<32x1xf32>
    %353 = vector.extract_strided_slice %334 {offsets = [2, 0], sizes = [1, 256], strides = [1, 1]} : vector<8x256xf32> to vector<1x256xf32>
    %354 = vector.broadcast %352 : vector<32x1xf32> to vector<32x256xf32>
    %355 = vector.broadcast %353 : vector<1x256xf32> to vector<32x256xf32>
    %356 = arith.mulf %354, %355 : vector<32x256xf32>
    %357 = arith.addf %351, %356 : vector<32x256xf32>
    %c0_200 = arith.constant 0 : index
    %c3_201 = arith.constant 3 : index
    %358 = vector.load %arg6[%c0_200, %c3_201] : memref<32x8xf32, #tpu.memory_space<vmem>>, vector<32x1xf32>
    %359 = vector.extract_strided_slice %334 {offsets = [3, 0], sizes = [1, 256], strides = [1, 1]} : vector<8x256xf32> to vector<1x256xf32>
    %360 = vector.broadcast %358 : vector<32x1xf32> to vector<32x256xf32>
    %361 = vector.broadcast %359 : vector<1x256xf32> to vector<32x256xf32>
    %362 = arith.mulf %360, %361 : vector<32x256xf32>
    %363 = arith.addf %357, %362 : vector<32x256xf32>
    %c0_202 = arith.constant 0 : index
    %c4_203 = arith.constant 4 : index
    %364 = vector.load %arg6[%c0_202, %c4_203] : memref<32x8xf32, #tpu.memory_space<vmem>>, vector<32x1xf32>
    %365 = vector.extract_strided_slice %334 {offsets = [4, 0], sizes = [1, 256], strides = [1, 1]} : vector<8x256xf32> to vector<1x256xf32>
    %366 = vector.broadcast %364 : vector<32x1xf32> to vector<32x256xf32>
    %367 = vector.broadcast %365 : vector<1x256xf32> to vector<32x256xf32>
    %368 = arith.mulf %366, %367 : vector<32x256xf32>
    %369 = arith.addf %363, %368 : vector<32x256xf32>
    %c0_204 = arith.constant 0 : index
    %c5_205 = arith.constant 5 : index
    %370 = vector.load %arg6[%c0_204, %c5_205] : memref<32x8xf32, #tpu.memory_space<vmem>>, vector<32x1xf32>
    %371 = vector.extract_strided_slice %334 {offsets = [5, 0], sizes = [1, 256], strides = [1, 1]} : vector<8x256xf32> to vector<1x256xf32>
    %372 = vector.broadcast %370 : vector<32x1xf32> to vector<32x256xf32>
    %373 = vector.broadcast %371 : vector<1x256xf32> to vector<32x256xf32>
    %374 = arith.mulf %372, %373 : vector<32x256xf32>
    %375 = arith.addf %369, %374 : vector<32x256xf32>
    %c0_206 = arith.constant 0 : index
    %c6_207 = arith.constant 6 : index
    %376 = vector.load %arg6[%c0_206, %c6_207] : memref<32x8xf32, #tpu.memory_space<vmem>>, vector<32x1xf32>
    %377 = vector.extract_strided_slice %334 {offsets = [6, 0], sizes = [1, 256], strides = [1, 1]} : vector<8x256xf32> to vector<1x256xf32>
    %378 = vector.broadcast %376 : vector<32x1xf32> to vector<32x256xf32>
    %379 = vector.broadcast %377 : vector<1x256xf32> to vector<32x256xf32>
    %380 = arith.mulf %378, %379 : vector<32x256xf32>
    %381 = arith.addf %375, %380 : vector<32x256xf32>
    %c0_208 = arith.constant 0 : index
    %c7_209 = arith.constant 7 : index
    %382 = vector.load %arg6[%c0_208, %c7_209] : memref<32x8xf32, #tpu.memory_space<vmem>>, vector<32x1xf32>
    %383 = vector.extract_strided_slice %334 {offsets = [7, 0], sizes = [1, 256], strides = [1, 1]} : vector<8x256xf32> to vector<1x256xf32>
    %384 = vector.broadcast %382 : vector<32x1xf32> to vector<32x256xf32>
    %385 = vector.broadcast %383 : vector<1x256xf32> to vector<32x256xf32>
    %386 = arith.mulf %384, %385 : vector<32x256xf32>
    %387 = arith.addf %381, %386 : vector<32x256xf32>
    %cst_210 = arith.constant 5.000000e-01 : f32
    %388 = vector.broadcast %cst_210 : f32 to vector<32x256xf32>
    %389 = arith.mulf %388, %387 : vector<32x256xf32>
    %cst_211 = arith.constant 0.707106769 : f32
    %390 = vector.broadcast %cst_211 : f32 to vector<32x256xf32>
    %391 = arith.mulf %387, %390 : vector<32x256xf32>
    %392 = math.erf %391 : vector<32x256xf32>
    %cst_212 = arith.constant 1.000000e+00 : f32
    %393 = vector.broadcast %cst_212 : f32 to vector<32x256xf32>
    %394 = arith.addf %393, %392 : vector<32x256xf32>
    %395 = arith.mulf %389, %394 : vector<32x256xf32>
    %c2_213 = arith.constant 2 : index
    %c0_214 = arith.constant 0 : index
    %c0_215 = arith.constant 0 : index
    %396 = vector.load %arg8[%c2_213, %c0_214, %c0_215] : memref<4x32x256xf32, #tpu.memory_space<vmem>>, vector<1x32x256xf32>
    %397 = vector.shape_cast %396 : vector<1x32x256xf32> to vector<32x256xf32>
    %398 = vector.shape_cast %395 : vector<32x256xf32> to vector<1x32x256xf32>
    tpu.vector_store %arg8[%c2_213, %c0_214, %c0_215], %398 {strides = array<i32>} : memref<4x32x256xf32, #tpu.memory_space<vmem>>, vector<1x32x256xf32>,
    %c0_216 = arith.constant 0 : index
    %c0_217 = arith.constant 0 : index
    %399 = vector.load %arg2[%c0_216, %c0_217] : memref<8x32xf32, #tpu.memory_space<vmem>>, vector<8x32xf32>
    %c3_218 = arith.constant 3 : index
    %c0_219 = arith.constant 0 : index
    %c0_220 = arith.constant 0 : index
    %400 = vector.load %arg1[%c3_218, %c0_219, %c0_220] : memref<4x32x256xf32, #tpu.memory_space<vmem>>, vector<1x32x256xf32>
    %401 = vector.shape_cast %400 : vector<1x32x256xf32> to vector<32x256xf32>
    %cst_221 = arith.constant dense<0.000000e+00> : vector<8x256xf32>
    %402 = tpu.matmul %399, %401, %cst_221 {dimension_numbers = #tpu.dot_dimension_numbers<[1], [0], [0], [1], [0, 0, 1, 1], [], []>} : vector<8x32xf32>, vector<32x256xf32>, vector<8x256xf32> -> vector<8x256xf32>
    %c0_222 = arith.constant 0 : index
    %c0_223 = arith.constant 0 : index
    %403 = vector.load %arg3[%c0_222, %c0_223] : memref<8x1xf32, #tpu.memory_space<vmem>>, vector<8x1xf32>
    %404 = vector.broadcast %403 : vector<8x1xf32> to vector<8x256xf32>
    %405 = arith.addf %402, %404 : vector<8x256xf32>
    %cst_224 = arith.constant 5.000000e-01 : f32
    %406 = vector.broadcast %cst_224 : f32 to vector<8x256xf32>
    %407 = arith.mulf %406, %405 : vector<8x256xf32>
    %cst_225 = arith.constant 0.707106769 : f32
    %408 = vector.broadcast %cst_225 : f32 to vector<8x256xf32>
    %409 = arith.mulf %405, %408 : vector<8x256xf32>
    %410 = math.erf %409 : vector<8x256xf32>
    %cst_226 = arith.constant 1.000000e+00 : f32
    %411 = vector.broadcast %cst_226 : f32 to vector<8x256xf32>
    %412 = arith.addf %411, %410 : vector<8x256xf32>
    %413 = arith.mulf %407, %412 : vector<8x256xf32>
    %c4_227 = arith.constant 4 : index
    %c0_228 = arith.constant 0 : index
    %c0_229 = arith.constant 0 : index
    %414 = vector.load %arg4[%c4_227, %c0_228, %c0_229] : memref<9x8x256xf32, #tpu.memory_space<vmem>>, vector<1x8x256xf32>
    %415 = vector.shape_cast %414 : vector<1x8x256xf32> to vector<8x256xf32>
    %416 = arith.mulf %413, %415 : vector<8x256xf32>
    %c17_i32_230 = arith.constant 17 : i32
    %417 = tpu.dynamic_rotate %413 by %c17_i32_230 dim 1 : vector<8x256xf32>, i32 -> vector<8x256xf32>
    %c0_231 = arith.constant 0 : index
    %c0_232 = arith.constant 0 : index
    %c0_233 = arith.constant 0 : index
    %418 = vector.load %arg4[%c0_231, %c0_232, %c0_233] : memref<9x8x256xf32, #tpu.memory_space<vmem>>, vector<1x8x256xf32>
    %419 = vector.shape_cast %418 : vector<1x8x256xf32> to vector<8x256xf32>
    %420 = arith.mulf %417, %419 : vector<8x256xf32>
    %421 = arith.addf %416, %420 : vector<8x256xf32>
    %c16_i32_234 = arith.constant 16 : i32
    %422 = tpu.dynamic_rotate %413 by %c16_i32_234 dim 1 : vector<8x256xf32>, i32 -> vector<8x256xf32>
    %c1_235 = arith.constant 1 : index
    %c0_236 = arith.constant 0 : index
    %c0_237 = arith.constant 0 : index
    %423 = vector.load %arg4[%c1_235, %c0_236, %c0_237] : memref<9x8x256xf32, #tpu.memory_space<vmem>>, vector<1x8x256xf32>
    %424 = vector.shape_cast %423 : vector<1x8x256xf32> to vector<8x256xf32>
    %425 = arith.mulf %422, %424 : vector<8x256xf32>
    %426 = arith.addf %421, %425 : vector<8x256xf32>
    %c15_i32_238 = arith.constant 15 : i32
    %427 = tpu.dynamic_rotate %413 by %c15_i32_238 dim 1 : vector<8x256xf32>, i32 -> vector<8x256xf32>
    %c2_239 = arith.constant 2 : index
    %c0_240 = arith.constant 0 : index
    %c0_241 = arith.constant 0 : index
    %428 = vector.load %arg4[%c2_239, %c0_240, %c0_241] : memref<9x8x256xf32, #tpu.memory_space<vmem>>, vector<1x8x256xf32>
    %429 = vector.shape_cast %428 : vector<1x8x256xf32> to vector<8x256xf32>
    %430 = arith.mulf %427, %429 : vector<8x256xf32>
    %431 = arith.addf %426, %430 : vector<8x256xf32>
    %c1_i32_242 = arith.constant 1 : i32
    %432 = tpu.dynamic_rotate %413 by %c1_i32_242 dim 1 : vector<8x256xf32>, i32 -> vector<8x256xf32>
    %c3_243 = arith.constant 3 : index
    %c0_244 = arith.constant 0 : index
    %c0_245 = arith.constant 0 : index
    %433 = vector.load %arg4[%c3_243, %c0_244, %c0_245] : memref<9x8x256xf32, #tpu.memory_space<vmem>>, vector<1x8x256xf32>
    %434 = vector.shape_cast %433 : vector<1x8x256xf32> to vector<8x256xf32>
    %435 = arith.mulf %432, %434 : vector<8x256xf32>
    %436 = arith.addf %431, %435 : vector<8x256xf32>
    %c255_i32_246 = arith.constant 255 : i32
    %437 = tpu.dynamic_rotate %413 by %c255_i32_246 dim 1 : vector<8x256xf32>, i32 -> vector<8x256xf32>
    %c5_247 = arith.constant 5 : index
    %c0_248 = arith.constant 0 : index
    %c0_249 = arith.constant 0 : index
    %438 = vector.load %arg4[%c5_247, %c0_248, %c0_249] : memref<9x8x256xf32, #tpu.memory_space<vmem>>, vector<1x8x256xf32>
    %439 = vector.shape_cast %438 : vector<1x8x256xf32> to vector<8x256xf32>
    %440 = arith.mulf %437, %439 : vector<8x256xf32>
    %441 = arith.addf %436, %440 : vector<8x256xf32>
    %c241_i32_250 = arith.constant 241 : i32
    %442 = tpu.dynamic_rotate %413 by %c241_i32_250 dim 1 : vector<8x256xf32>, i32 -> vector<8x256xf32>
    %c6_251 = arith.constant 6 : index
    %c0_252 = arith.constant 0 : index
    %c0_253 = arith.constant 0 : index
    %443 = vector.load %arg4[%c6_251, %c0_252, %c0_253] : memref<9x8x256xf32, #tpu.memory_space<vmem>>, vector<1x8x256xf32>
    %444 = vector.shape_cast %443 : vector<1x8x256xf32> to vector<8x256xf32>
    %445 = arith.mulf %442, %444 : vector<8x256xf32>
    %446 = arith.addf %441, %445 : vector<8x256xf32>
    %c240_i32_254 = arith.constant 240 : i32
    %447 = tpu.dynamic_rotate %413 by %c240_i32_254 dim 1 : vector<8x256xf32>, i32 -> vector<8x256xf32>
    %c7_255 = arith.constant 7 : index
    %c0_256 = arith.constant 0 : index
    %c0_257 = arith.constant 0 : index
    %448 = vector.load %arg4[%c7_255, %c0_256, %c0_257] : memref<9x8x256xf32, #tpu.memory_space<vmem>>, vector<1x8x256xf32>
    %449 = vector.shape_cast %448 : vector<1x8x256xf32> to vector<8x256xf32>
    %450 = arith.mulf %447, %449 : vector<8x256xf32>
    %451 = arith.addf %446, %450 : vector<8x256xf32>
    %c239_i32_258 = arith.constant 239 : i32
    %452 = tpu.dynamic_rotate %413 by %c239_i32_258 dim 1 : vector<8x256xf32>, i32 -> vector<8x256xf32>
    %c8_259 = arith.constant 8 : index
    %c0_260 = arith.constant 0 : index
    %c0_261 = arith.constant 0 : index
    %453 = vector.load %arg4[%c8_259, %c0_260, %c0_261] : memref<9x8x256xf32, #tpu.memory_space<vmem>>, vector<1x8x256xf32>
    %454 = vector.shape_cast %453 : vector<1x8x256xf32> to vector<8x256xf32>
    %455 = arith.mulf %452, %454 : vector<8x256xf32>
    %456 = arith.addf %451, %455 : vector<8x256xf32>
    %c0_262 = arith.constant 0 : index
    %c0_263 = arith.constant 0 : index
    %457 = vector.load %arg5[%c0_262, %c0_263] : memref<8x1xf32, #tpu.memory_space<vmem>>, vector<8x1xf32>
    %458 = vector.broadcast %457 : vector<8x1xf32> to vector<8x256xf32>
    %459 = arith.addf %456, %458 : vector<8x256xf32>
    %cst_264 = arith.constant 5.000000e-01 : f32
    %460 = vector.broadcast %cst_264 : f32 to vector<8x256xf32>
    %461 = arith.mulf %460, %459 : vector<8x256xf32>
    %cst_265 = arith.constant 0.707106769 : f32
    %462 = vector.broadcast %cst_265 : f32 to vector<8x256xf32>
    %463 = arith.mulf %459, %462 : vector<8x256xf32>
    %464 = math.erf %463 : vector<8x256xf32>
    %cst_266 = arith.constant 1.000000e+00 : f32
    %465 = vector.broadcast %cst_266 : f32 to vector<8x256xf32>
    %466 = arith.addf %465, %464 : vector<8x256xf32>
    %467 = arith.mulf %461, %466 : vector<8x256xf32>
    %c0_267 = arith.constant 0 : index
    %c0_268 = arith.constant 0 : index
    %468 = vector.load %arg7[%c0_267, %c0_268] : memref<32x1xf32, #tpu.memory_space<vmem>>, vector<32x1xf32>
    %c3_269 = arith.constant 3 : index
    %c0_270 = arith.constant 0 : index
    %c0_271 = arith.constant 0 : index
    %469 = vector.load %arg1[%c3_269, %c0_270, %c0_271] : memref<4x32x256xf32, #tpu.memory_space<vmem>>, vector<1x32x256xf32>
    %470 = vector.shape_cast %469 : vector<1x32x256xf32> to vector<32x256xf32>
    %471 = vector.broadcast %468 : vector<32x1xf32> to vector<32x256xf32>
    %472 = arith.addf %471, %470 : vector<32x256xf32>
    %c0_272 = arith.constant 0 : index
    %c0_273 = arith.constant 0 : index
    %473 = vector.load %arg6[%c0_272, %c0_273] : memref<32x8xf32, #tpu.memory_space<vmem>>, vector<32x1xf32>
    %474 = vector.extract_strided_slice %467 {offsets = [0, 0], sizes = [1, 256], strides = [1, 1]} : vector<8x256xf32> to vector<1x256xf32>
    %475 = vector.broadcast %473 : vector<32x1xf32> to vector<32x256xf32>
    %476 = vector.broadcast %474 : vector<1x256xf32> to vector<32x256xf32>
    %477 = arith.mulf %475, %476 : vector<32x256xf32>
    %478 = arith.addf %472, %477 : vector<32x256xf32>
    %c0_274 = arith.constant 0 : index
    %c1_275 = arith.constant 1 : index
    %479 = vector.load %arg6[%c0_274, %c1_275] : memref<32x8xf32, #tpu.memory_space<vmem>>, vector<32x1xf32>
    %480 = vector.extract_strided_slice %467 {offsets = [1, 0], sizes = [1, 256], strides = [1, 1]} : vector<8x256xf32> to vector<1x256xf32>
    %481 = vector.broadcast %479 : vector<32x1xf32> to vector<32x256xf32>
    %482 = vector.broadcast %480 : vector<1x256xf32> to vector<32x256xf32>
    %483 = arith.mulf %481, %482 : vector<32x256xf32>
    %484 = arith.addf %478, %483 : vector<32x256xf32>
    %c0_276 = arith.constant 0 : index
    %c2_277 = arith.constant 2 : index
    %485 = vector.load %arg6[%c0_276, %c2_277] : memref<32x8xf32, #tpu.memory_space<vmem>>, vector<32x1xf32>
    %486 = vector.extract_strided_slice %467 {offsets = [2, 0], sizes = [1, 256], strides = [1, 1]} : vector<8x256xf32> to vector<1x256xf32>
    %487 = vector.broadcast %485 : vector<32x1xf32> to vector<32x256xf32>
    %488 = vector.broadcast %486 : vector<1x256xf32> to vector<32x256xf32>
    %489 = arith.mulf %487, %488 : vector<32x256xf32>
    %490 = arith.addf %484, %489 : vector<32x256xf32>
    %c0_278 = arith.constant 0 : index
    %c3_279 = arith.constant 3 : index
    %491 = vector.load %arg6[%c0_278, %c3_279] : memref<32x8xf32, #tpu.memory_space<vmem>>, vector<32x1xf32>
    %492 = vector.extract_strided_slice %467 {offsets = [3, 0], sizes = [1, 256], strides = [1, 1]} : vector<8x256xf32> to vector<1x256xf32>
    %493 = vector.broadcast %491 : vector<32x1xf32> to vector<32x256xf32>
    %494 = vector.broadcast %492 : vector<1x256xf32> to vector<32x256xf32>
    %495 = arith.mulf %493, %494 : vector<32x256xf32>
    %496 = arith.addf %490, %495 : vector<32x256xf32>
    %c0_280 = arith.constant 0 : index
    %c4_281 = arith.constant 4 : index
    %497 = vector.load %arg6[%c0_280, %c4_281] : memref<32x8xf32, #tpu.memory_space<vmem>>, vector<32x1xf32>
    %498 = vector.extract_strided_slice %467 {offsets = [4, 0], sizes = [1, 256], strides = [1, 1]} : vector<8x256xf32> to vector<1x256xf32>
    %499 = vector.broadcast %497 : vector<32x1xf32> to vector<32x256xf32>
    %500 = vector.broadcast %498 : vector<1x256xf32> to vector<32x256xf32>
    %501 = arith.mulf %499, %500 : vector<32x256xf32>
    %502 = arith.addf %496, %501 : vector<32x256xf32>
    %c0_282 = arith.constant 0 : index
    %c5_283 = arith.constant 5 : index
    %503 = vector.load %arg6[%c0_282, %c5_283] : memref<32x8xf32, #tpu.memory_space<vmem>>, vector<32x1xf32>
    %504 = vector.extract_strided_slice %467 {offsets = [5, 0], sizes = [1, 256], strides = [1, 1]} : vector<8x256xf32> to vector<1x256xf32>
    %505 = vector.broadcast %503 : vector<32x1xf32> to vector<32x256xf32>
    %506 = vector.broadcast %504 : vector<1x256xf32> to vector<32x256xf32>
    %507 = arith.mulf %505, %506 : vector<32x256xf32>
    %508 = arith.addf %502, %507 : vector<32x256xf32>
    %c0_284 = arith.constant 0 : index
    %c6_285 = arith.constant 6 : index
    %509 = vector.load %arg6[%c0_284, %c6_285] : memref<32x8xf32, #tpu.memory_space<vmem>>, vector<32x1xf32>
    %510 = vector.extract_strided_slice %467 {offsets = [6, 0], sizes = [1, 256], strides = [1, 1]} : vector<8x256xf32> to vector<1x256xf32>
    %511 = vector.broadcast %509 : vector<32x1xf32> to vector<32x256xf32>
    %512 = vector.broadcast %510 : vector<1x256xf32> to vector<32x256xf32>
    %513 = arith.mulf %511, %512 : vector<32x256xf32>
    %514 = arith.addf %508, %513 : vector<32x256xf32>
    %c0_286 = arith.constant 0 : index
    %c7_287 = arith.constant 7 : index
    %515 = vector.load %arg6[%c0_286, %c7_287] : memref<32x8xf32, #tpu.memory_space<vmem>>, vector<32x1xf32>
    %516 = vector.extract_strided_slice %467 {offsets = [7, 0], sizes = [1, 256], strides = [1, 1]} : vector<8x256xf32> to vector<1x256xf32>
    %517 = vector.broadcast %515 : vector<32x1xf32> to vector<32x256xf32>
    %518 = vector.broadcast %516 : vector<1x256xf32> to vector<32x256xf32>
    %519 = arith.mulf %517, %518 : vector<32x256xf32>
    %520 = arith.addf %514, %519 : vector<32x256xf32>
    %cst_288 = arith.constant 5.000000e-01 : f32
    %521 = vector.broadcast %cst_288 : f32 to vector<32x256xf32>
    %522 = arith.mulf %521, %520 : vector<32x256xf32>
    %cst_289 = arith.constant 0.707106769 : f32
    %523 = vector.broadcast %cst_289 : f32 to vector<32x256xf32>
    %524 = arith.mulf %520, %523 : vector<32x256xf32>
    %525 = math.erf %524 : vector<32x256xf32>
    %cst_290 = arith.constant 1.000000e+00 : f32
    %526 = vector.broadcast %cst_290 : f32 to vector<32x256xf32>
    %527 = arith.addf %526, %525 : vector<32x256xf32>
    %528 = arith.mulf %522, %527 : vector<32x256xf32>
    %c3_291 = arith.constant 3 : index
    %c0_292 = arith.constant 0 : index
    %c0_293 = arith.constant 0 : index
    %529 = vector.load %arg8[%c3_291, %c0_292, %c0_293] : memref<4x32x256xf32, #tpu.memory_space<vmem>>, vector<1x32x256xf32>
    %530 = vector.shape_cast %529 : vector<1x32x256xf32> to vector<32x256xf32>
    %531 = vector.shape_cast %528 : vector<32x256xf32> to vector<1x32x256xf32>
    tpu.vector_store %arg8[%c3_291, %c0_292, %c0_293], %531 {strides = array<i32>} : memref<4x32x256xf32, #tpu.memory_space<vmem>>, vector<1x32x256xf32>,
    return
  }
  func.func @transform_0(%arg0: i32) -> (i32, i32, i32) {
    %c0_i32 = arith.constant 0 : i32
    %c0_i32_0 = arith.constant 0 : i32
    %c0_i32_1 = arith.constant 0 : i32
    return %arg0, %c0_i32, %c0_i32_0 : i32, i32, i32
  }
  func.func @transform_1(%arg0: i32) -> (i32, i32) {
    %c0_i32 = arith.constant 0 : i32
    %c0_i32_0 = arith.constant 0 : i32
    %c0_i32_1 = arith.constant 0 : i32
    return %c0_i32, %c0_i32_0 : i32, i32
  }
  func.func @transform_2(%arg0: i32) -> (i32, i32) {
    %c0_i32 = arith.constant 0 : i32
    %c0_i32_0 = arith.constant 0 : i32
    %c0_i32_1 = arith.constant 0 : i32
    return %c0_i32, %c0_i32_0 : i32, i32
  }
  func.func @transform_3(%arg0: i32) -> (i32, i32, i32) {
    %c0_i32 = arith.constant 0 : i32
    %c0_i32_0 = arith.constant 0 : i32
    %c0_i32_1 = arith.constant 0 : i32
    %c0_i32_2 = arith.constant 0 : i32
    return %c0_i32, %c0_i32_0, %c0_i32_1 : i32, i32, i32
  }
  func.func @transform_4(%arg0: i32) -> (i32, i32) {
    %c0_i32 = arith.constant 0 : i32
    %c0_i32_0 = arith.constant 0 : i32
    %c0_i32_1 = arith.constant 0 : i32
    return %c0_i32, %c0_i32_0 : i32, i32
  }
  func.func @transform_5(%arg0: i32) -> (i32, i32) {
    %c0_i32 = arith.constant 0 : i32
    %c0_i32_0 = arith.constant 0 : i32
    %c0_i32_1 = arith.constant 0 : i32
    return %c0_i32, %c0_i32_0 : i32, i32
  }
  func.func @transform_6(%arg0: i32) -> (i32, i32) {
    %c0_i32 = arith.constant 0 : i32
    %c0_i32_0 = arith.constant 0 : i32
    %c0_i32_1 = arith.constant 0 : i32
    return %c0_i32, %c0_i32_0 : i32, i32
  }
  func.func @transform_7(%arg0: i32) -> (i32, i32, i32) {
    %c0_i32 = arith.constant 0 : i32
    %c0_i32_0 = arith.constant 0 : i32
    %c0_i32_1 = arith.constant 0 : i32
    return %arg0, %c0_i32, %c0_i32_0 : i32, i32, i32
  }
}

</mosaic_0001>

<bundles_post_ra>
// kernel: block_forward.1
= control target key start
LH: loop header
LB: loop body
LE: loop exit
PB: predicated region body
PF: predicated region fallthrough
CT: control target
= control target key end

     0   :  { %s3263_s24 = smov 0   ;;  %s5560_s0 = inlined_call_operand.vmem [shape: f32[8,32,256], index: 0, kind: input, shape index: {}]   ;;  %s5561_s1 = inlined_call_operand.vmem [shape: f32[8,32], index: 1, kind: input, shape index: {}]   ;;  %s5562_s2 = inlined_call_operand.vmem [shape: f32[8,1], index: 2, kind: input, shape index: {}]   ;;  %s5563_s3 = inlined_call_operand.vmem [shape: f32[9,8,256], index: 3, kind: input, shape index: {}]   ;;  %s5564_s4 = inlined_call_operand.vmem [shape: f32[8,1], index: 4, kind: input, shape index: {}]   ;;  %s5565_s5 = inlined_call_operand.vmem [shape: f32[32,8], index: 5, kind: input, shape index: {}]   ;;  %s5566_s6 = inlined_call_operand.vmem [shape: f32[32,1], index: 6, kind: input, shape index: {}]   ;;  %s5567_s7 = inlined_call_operand.vmem [shape: f32[8,32,256], index: 7, kind: output, shape index: {}]  }
   0x1 LB: > { %s2870_s25 = sadd.s32 4294967295, %s3204_s24   ;;  %p2874_p0 = scmp.ge.s32.totalorder %s3204_s24, 1  ;;  %s3204_s24 = sphi %s3263_s24, %s17_s24  }
   0x2   : > { %p239_p1 = scmp.lt.s32.totalorder %s3204_s24, 3 }
   0x4   : > { %p240_p2 = pnand %p2874_p0, %p239_p1 }
   0x6   : > { %243 = sbr.rel (%p240_p2) target bundleno = 1088 (0x440), region = 48 }
   0xb   : > { %v3274_v0 = vld [vmem:[%s5564_s4] sm:$0xff]  ;;  %s2875_s28 = sshll.u32 %s2870_s25, 2  ;;  %v5572_v1 = vmov 0   ;;  %v3207_v2 = vmov 0.0   ;;  %v3286_v4 = vld [vmem:[%s5566_s6 + $0x8] sm:$0xff]  ;;  %v3309_v6 = vld [vmem:[%s5566_s6 + $0x18] sm:$0xff] }
   0xc   : > { %3027 = vset.pattern.permute.xlu1 %v5572_v1  ;;  %p274_p3 = scmp.lt.s32.totalorder %s2875_s28, 7  ;;  %370 = vmatprep.mubr.f32.mxu0 %v3207_v2  ;;  %v3281_v3 = vld [vmem:[%s5562_s2] sm:$0xff]  ;;  %v3333_v16 = vld [vmem:[%s5565_s5 + $0x8] sm:$0xff]  ;;  %vm302_vm0 = vcmask 261120   ;;  %v525_v23 = vld [vmem:[%s5566_s6 + $0x10] sm:$0xff]  ;;  %v5582_v28 = vmov 1  }
   0xd   : > { %508 = vperm.xlu1 %3027, %v3274_v0   ;;  %1014 = vmatprep.mubr.f32.mxu1 %v3207_v2  ;;  %v3296_v5 = vld [vmem:[%s5566_s6] sm:$0xff]  ;;  %v3355_v24 = vld [vmem:[%s5565_s5 + $0x18] sm:$0xff]  ;;  %v3376_v29 = vld [vmem:[%s5565_s5 + $0x10] sm:$0xff]  ;;  %v5580_v30 = vmov 2   ;;  %v5578_v31 = vmov 3   ;;  %v5576_v32 = vmov 4  }
   0xe   : > { %s6012_s28 = smov (!%p274_p3, %s2875_s28), 7  ;;  %3026 = vset.pattern.permute.xlu0 %v5572_v1  ;;  %v3343_v20 = vld [vmem:[%s5561_s1] sm:$0xff]  ;;  %v5574_v33 = vmov 5   ;;  %v5570_v34 = vmov 6   ;;  %v5568_v35 = vmov 7   ;;  %s3215_s9 = smov 16  }
   0xf   : > { %299 = vperm.xlu0 %3026, %v3281_v3   ;;  %s2999_s10 = sshll.u32 %s6012_s28, 6  ;;  %v3368_v27 = vld [vmem:[%s5565_s5] sm:$0xff]  ;;  %s3216_s11 = smov 17  }
  0x10   : > { %s3304_s15 = scalar_lea.vmem %s5560_s0, %s2999_s10  ;;  %s3217_s12 = smov 15  }
  0x11   : > { %534 = vperm.xlu1 %3027, %v3286_v4   ;;  %v295_v7 = vld [vmem:[%s3304_s15 + $0x38] sm:$0xff]  ;;  %v294_v8 = vld [vmem:[%s3304_s15 + $0x30] sm:$0xff]  ;;  %v3314_v9 = vld [vmem:[%s3304_s15 + $0x28] sm:$0xff]  ;;  %s3218_s13 = smov 1   ;;  %s3219_s14 = smov 127  }
  0x12   : > { %330 = vmatprep.subr.mxu0 %v295_v7  ;;  %v3317_v10 = vld [vmem:[%s3304_s15 + $0x20] sm:$0xff]  ;;  %v291_v11 = vld [vmem:[%s3304_s15 + $0x18] sm:$0xff]  ;;  %v290_v13 = vld [vmem:[%s3304_s15 + $0x10] sm:$0xff]  ;;  %s3220_s16 = smov 113   ;;  %s3221_s17 = smov 112  }
  0x13   : > { %529 = vperm.xlu0 %3026, %v3296_v5   ;;  %331 = vmatpush1.msra.mxu0 %v294_v8  ;;  %v2905_v12 = vld [vmem:[%s3304_s15 + $0x78] sm:$0xff]  ;;  %v2904_v14 = vld [vmem:[%s3304_s15 + $0x70] sm:$0xff]  ;;  %v3327_v15 = vld [vmem:[%s3304_s15 + $0x68] sm:$0xff]  ;;  %s3222_s18 = smov 111   ;;  %s4196_s29 = scalar_lea.vmem %s5567_s7, %s2999_s10 }
  0x14   : > { %332 = vmatprep.subr.mxu0 %v3314_v9  ;;  %v289_v17 = vld [vmem:[%s3304_s15 + $0x8] sm:$0xff]  ;;  %974 = vmatprep.subr.mxu1 %v2905_v12  ;;  %v288_v18 = vld [vmem:[%s3304_s15] sm:$0xff]  ;;  %v2901_v21 = vld [vmem:[%s3304_s15 + $0x58] sm:$0xff] }
  0x15   : > { %544 = vperm.xlu1 %3027, %v3309_v6   ;;  %333 = vmatpush1.msra.mxu0 %v3317_v10  ;;  %v3338_v19 = vld [vmem:[%s3304_s15 + $0x60] sm:$0xff]  ;;  %v2900_v22 = vld [vmem:[%s3304_s15 + $0x50] sm:$0xff]  ;;  %v2899_v25 = vld [vmem:[%s3304_s15 + $0x48] sm:$0xff] }
  0x16   : > { %334 = vmatprep.subr.mxu0 %v291_v11  ;;  %975 = vmatpush1.msra.mxu1 %v2904_v14  ;;  %v2898_v26 = vld [vmem:[%s3304_s15 + $0x40] sm:$0xff]  ;;  %v2938_v36 = vld [vmem:[%s3304_s15 + $0xb8] sm:$0xff]  ;;  %v2937_v37 = vld [vmem:[%s3304_s15 + $0xb0] sm:$0xff] }
  0x17   : > { %335 = vmatpush1.msra.mxu0 %v290_v13  ;;  %976 = vmatprep.subr.mxu1 %v3327_v15  ;;  %v2936_v38 = vld [vmem:[%s3304_s15 + $0xa8] sm:$0xff]  ;;  %v2935_v39 = vld [vmem:[%s3304_s15 + $0xa0] sm:$0xff]  ;;  %v2934_v40 = vld [vmem:[%s3304_s15 + $0x98] sm:$0xff] }
  0x18   : > { %336 = vmatprep.subr.mxu0 %v289_v17  ;;  %977 = vmatpush1.msra.mxu1 %v3338_v19  ;;  %v2933_v41 = vld [vmem:[%s3304_s15 + $0x90] sm:$0xff]  ;;  %v2932_v42 = vld [vmem:[%s3304_s15 + $0x88] sm:$0xff]  ;;  %v2931_v43 = vld [vmem:[%s3304_s15 + $0x80] sm:$0xff] }
  0x19   : > { %566 = vperm.xlu1 %3027, %v3333_v16   ;;  %337 = vmatpush1.msra.mxu0 %v288_v18 }
  0x1a   : > { %2881 = vmatmul.mubr.msk.f32.vlgmr.msra.gmra.mxu0 %vm302_vm0, %v3343_v20  ;;  %978 = vmatprep.subr.mxu1 %v2901_v21 }
  0x1b   : > { %979 = vmatpush1.msra.mxu1 %v2900_v22  ;;  %539 = vperm.xlu0 %3026, %v525_v23  }
  0x1c   : > { %980 = vmatprep.subr.mxu1 %v2899_v25  ;;  %1641 = vmatprep.mubr.f32.mxu0 %v3207_v2 }
  0x1d   : > { %576 = vperm.xlu1 %3027, %v3355_v24   ;;  %981 = vmatpush1.msra.mxu1 %v2898_v26 }
  0x1e   : > { %2906 = vmatmul.mubr.msk.f32.vlgmr.msra.gmra.mxu1 %vm302_vm0, %v3343_v20  ;;  %1601 = vmatprep.subr.mxu0 %v2938_v36 }
  0x1f   : > { %561 = vperm.xlu0 %3026, %v3368_v27   ;;  %2268 = vmatprep.mubr.f32.mxu1 %v3207_v2 }
  0x20   : > { %1602 = vmatpush1.msra.mxu0 %v2937_v37 }
  0x21   : > { %3028 = vset.pattern.permute.xlu1 %v5582_v28  ;;  %1603 = vmatprep.subr.mxu0 %v2936_v38 }
  0x22   : > { %608 = vperm.xlu1 %3028, %v3333_v16   ;;  %1604 = vmatpush1.msra.mxu0 %v2935_v39 }
  0x23   : > { %571 = vperm.xlu0 %3026, %v3376_v29   ;;  %1605 = vmatprep.subr.mxu0 %v2934_v40 }
  0x24   : > { %1606 = vmatpush1.msra.mxu0 %v2933_v41 }
  0x25   : > { %1607 = vmatprep.subr.mxu0 %v2932_v42 }
  0x26   : > { %612 = vperm.xlu1 %3028, %v3376_v29   ;;  %1608 = vmatpush1.msra.mxu0 %v2931_v43 }
  0x27   : > { %1134 = vperm.xlu0 %3026, %v3274_v0   ;;  %2939 = vmatmul.mubr.msk.f32.vlgmr.msra.gmra.mxu0 %vm302_vm0, %v3343_v20 }
  0x2a   : > { %3029 = vset.pattern.permute.xlu1 %v5580_v30 }
  0x2b   : > { %644 = vperm.xlu1 %3029, %v3368_v27   ;;  %1165 = vperm.xlu0 %3026, %v525_v23  }
  0x2f   : > { %652 = vperm.xlu1 %3029, %v3376_v29   ;;  %1187 = vperm.xlu0 %3026, %v3368_v27  }
  0x33   : > { %656 = vperm.xlu1 %3029, %v3355_v24   ;;  %1197 = vperm.xlu0 %3026, %v3376_v29  }
  0x37   : > { %3030 = vset.pattern.permute.xlu1 %v5578_v31 }
  0x38   : > { %688 = vperm.xlu1 %3030, %v3333_v16  }
  0x3c   : > { %692 = vperm.xlu1 %3030, %v3376_v29  }
  0x40   : > { %3031 = vset.pattern.permute.xlu1 %v5576_v32 }
  0x41   : > { %724 = vperm.xlu1 %3031, %v3368_v27  }
  0x45   : > { %732 = vperm.xlu1 %3031, %v3376_v29  }
  0x49   : > { %736 = vperm.xlu1 %3031, %v3355_v24  }
  0x4d   : > { %3032 = vset.pattern.permute.xlu1 %v5574_v33 }
  0x4e   : > { %768 = vperm.xlu1 %3032, %v3333_v16  }
  0x52   : > { %772 = vperm.xlu1 %3032, %v3376_v29  }
  0x56   : > { %3033 = vset.pattern.permute.xlu1 %v5570_v34 }
  0x57   : > { %804 = vperm.xlu1 %3033, %v3368_v27  }
  0x5b   : > { %812 = vperm.xlu1 %3033, %v3376_v29  }
  0x5f   : > { %816 = vperm.xlu1 %3033, %v3355_v24  }
  0x63   : > { %3034 = vset.pattern.permute.xlu1 %v5568_v35 }
  0x64   : > { %848 = vperm.xlu1 %3034, %v3333_v16  }
  0x68   : > { %852 = vperm.xlu1 %3034, %v3376_v29  }
  0x6c   : > { %3035 = vset.pattern.permute.xlu1 %v5572_v1 }
  0x6d   : > { %944 = vperm.xlu1 %3035, %v3281_v3  }
  0x71   : > { %1155 = vperm.xlu1 %3035, %v3296_v5  }
  0x75   : > { %1160 = vperm.xlu1 %3035, %v3286_v4  }
  0x79   : > { %1170 = vperm.xlu1 %3035, %v3309_v6  }
  0x7d   : > { %1192 = vperm.xlu1 %3035, %v3333_v16  }
  0x81   : > { %1202 = vperm.xlu1 %3035, %v3355_v24  }
  0x85   : > { %3036 = vset.pattern.permute.xlu1 %v5582_v28 }
  0x86   : > { %1234 = vperm.xlu1 %3036, %v3333_v16  }
  0x88   : > { %v3423_v44 = vpop.permute.xlu1 %508 }
  0x8a   : > { %1238 = vperm.xlu1 %3036, %v3376_v29   ;;  %v300_v0 = vpop.permute.xlu0 %299 }
  0x8c   : > { %v3426_v45 = vpop.permute.xlu1 %534 }
  0x8d   : > { %5726 = vst [vmem:[#allocation2_spill] sm:$0xff] %v3426_v45  ;;  %v3686_v45 = vld [vmem:[%s5563_s3 + $0x18] sm:$0xff] }
  0x8e   : > { %3037 = vset.pattern.permute.xlu1 %v5580_v30  ;;  %v2970_v30 = vld [vmem:[%s3304_s15 + $0xf0] sm:$0xff] }
  0x8f   : > { %1270 = vperm.xlu1 %3037, %v3368_v27  }
  0x90   : > { %v3430_v46 = vpop.permute.xlu1 %544 }
  0x91   : > { %5727 = vst [vmem:[#allocation3_spill] sm:$0xff] %v3430_v46 }
  0x93   : > { %1278 = vperm.xlu1 %3037, %v3376_v29  }
  0x94   : > { %v3433_v47 = vpop.permute.xlu1 %566 }
  0x95   : > { %5728 = vst [vmem:[#allocation4_spill] sm:$0xff] %v3433_v47 }
  0x97   : > { %1282 = vperm.xlu1 %3037, %v3355_v24  }
  0x98   : > { %v3436_v48 = vpop.permute.xlu1 %576 }
  0x99   : > { %5729 = vst [vmem:[#allocation5_spill] sm:$0xff] %v3436_v48 }
  0x9b   : > { %3038 = vset.pattern.permute.xlu1 %v5578_v31  ;;  %v2971_v31 = vld [vmem:[%s3304_s15 + $0xf8] sm:$0xff] }
  0x9c   : > { %1314 = vperm.xlu1 %3038, %v3333_v16   ;;  %2228 = vmatprep.subr.mxu1 %v2971_v31  ;;  %v2185_v31 = vld [vmem:[%s5561_s1] sm:$0xff] }
  0x9d   : > { %v3440_v49 = vpop.permute.xlu1 %608  ;;  %2229 = vmatpush1.msra.mxu1 %v2970_v30 }
  0x9e   : > { %5730 = vst [vmem:[#allocation6_spill] sm:$0xff] %v3440_v49  ;;  %v3673_v49 = vld [vmem:[%s5563_s3 + $0x8] sm:$0xff] }
  0x9f   : > { %5762 = vst [vmem:[#allocation38_spill] sm:$0xff] %v3673_v49 }
  0xa0   : > { %1318 = vperm.xlu1 %3038, %v3376_v29  }
  0xa1   : > { %v3443_v50 = vpop.permute.xlu1 %612 }
  0xa4   : > { %3039 = vset.pattern.permute.xlu1 %v5576_v32 }
  0xa5   : > { %1350 = vperm.xlu1 %3039, %v3368_v27  }
  0xa6   : > { %v3447_v51 = vpop.permute.xlu1 %644 }
  0xa7   : > { %5731 = vst [vmem:[#allocation7_spill] sm:$0xff] %v3447_v51 }
  0xa9   : > { %1358 = vperm.xlu1 %3039, %v3376_v29  }
  0xaa   : > { %v3450_v52 = vpop.permute.xlu1 %652 }
  0xad   : > { %1362 = vperm.xlu1 %3039, %v3355_v24  }
  0xae   : > { %v3453_v53 = vpop.permute.xlu1 %656 }
  0xaf   : > { %5732 = vst [vmem:[#allocation8_spill] sm:$0xff] %v3453_v53 }
  0xb1   : > { %3040 = vset.pattern.permute.xlu1 %v5574_v33 }
  0xb2   : > { %1394 = vperm.xlu1 %3040, %v3333_v16  }
  0xb3   : > { %v3457_v54 = vpop.permute.xlu1 %688 }
  0xb4   : > { %5733 = vst [vmem:[#allocation9_spill] sm:$0xff] %v3457_v54 }
  0xb6   : > { %1398 = vperm.xlu1 %3040, %v3376_v29  }
  0xb7   : > { %v3460_v55 = vpop.permute.xlu1 %692 }
  0xba   : > { %3041 = vset.pattern.permute.xlu1 %v5570_v34 }
  0xbb   : > { %1430 = vperm.xlu1 %3041, %v3368_v27  }
  0xbc   : > { %v3464_v56 = vpop.permute.xlu1 %724 }
  0xbd   : > { %5734 = vst [vmem:[#allocation10_spill] sm:$0xff] %v3464_v56 }
  0xbf   : > { %1438 = vperm.xlu1 %3041, %v3376_v29  }
  0xc0   : > { %v3467_v57 = vpop.permute.xlu1 %732 }
  0xc3   : > { %1442 = vperm.xlu1 %3041, %v3355_v24  }
  0xc4   : > { %v3470_v58 = vpop.permute.xlu1 %736 }
  0xc5   : > { %5735 = vst [vmem:[#allocation11_spill] sm:$0xff] %v3470_v58 }
  0xc7   : > { %3042 = vset.pattern.permute.xlu1 %v5568_v35 }
  0xc9   : > { %v3473_v59 = vpop.permute.xlu1 %768 }
  0xca   : > { %5736 = vst [vmem:[#allocation12_spill] sm:$0xff] %v3473_v59 }
  0xcd   : > { %v3475_v60 = vpop.permute.xlu1 %772 }
  0xce   : > { %5737 = vst [vmem:[#allocation13_spill] sm:$0xff] %v3475_v60  ;;  %v3729_v60 = vld [vmem:[%s5563_s3 + $0x30] sm:$0xff] }
  0xd2   : > { %v3477_v61 = vpop.permute.xlu1 %804 }
  0xd3   : > { %5738 = vst [vmem:[#allocation14_spill] sm:$0xff] %v3477_v61  ;;  %v2968_v61 = vld [vmem:[%s3304_s15 + $0xe0] sm:$0xff] }
  0xd6   : > { %v3479_v62 = vpop.permute.xlu1 %812 }
  0xd7   : > { %5739 = vst [vmem:[#allocation15_spill] sm:$0xff] %v3479_v62 }
  0xda   : > { %v3481_v63 = vpop.permute.xlu1 %816  ;;  %v372_v2 = vpop.f32.mrf.mxu0 }
  0xdb   : > { %5740 = vst [vmem:[#allocation16_spill] sm:$0xff] %v3481_v63  ;;  %v373_v4 = vadd.f32 %v372_v2, %v300_v0 }
  0xdc   : > { %v374_v17 = vpop.f32.mrf.mxu0 }
  0xdd   : > { %v379_v5 = vmul.f32 0.70710677, %v373_v4  ;;  %v377_v18 = vmul.f32 0.5, %v373_v4  ;;  %v375_v22 = vadd.f32 %v374_v17, %v300_v0 }
  0xde   : > { %v1016_v8 = vpop.f32.mrf.mxu1 }
  0xdf   : > { %v3483_v6 = vpop.permute.xlu1 %848  ;;  %3068 = verf.f32 %v379_v5  ;;  %v380_v25 = vmul.f32 0.70710677, %v375_v22  ;;  %v378_v5 = vmul.f32 0.5, %v375_v22 }
  0xe0   : > { %5741 = vst [vmem:[#allocation17_spill] sm:$0xff] %v3483_v6  ;;  %v1018_v24 = vpop.f32.mrf.mxu1 }
  0xe3   : > { %v3485_v7 = vpop.permute.xlu1 %852 }
  0xe4   : > { %5742 = vst [vmem:[#allocation18_spill] sm:$0xff] %v3485_v7 }
  0xe8   : > { %v945_v11 = vpop.permute.xlu1 %944 }
  0xe9   : > { %v1017_v12 = vadd.f32 %v1016_v8, %v945_v11  ;;  %v1019_v26 = vadd.f32 %v1018_v24, %v945_v11 }
  0xeb   : > { %v1023_v13 = vmul.f32 0.70710677, %v1017_v12  ;;  %v1024_v36 = vmul.f32 0.70710677, %v1019_v26  ;;  %v1021_v37 = vmul.f32 0.5, %v1017_v12  ;;  %v1022_v11 = vmul.f32 0.5, %v1019_v26 }
  0xec   : > { %v3069_v14 = vpop.eup %3068  ;;  %v3489_v23 = vpop.permute.xlu1 %1155 }
  0xed   : > { %3070 = verf.f32 %v1023_v13  ;;  %v383_v20 = vadd.f32 1.0, %v3069_v14  ;;  %5743 = vst [vmem:[#allocation19_spill] sm:$0xff] %v3489_v23 }
  0xee   : > { %3072 = verf.f32 %v380_v25 }
  0xef   : > { %v3487_v21 = vmul.f32 %v383_v20, %v377_v18  ;;  %3074 = verf.f32 %v1024_v36 }
  0xf0   : > { %v3495_v27 = vpop.permute.xlu1 %1160 }
  0xf1   : > { %407 = vrot.lane.b32.xlu1 %v3487_v21, %s3215_s9  ;;  %392 = vrot.lane.b32.xlu0 %v3487_v21, %s3216_s11  ;;  %5744 = vst [vmem:[#allocation20_spill] sm:$0xff] %v3495_v27  ;;  %v3668_v27 = vld [vmem:[%s5563_s3] sm:$0xff] }
  0xf2   : > { %5761 = vst [vmem:[#allocation37_spill] sm:$0xff] %v3668_v27 }
  0xf4   : > { %v3501_v40 = vpop.permute.xlu1 %1170 }
  0xf5   : > { %421 = vrot.lane.b32.xlu1 %v3487_v21, %s3217_s12  ;;  %5745 = vst [vmem:[#allocation21_spill] sm:$0xff] %v3501_v40 }
  0xf8   : > { %v3509_v42 = vpop.permute.xlu1 %1192 }
  0xf9   : > { %435 = vrot.lane.b32.xlu1 %v3487_v21, %s3218_s13  ;;  %5746 = vst [vmem:[#allocation22_spill] sm:$0xff] %v3509_v42  ;;  %v3681_v42 = vld [vmem:[%s5563_s3 + $0x10] sm:$0xff] }
  0xfa   : > { %v3071_v38 = vpop.eup %3070  ;;  %5763 = vst [vmem:[#allocation39_spill] sm:$0xff] %v3681_v42 }
  0xfb   : > { %v1027_v39 = vadd.f32 1.0, %v3071_v38  ;;  %v3073_v43 = vpop.eup %3072 }
  0xfc   : > { %v384_v0 = vadd.f32 1.0, %v3073_v43  ;;  %v3519_v2 = vpop.permute.xlu1 %1202  ;;  %v3075_v4 = vpop.eup %3074 }
  0xfd   : > { %v3503_v41 = vmul.f32 %v1027_v39, %v1021_v37  ;;  %449 = vrot.lane.b32.xlu1 %v3487_v21, %s3219_s14  ;;  %5747 = vst [vmem:[#allocation23_spill] sm:$0xff] %v3519_v2  ;;  %v1028_v12 = vadd.f32 1.0, %v3075_v4  ;;  %v3591_v37 = vpop.permute.xlu0 %529 }
  0xfe   : > { %v3525_v8 = vmul.f32 %v384_v0, %v378_v5  ;;  %5753 = vst [vmem:[#allocation29_spill] sm:$0xff] %v3591_v37 }
  0xff   : > { %1035 = vrot.lane.b32.xlu0 %v3503_v41, %s3216_s11  ;;  %v3533_v14 = vmul.f32 %v1028_v12, %v1022_v11 }
 0x101   : > { %463 = vrot.lane.b32.xlu1 %v3487_v21, %s3220_s16  ;;  %v3527_v13 = vpop.permute.xlu1 %1234 }
 0x102   : > { %5748 = vst [vmem:[#allocation24_spill] sm:$0xff] %v3527_v13  ;;  %v3661_v13 = vld [vmem:[%s5563_s3 + $0x40] sm:$0xff] }
 0x103   : > { %1047 = vrot.lane.b32.xlu0 %v3503_v41, %s3215_s9  ;;  %5760 = vst [vmem:[#allocation36_spill] sm:$0xff] %v3661_v13  ;;  %v1033_v46 = vmul.f32 %v3661_v13, %v3503_v41 }
 0x105   : > { %477 = vrot.lane.b32.xlu1 %v3487_v21, %s3221_s17  ;;  %v3537_v17 = vpop.permute.xlu1 %1238 }
 0x107   : > { %1059 = vrot.lane.b32.xlu0 %v3503_v41, %s3217_s12 }
 0x109   : > { %491 = vrot.lane.b32.xlu1 %v3487_v21, %s3222_s18 }
 0x10a   : > { %v3545_v18 = vpop.permute.xlu1 %1270 }
 0x10b   : > { %1071 = vrot.lane.b32.xlu0 %v3503_v41, %s3218_s13  ;;  %5749 = vst [vmem:[#allocation25_spill] sm:$0xff] %v3545_v18 }
 0x10d   : > { %394 = vrot.lane.b32.xlu1 %v3525_v8, %s3216_s11 }
 0x10e   : > { %v3553_v20 = vpop.permute.xlu1 %1278 }
 0x10f   : > { %1083 = vrot.lane.b32.xlu0 %v3503_v41, %s3219_s14 }
 0x111   : > { %1037 = vrot.lane.b32.xlu1 %v3533_v14, %s3216_s11 }
 0x112   : > { %v3561_v22 = vpop.permute.xlu1 %1282 }
 0x113   : > { %1095 = vrot.lane.b32.xlu0 %v3503_v41, %s3220_s16  ;;  %5750 = vst [vmem:[#allocation26_spill] sm:$0xff] %v3561_v22 }
 0x115   : > { %1049 = vrot.lane.b32.xlu1 %v3533_v14, %s3215_s9 }
 0x117   : > { %1107 = vrot.lane.b32.xlu0 %v3503_v41, %s3221_s17  ;;  %v3567_v24 = vpop.permute.xlu1 %1314 }
 0x118   : > { %5751 = vst [vmem:[#allocation27_spill] sm:$0xff] %v3567_v24 }
 0x119   : > { %1061 = vrot.lane.b32.xlu1 %v3533_v14, %s3217_s12 }
 0x11b   : > { %1119 = vrot.lane.b32.xlu0 %v3503_v41, %s3222_s18  ;;  %v3575_v25 = vpop.permute.xlu1 %1318 }
 0x11d   : > { %1073 = vrot.lane.b32.xlu1 %v3533_v14, %s3218_s13 }
 0x11f   : > { %409 = vrot.lane.b32.xlu0 %v3525_v8, %s3215_s9 }
 0x120   : > { %v3582_v26 = vpop.permute.xlu1 %1350 }
 0x121   : > { %1085 = vrot.lane.b32.xlu1 %v3533_v14, %s3219_s14  ;;  %5752 = vst [vmem:[#allocation28_spill] sm:$0xff] %v3582_v26  ;;  %v2964_v26 = vld [vmem:[%s3304_s15 + $0xc0] sm:$0xff] }
 0x123   : > { %423 = vrot.lane.b32.xlu0 %v3525_v8, %s3217_s12 }
 0x124   : > { %v3588_v36 = vpop.permute.xlu1 %1358 }
 0x125   : > { %1097 = vrot.lane.b32.xlu1 %v3533_v14, %s3220_s16 }
 0x127   : > { %437 = vrot.lane.b32.xlu0 %v3525_v8, %s3218_s13 }
 0x128   : > { %v3593_v38 = vpop.permute.xlu1 %1362 }
 0x129   : > { %1109 = vrot.lane.b32.xlu1 %v3533_v14, %s3221_s17  ;;  %5754 = vst [vmem:[#allocation30_spill] sm:$0xff] %v3593_v38  ;;  %v2965_v38 = vld [vmem:[%s3304_s15 + $0xc8] sm:$0xff] }
 0x12b   : > { %451 = vrot.lane.b32.xlu0 %v3525_v8, %s3219_s14 }
 0x12d   : > { %1121 = vrot.lane.b32.xlu1 %v3533_v14, %s3222_s18  ;;  %v3597_v39 = vpop.permute.xlu1 %1394 }
 0x12e   : > { %5755 = vst [vmem:[#allocation31_spill] sm:$0xff] %v3597_v39  ;;  %v2966_v39 = vld [vmem:[%s3304_s15 + $0xd0] sm:$0xff] }
 0x12f   : > { %465 = vrot.lane.b32.xlu0 %v3525_v8, %s3220_s16 }
 0x131   : > { %1474 = vperm.xlu1 %3042, %v3333_v16   ;;  %v3595_v16 = vpop.permute.xlu0 %539  ;;  %v3601_v43 = vpop.permute.xlu1 %1398 }
 0x133   : > { %479 = vrot.lane.b32.xlu0 %v3525_v8, %s3221_s17 }
 0x135   : > { %1478 = vperm.xlu1 %3042, %v3376_v29   ;;  %v3599_v29 = vpop.permute.xlu0 %561 }
 0x136   : > { %5756 = vst [vmem:[#allocation32_spill] sm:$0xff] %v3599_v29  ;;  %v3605_v4 = vpop.permute.xlu1 %1430 }
 0x137   : > { %493 = vrot.lane.b32.xlu0 %v3525_v8, %s3222_s18  ;;  %5757 = vst [vmem:[#allocation33_spill] sm:$0xff] %v3605_v4  ;;  %v2967_v4 = vld [vmem:[%s3304_s15 + $0xd8] sm:$0xff] }
 0x139   : > { %3043 = vset.pattern.permute.xlu1 %v5572_v1  ;;  %v3603_v0 = vpop.permute.xlu0 %571 }
 0x13a   : > { %1571 = vperm.xlu1 %3043, %v3281_v3   ;;  %v3609_v5 = vpop.permute.xlu1 %1438 }
 0x13d   : > { %v3607_v3 = vpop.permute.xlu0 %1134 }
 0x13e   : > { %v3613_v12 = vpop.permute.xlu1 %1442 }
 0x13f   : > { %5758 = vst [vmem:[#allocation34_spill] sm:$0xff] %v3613_v12  ;;  %v2969_v12 = vld [vmem:[%s3304_s15 + $0xe8] sm:$0xff] }
 0x140   : > { %2230 = vmatprep.subr.mxu1 %v2969_v12 }
 0x141   : > { %v3611_v11 = vpop.permute.xlu0 %1165  ;;  %2231 = vmatpush1.msra.mxu1 %v2968_v61 }
 0x142   : > { %2232 = vmatprep.subr.mxu1 %v2967_v4 }
 0x143   : > { %2233 = vmatpush1.msra.mxu1 %v2966_v39  ;;  %v5602_v39 = vlaneseq }
 0x144   : > { %2234 = vmatprep.subr.mxu1 %v2965_v38 }
 0x145   : > { %v3615_v35 = vpop.permute.xlu0 %1187  ;;  %2235 = vmatpush1.msra.mxu1 %v2964_v26  ;;  %v3648_v18 = vand.u32 127, %v5602_v39 }
 0x146   : > { %5759 = vst [vmem:[#allocation35_spill] sm:$0xff] %v3615_v35  ;;  %2972 = vmatmul.mubr.msk.f32.vlgmr.msra.gmra.mxu1 %vm302_vm0, %v2185_v31 }
 0x147   : > { %vm398_vm1 = vcmp.lt.s32.totalorder %v3648_v18, 17  ;;  %vm411_vm2 = vcmp.lt.s32.totalorder %v3648_v18, 16  ;;  %vm425_vm3 = vcmp.lt.s32.totalorder %v3648_v18, 15  ;;  %vm439_vm4 = vcmp.lt.s32.totalorder %v3648_v18, 1 }
 0x148   : > { %vm453_vm5 = vcmp.lt.s32.totalorder %v3648_v18, 127  ;;  %vm467_vm6 = vcmp.lt.s32.totalorder %v3648_v18, 113  ;;  %vm481_vm7 = vcmp.lt.s32.totalorder %v3648_v18, 112  ;;  %vm495_vm8 = vcmp.lt.s32.totalorder %v3648_v18, 111 }
 0x149   : > { %v3621_v33 = vpop.permute.xlu0 %1197 }
 0x163   : > { %v3617_v34 = vpop.permute.xlu1 %407  ;;  %v393_v28 = vpop.permute.xlu0 %392 }
 0x167   : > { %v3619_v1 = vpop.permute.xlu1 %421 }
 0x16b   : > { %v3623_v32 = vpop.permute.xlu1 %435 }
 0x16f   : > { %v3627_v63 = vpop.permute.xlu1 %449 }
 0x171   : > { %v1036_v6 = vpop.permute.xlu0 %1035 }
 0x173   : > { %v3633_v59 = vpop.permute.xlu1 %463 }
 0x175   : > { %v1048_v30 = vpop.permute.xlu0 %1047 }
 0x177   : > { %v3641_v58 = vpop.permute.xlu1 %477 }
 0x179   : > { %v1060_v12 = vpop.permute.xlu0 %1059 }
 0x17b   : > { %v3643_v56 = vpop.permute.xlu1 %491 }
 0x17d   : > { %v1072_v61 = vpop.permute.xlu0 %1071 }
 0x17f   : > { %v395_v4 = vpop.permute.xlu1 %394 }
 0x180   : > { %v400_v23 = vsel %vm398_vm1, %v395_v4, %v393_v28 }
 0x181   : > { %v1084_v24 = vpop.permute.xlu0 %1083 }
 0x183   : > { %v1038_v54 = vpop.permute.xlu1 %1037 }
 0x184   : > { %v1039_v26 = vsel %vm398_vm1, %v1036_v6, %v1038_v54  ;;  %v1040_v31 = vsel %vm398_vm1, %v1038_v54, %v1036_v6 }
 0x185   : > { %v3645_v22 = vpop.permute.xlu0 %1095  ;;  %v1043_v54 = vmul.f32 %v1040_v31, %v3668_v27  ;;  %v1044_v6 = vmul.f32 %v1039_v26, %v3673_v49  ;;  %v3695_v26 = vld [vmem:[%s5563_s3 + $0x48] sm:$0xff]  ;;  %v390_v31 = vmul.f32 %v3661_v13, %v3487_v21  ;;  %v403_v13 = vmul.f32 %v3668_v27, %v400_v23 }
 0x186   : > { %5764 = vst [vmem:[#allocation40_spill] sm:$0xff] %v3695_v26  ;;  %v3714_v21 = vld [vmem:[%s5563_s3 + $0x28] sm:$0xff] }
 0x187   : > { %v1050_v53 = vpop.permute.xlu1 %1049  ;;  %v1045_v7 = vadd.f32 %v1043_v54, %v1033_v46 }
 0x188   : > { %v1051_v47 = vsel %vm411_vm2, %v1048_v30, %v1050_v53  ;;  %v1052_v40 = vsel %vm411_vm2, %v1050_v53, %v1048_v30  ;;  %v1034_v53 = vmul.f32 %v3695_v26, %v3533_v14  ;;  %v3709_v30 = vld [vmem:[%s5563_s3 + $0x20] sm:$0xff]  ;;  %v399_v14 = vsel %vm398_vm1, %v393_v28, %v395_v4 }
 0x189   : > { %v3650_v38 = vpop.permute.xlu0 %1107  ;;  %v1055_v48 = vmul.f32 %v3681_v42, %v1052_v40  ;;  %v1056_v29 = vmul.f32 %v3686_v45, %v1051_v47  ;;  %v3738_v47 = vld [vmem:[%s5563_s3 + $0x38] sm:$0xff]  ;;  %v391_v4 = vmul.f32 %v3695_v26, %v3525_v8 }
 0x18a   : > { %v1046_v62 = vadd.f32 %v1044_v6, %v1034_v53  ;;  %v3760_v8 = vld [vmem:[%s5563_s3 + $0x58] sm:$0xff] }
 0x18b   : > { %v1062_v51 = vpop.permute.xlu1 %1061 }
 0x18c   : > { %v1063_v2 = vsel %vm425_vm3, %v1060_v12, %v1062_v51  ;;  %v1064_v35 = vsel %vm425_vm3, %v1062_v51, %v1060_v12 }
 0x18d   : > { %v3663_v39 = vpop.permute.xlu0 %1119  ;;  %v1067_v28 = vmul.f32 %v3709_v30, %v1064_v35  ;;  %v1068_v40 = vmul.f32 %v3714_v21, %v1063_v2  ;;  %v404_v35 = vmul.f32 %v3673_v49, %v399_v14  ;;  %v3751_v2 = vld [vmem:[%s5563_s3 + $0x50] sm:$0xff] }
 0x18f   : > { %v1074_v37 = vpop.permute.xlu1 %1073 }
 0x190   : > { %v1076_v51 = vsel %vm439_vm4, %v1074_v37, %v1072_v61  ;;  %v1075_v46 = vsel %vm439_vm4, %v1072_v61, %v1074_v37  ;;  %v1057_v37 = vadd.f32 %v1055_v48, %v1045_v7  ;;  %v1058_v61 = vadd.f32 %v1056_v29, %v1046_v62 }
 0x191   : > { %v410_v41 = vpop.permute.xlu0 %409  ;;  %v1079_v53 = vmul.f32 %v3729_v60, %v1076_v51  ;;  %v1080_v26 = vmul.f32 %v3738_v47, %v1075_v46  ;;  %v405_v48 = vadd.f32 %v403_v13, %v390_v31  ;;  %v3774_v51 = vld [vmem:[%s5563_s3 + $0x60] sm:$0xff]  ;;  %v406_v46 = vadd.f32 %v404_v35, %v391_v4 }
 0x192   : > { %v413_v23 = vsel %vm411_vm2, %v410_v41, %v3617_v34  ;;  %v412_v49 = vsel %vm411_vm2, %v3617_v34, %v410_v41  ;;  %v1069_v62 = vadd.f32 %v1067_v28, %v1057_v37  ;;  %v1070_v7 = vadd.f32 %v1068_v40, %v1058_v61 }
 0x193   : > { %v1086_v12 = vpop.permute.xlu1 %1085  ;;  %v417_v27 = vmul.f32 %v3681_v42, %v413_v23  ;;  %v3798_v42 = vld [vmem:[%s5563_s3 + $0x70] sm:$0xff] }
 0x194   : > { %v1087_v54 = vsel %vm453_vm5, %v1084_v24, %v1086_v12  ;;  %v1088_v14 = vsel %vm453_vm5, %v1086_v12, %v1084_v24  ;;  %v3779_v24 = vld [vmem:[%s5563_s3 + $0x68] sm:$0xff]  ;;  %v1081_v23 = vadd.f32 %v1079_v53, %v1069_v62  ;;  %v418_v12 = vmul.f32 %v3686_v45, %v412_v49 }
 0x195   : > { %v424_v6 = vpop.permute.xlu0 %423  ;;  %v1091_v29 = vmul.f32 %v3751_v2, %v1087_v54  ;;  %v1092_v41 = vmul.f32 %v3760_v8, %v1088_v14  ;;  %v1082_v54 = vadd.f32 %v1080_v26, %v1070_v7  ;;  %v419_v37 = vadd.f32 %v417_v27, %v405_v48 }
 0x196   : > { %v427_v13 = vsel %vm425_vm3, %v424_v6, %v3619_v1  ;;  %v426_v49 = vsel %vm425_vm3, %v3619_v1, %v424_v6  ;;  %v420_v7 = vadd.f32 %v418_v12, %v406_v46 }
 0x197   : > { %v1098_v34 = vpop.permute.xlu1 %1097  ;;  %v1093_v4 = vadd.f32 %v1091_v29, %v1081_v23  ;;  %v431_v27 = vmul.f32 %v3709_v30, %v427_v13  ;;  %v1094_v53 = vadd.f32 %v1092_v41, %v1082_v54 }
 0x198   : > { %v1099_v31 = vsel %vm467_vm6, %v3645_v22, %v1098_v34  ;;  %v1100_v28 = vsel %vm467_vm6, %v1098_v34, %v3645_v22  ;;  %v3803_v22 = vld [vmem:[%s5563_s3 + $0x78] sm:$0xff] }
 0x199   : > { %v438_v40 = vpop.permute.xlu0 %437  ;;  %v1103_v61 = vmul.f32 %v3774_v51, %v1099_v31  ;;  %v1104_v14 = vmul.f32 %v3779_v24, %v1100_v28  ;;  %v433_v46 = vadd.f32 %v431_v27, %v419_v37 }
 0x19a   : > { %v441_v26 = vsel %vm439_vm4, %v438_v40, %v3623_v32  ;;  %v440_v48 = vsel %vm439_vm4, %v3623_v32, %v438_v40  ;;  %v432_v32 = vmul.f32 %v3714_v21, %v426_v49  ;;  %v3836_v40 = vld [vmem:[%s5563_s3 + $0x88] sm:$0xff] }
 0x19b   : > { %v1110_v35 = vpop.permute.xlu1 %1109  ;;  %v1105_v13 = vadd.f32 %v1103_v61, %v1093_v4  ;;  %v1106_v31 = vadd.f32 %v1104_v14, %v1094_v53  ;;  %v445_v28 = vmul.f32 %v3729_v60, %v441_v26  ;;  %v446_v23 = vmul.f32 %v3738_v47, %v440_v48 }
 0x19c   : > { %v1111_v62 = vsel %vm481_vm7, %v3650_v38, %v1110_v35  ;;  %v1112_v1 = vsel %vm481_vm7, %v1110_v35, %v3650_v38  ;;  %v3831_v38 = vld [vmem:[%s5563_s3 + $0x80] sm:$0xff]  ;;  %v434_v48 = vadd.f32 %v432_v32, %v420_v7 }
 0x19d   : > { %v452_v6 = vpop.permute.xlu0 %451  ;;  %v1115_v29 = vmul.f32 %v3798_v42, %v1111_v62  ;;  %v1116_v34 = vmul.f32 %v3803_v22, %v1112_v1  ;;  %v447_v62 = vadd.f32 %v445_v28, %v433_v46 }
 0x19e   : > { %v454_v41 = vsel %vm453_vm5, %v3627_v63, %v452_v6  ;;  %v455_v12 = vsel %vm453_vm5, %v452_v6, %v3627_v63 }
 0x19f   : > { %v459_v54 = vmul.f32 %v3751_v2, %v454_v41  ;;  %v1122_v61 = vpop.permute.xlu1 %1121  ;;  %v1117_v14 = vadd.f32 %v1115_v29, %v1105_v13  ;;  %v1118_v4 = vadd.f32 %v1116_v34, %v1106_v31  ;;  %v460_v1 = vmul.f32 %v3760_v8, %v455_v12 }
 0x1a0   : > { %v1123_v49 = vsel %vm495_vm8, %v3663_v39, %v1122_v61  ;;  %v1124_v26 = vsel %vm495_vm8, %v1122_v61, %v3663_v39  ;;  %v448_v34 = vadd.f32 %v446_v23, %v434_v48 }
 0x1a1   : > { %v466_v37 = vpop.permute.xlu0 %465  ;;  %v1127_v27 = vmul.f32 %v3831_v38, %v1123_v49  ;;  %v1128_v35 = vmul.f32 %v3836_v40, %v1124_v26  ;;  %v461_v41 = vadd.f32 %v459_v54, %v447_v62 }
 0x1a2   : > { %v468_v63 = vsel %vm467_vm6, %v3633_v59, %v466_v37  ;;  %v469_v53 = vsel %vm467_vm6, %v466_v37, %v3633_v59  ;;  %v462_v32 = vadd.f32 %v460_v1, %v448_v34 }
 0x1a3   : > { %v1129_v6 = vadd.f32 %v1127_v27, %v1117_v14  ;;  %v1130_v29 = vadd.f32 %v1128_v35, %v1118_v4  ;;  %v473_v39 = vmul.f32 %v3774_v51, %v468_v63  ;;  %v474_v13 = vmul.f32 %v3779_v24, %v469_v53 }
 0x1a5   : > { %v480_v31 = vpop.permute.xlu0 %479  ;;  %v1137_v61 = vadd.f32 %v3607_v3, %v1129_v6  ;;  %v1138_v49 = vadd.f32 %v3607_v3, %v1130_v29  ;;  %v475_v54 = vadd.f32 %v473_v39, %v461_v41  ;;  %v476_v14 = vadd.f32 %v474_v13, %v462_v32  ;;  %v1643_v41 = vpop.f32.mrf.mxu0 }
 0x1a6   : > { %v482_v59 = vsel %vm481_vm7, %v3641_v58, %v480_v31  ;;  %v483_v7 = vsel %vm481_vm7, %v480_v31, %v3641_v58 }
 0x1a7   : > { %v487_v28 = vmul.f32 %v3798_v42, %v482_v59  ;;  %v488_v46 = vmul.f32 %v3803_v22, %v483_v7  ;;  %v1141_v23 = vmul.f32 0.70710677, %v1137_v61  ;;  %v1142_v12 = vmul.f32 0.70710677, %v1138_v49 }
 0x1a8   : > { %v1139_v32 = vmul.f32 0.5, %v1137_v61 }
 0x1a9   : > { %v494_v4 = vpop.permute.xlu0 %493  ;;  %3076 = verf.f32 %v1141_v23  ;;  %v489_v3 = vadd.f32 %v487_v28, %v475_v54  ;;  %v490_v37 = vadd.f32 %v488_v46, %v476_v14  ;;  %v1140_v46 = vmul.f32 0.5, %v1138_v49 }
 0x1aa   : > { %v496_v26 = vsel %vm495_vm8, %v3643_v56, %v494_v4  ;;  %v497_v58 = vsel %vm495_vm8, %v494_v4, %v3643_v56  ;;  %3078 = verf.f32 %v1142_v12  ;;  %v5766_v56 = vlaneseq  ;;  %v1645_v4 = vpop.f32.mrf.mxu0 }
 0x1ab   : > { %v501_v27 = vmul.f32 %v3831_v38, %v496_v26  ;;  %v502_v35 = vmul.f32 %v3836_v40, %v497_v58 }
 0x1ac   : > { %v3878_v48 = vpop.permute.xlu1 %1474  ;;  %v3885_v34 = vshrl.u32 %v5766_v56, 7 }
 0x1ad   : > { %v503_v63 = vadd.f32 %v501_v27, %v489_v3  ;;  %v504_v53 = vadd.f32 %v502_v35, %v490_v37  ;;  %5765 = vst [vmem:[#allocation41_spill] sm:$0xff] %v3878_v48 }
 0x1ae   : > { %v3890_v54 = vsub.s32 0, %v3885_v34  ;;  %v3903_v58 = vsub.s32 1, %v3885_v34 }
 0x1af   : > { %v511_v62 = vadd.f32 %v3423_v44, %v503_v63  ;;  %v512_v1 = vadd.f32 %v3423_v44, %v504_v53 }
 0x1b0   : > { %v3882_v39 = vpop.permute.xlu1 %1478 }
 0x1b1   : > { %v515_v6 = vmul.f32 0.70710677, %v511_v62  ;;  %v516_v29 = vmul.f32 0.70710677, %v512_v1 }
 0x1b3   : > { %3080 = verf.f32 %v515_v6  ;;  %v513_v6 = vmul.f32 0.5, %v511_v62 }
 0x1b4   : > { %3082 = verf.f32 %v516_v29  ;;  %v514_v29 = vmul.f32 0.5, %v512_v1 }
 0x1b5   : > { %v1572_v13 = vpop.permute.xlu1 %1571 }
 0x1b6   : > { %v3077_v31 = vpop.eup %3076  ;;  %v1644_v59 = vadd.f32 %v1643_v41, %v1572_v13  ;;  %v1646_v26 = vadd.f32 %v1645_v4, %v1572_v13  ;;  %v1177_v41 = vadd.f32 %v3338_v19, %v3611_v11  ;;  %v3912_v13 = vsub.s32 2, %v3885_v34 }
 0x1b7   : > { %v3079_v7 = vpop.eup %3078  ;;  %v1145_v28 = vadd.f32 1.0, %v3077_v31  ;;  %v3929_v19 = vsub.s32 3, %v3885_v34 }
 0x1b8   : > { %v1146_v23 = vadd.f32 1.0, %v3079_v7  ;;  %v1650_v12 = vmul.f32 0.70710677, %v1644_v59  ;;  %v1651_v53 = vmul.f32 0.70710677, %v1646_v26  ;;  %v1178_v7 = vadd.f32 %v3327_v15, %v3611_v11 }
 0x1b9   : > { %v3887_v44 = vmul.f32 %v1145_v28, %v1139_v32 }
 0x1ba   : > { %v3892_v14 = vmul.f32 %v1146_v23, %v1140_v46  ;;  %3084 = verf.f32 %v1650_v12  ;;  %v1648_v12 = vmul.f32 0.5, %v1644_v59 }
 0x1bb   : > { %v3896_v3 = vrot.slane %v3887_v44, %v3890_v54  ;;  %v3916_v31 = vrot.slane %v3887_v44, %v3903_v58  ;;  %3086 = verf.f32 %v1651_v53  ;;  %v3935_v15 = vrot.slane %v3887_v44, %v3912_v13 }
 0x1bc   : > { %v3900_v61 = vrot.slane %v3892_v14, %v3890_v54  ;;  %v3939_v11 = vrot.slane %v3892_v14, %v3912_v13 }
 0x1bd   : > { %5767 = vst [vmem:[#allocation42_spill] sm:$0xff] %v3896_v3  ;;  %v1217_v63 = vmul.f32 %v3896_v3, %v3621_v33  ;;  %5769 = vst [vmem:[#allocation44_spill] sm:$0xff] %v3916_v31  ;;  %v1257_v23 = vmul.f32 %v3916_v31, %v3537_v17  ;;  %v1297_v59 = vmul.f32 %v3935_v15, %v3553_v20  ;;  %v5817_v3 = vld [vmem:[#allocation40_spill] sm:$0xff] }
 0x1be   : > { %5768 = vst [vmem:[#allocation43_spill] sm:$0xff] %v3900_v61  ;;  %v1218_v56 = vmul.f32 %v3900_v61, %v3621_v33  ;;  %v3926_v33 = vrot.slane %v3892_v14, %v3903_v58  ;;  %5771 = vst [vmem:[#allocation46_spill] sm:$0xff] %v3935_v15 }
 0x1bf   : > { %v1225_v1 = vadd.f32 %v1217_v63, %v1177_v41  ;;  %5772 = vst [vmem:[#allocation47_spill] sm:$0xff] %v3939_v11 }
 0x1c0   : > { %v3081_v49 = vpop.eup %3080  ;;  %5770 = vst [vmem:[#allocation45_spill] sm:$0xff] %v3926_v33  ;;  %v1226_v28 = vadd.f32 %v1218_v56, %v1178_v7  ;;  %v1258_v4 = vmul.f32 %v3926_v33, %v3537_v17  ;;  %v3960_v17 = vrot.slane %v3887_v44, %v3929_v19  ;;  %v3966_v56 = vrot.slane %v3892_v14, %v3929_v19 }
 0x1c1   : > { %v3083_v37 = vpop.eup %3082  ;;  %v519_v27 = vadd.f32 1.0, %v3081_v49 }
 0x1c2   : > { %v520_v35 = vadd.f32 1.0, %v3083_v37  ;;  %v1266_v63 = vadd.f32 %v1258_v4, %v1226_v28  ;;  %5776 = vst [vmem:[#allocation51_spill] sm:$0xff] %v3960_v17  ;;  %5777 = vst [vmem:[#allocation52_spill] sm:$0xff] %v3966_v56  ;;  %v3987_v4 = vsub.s32 5, %v3885_v34 }
 0x1c3   : > { %v3920_v32 = vmul.f32 %v519_v27, %v513_v6  ;;  %v3954_v6 = vsub.s32 4, %v3885_v34 }
 0x1c4   : > { %v3922_v62 = vmul.f32 %v520_v35, %v514_v29  ;;  %v1265_v35 = vadd.f32 %v1257_v23, %v1225_v1  ;;  %v1298_v29 = vmul.f32 %v3939_v11, %v3553_v20  ;;  %v551_v1 = vadd.f32 %v3595_v16, %v3317_v10  ;;  %5780 = vst [vmem:[#allocation55_spill] sm:$0xff] %v3987_v4 }
 0x1c5   : > { %v3949_v27 = vrot.slane %v3920_v32, %v3890_v54  ;;  %5775 = vst [vmem:[#allocation50_spill] sm:$0xff] %v3954_v6  ;;  %v552_v20 = vadd.f32 %v3595_v16, %v3314_v9  ;;  %v3993_v10 = vrot.slane %v3887_v44, %v3954_v6  ;;  %v1338_v9 = vmul.f32 %v3966_v56, %v3575_v25 }
 0x1c6   : > { %v3945_v37 = vrot.slane %v3922_v62, %v3890_v54  ;;  %v1305_v28 = vadd.f32 %v1297_v59, %v1265_v35  ;;  %v3980_v23 = vrot.slane %v3922_v62, %v3903_v58  ;;  %v3999_v16 = vrot.slane %v3892_v14, %v3954_v6 }
 0x1c7   : > { %v3085_v46 = vpop.eup %3084  ;;  %5774 = vst [vmem:[#allocation49_spill] sm:$0xff] %v3949_v27  ;;  %v591_v7 = vmul.f32 %v3949_v27, %v3603_v0  ;;  %5781 = vst [vmem:[#allocation56_spill] sm:$0xff] %v3993_v10  ;;  %v4012_v56 = vrot.slane %v3922_v62, %v3912_v13 }
 0x1c8   : > { %v1654_v49 = vadd.f32 1.0, %v3085_v46  ;;  %5773 = vst [vmem:[#allocation48_spill] sm:$0xff] %v3945_v37  ;;  %v592_v41 = vmul.f32 %v3945_v37, %v3603_v0  ;;  %v1306_v46 = vadd.f32 %v1298_v29, %v1266_v63  ;;  %5778 = vst [vmem:[#allocation53_spill] sm:$0xff] %v3980_v23  ;;  %v1337_v0 = vmul.f32 %v3960_v17, %v3575_v25  ;;  %v3087_v48 = vpop.eup %3086 }
 0x1c9   : > { %5782 = vst [vmem:[#allocation57_spill] sm:$0xff] %v3999_v16  ;;  %v599_v35 = vadd.f32 %v591_v7, %v551_v1  ;;  %v4004_v63 = vsub.s32 6, %v3885_v34  ;;  %v1649_v29 = vmul.f32 0.5, %v1646_v26  ;;  %v632_v11 = vmul.f32 %v3980_v23, %v3443_v50  ;;  %5784 = vst [vmem:[#allocation59_spill] sm:$0xff] %v4012_v56 }
 0x1ca   : > { %v3951_v53 = vmul.f32 %v1654_v49, %v1648_v12  ;;  %v3984_v12 = vrot.slane %v3920_v32, %v3903_v58  ;;  %v600_v49 = vadd.f32 %v592_v41, %v552_v20  ;;  %v1345_v59 = vadd.f32 %v1337_v0, %v1305_v28 }
 0x1cb   : > { %5783 = vst [vmem:[#allocation58_spill] sm:$0xff] %v4004_v63  ;;  %v1346_v17 = vadd.f32 %v1338_v9, %v1306_v46  ;;  %v4016_v41 = vrot.slane %v3887_v44, %v3987_v4  ;;  %v4020_v7 = vrot.slane %v3892_v14, %v3987_v4  ;;  %v1655_v26 = vadd.f32 1.0, %v3087_v48 }
 0x1cc   : > { %1662 = vrot.lane.b32.xlu0 %v3951_v53, %s3216_s11  ;;  %5779 = vst [vmem:[#allocation54_spill] sm:$0xff] %v3984_v12  ;;  %v631_v25 = vmul.f32 %v3984_v12, %v3443_v50  ;;  %v4024_v1 = vrot.slane %v3920_v32, %v3912_v13  ;;  %v1377_v50 = vmul.f32 %v3993_v10, %v3588_v36  ;;  %v4033_v0 = vsub.s32 7, %v3885_v34 }
 0x1cd   : > { %5785 = vst [vmem:[#allocation60_spill] sm:$0xff] %v4016_v41  ;;  %5786 = vst [vmem:[#allocation61_spill] sm:$0xff] %v4020_v7  ;;  %v1378_v28 = vmul.f32 %v3999_v16, %v3588_v36  ;;  %v640_v20 = vadd.f32 %v632_v11, %v600_v49  ;;  %v4035_v9 = vmul.f32 %v1655_v26, %v1649_v29 }
 0x1ce   : > { %5787 = vst [vmem:[#allocation62_spill] sm:$0xff] %v4024_v1  ;;  %v639_v46 = vadd.f32 %v631_v25, %v599_v35  ;;  %5788 = vst [vmem:[#allocation63_spill] sm:$0xff] %v4033_v0  ;;  %v1385_v48 = vadd.f32 %v1377_v50, %v1345_v59  ;;  %v672_v33 = vmul.f32 %v4012_v56, %v3450_v52 }
 0x1cf   : > { %v1386_v15 = vadd.f32 %v1378_v28, %v1346_v17  ;;  %v671_v10 = vmul.f32 %v4024_v1, %v3450_v52  ;;  %v1417_v36 = vmul.f32 %v4016_v41, %v3601_v43  ;;  %v1418_v11 = vmul.f32 %v4020_v7, %v3601_v43  ;;  %1664 = vrot.lane.b32.xlu1 %v4035_v9, %s3216_s11  ;;  %v5815_v1 = vld [vmem:[#allocation38_spill] sm:$0xff] }
 0x1d0   : > { %1674 = vrot.lane.b32.xlu0 %v3951_v53, %s3215_s9  ;;  %v4047_v34 = vrot.slane %v3887_v44, %v4004_v63  ;;  %v4051_v49 = vrot.slane %v3892_v14, %v4004_v63  ;;  %v680_v52 = vadd.f32 %v672_v33, %v640_v20  ;;  %v4059_v35 = vrot.slane %v3922_v62, %v3929_v19 }
 0x1d1   : > { %v679_v17 = vadd.f32 %v671_v10, %v639_v46  ;;  %v4063_v43 = vrot.slane %v3920_v32, %v3929_v19  ;;  %v1425_v59 = vadd.f32 %v1417_v36, %v1385_v48  ;;  %v1426_v29 = vadd.f32 %v1418_v11, %v1386_v15 }
 0x1d2   : > { %5789 = vst [vmem:[#allocation64_spill] sm:$0xff] %v4047_v34  ;;  %5790 = vst [vmem:[#allocation65_spill] sm:$0xff] %v4051_v49  ;;  %v712_v25 = vmul.f32 %v4059_v35, %v3460_v55  ;;  %v4071_v33 = vrot.slane %v3887_v44, %v4033_v0  ;;  %v4075_v10 = vrot.slane %v3892_v14, %v4033_v0 }
 0x1d3   : > { %5791 = vst [vmem:[#allocation66_spill] sm:$0xff] %v4059_v35  ;;  %5792 = vst [vmem:[#allocation67_spill] sm:$0xff] %v4063_v43  ;;  %v711_v26 = vmul.f32 %v4063_v43, %v3460_v55  ;;  %v1457_v50 = vmul.f32 %v4047_v34, %v3609_v5  ;;  %1676 = vrot.lane.b32.xlu1 %v4035_v9, %s3215_s9  ;;  %v4083_v15 = vrot.slane %v3922_v62, %v3954_v6  ;;  %v5814_v43 = vld [vmem:[#allocation37_spill] sm:$0xff] }
 0x1d4   : > { %1686 = vrot.lane.b32.xlu0 %v3951_v53, %s3217_s12  ;;  %5793 = vst [vmem:[#allocation68_spill] sm:$0xff] %v4071_v33  ;;  %5794 = vst [vmem:[#allocation69_spill] sm:$0xff] %v4075_v10  ;;  %v1458_v55 = vmul.f32 %v4051_v49, %v3609_v5  ;;  %v720_v44 = vadd.f32 %v712_v25, %v680_v52  ;;  %v4091_v14 = vrot.slane %v3920_v32, %v3954_v6 }
 0x1d5   : > { %5795 = vst [vmem:[#allocation70_spill] sm:$0xff] %v4083_v15  ;;  %v719_v28 = vadd.f32 %v711_v26, %v679_v17  ;;  %v752_v20 = vmul.f32 %v4083_v15, %v3467_v57  ;;  %v4097_v46 = vrot.slane %v3922_v62, %v3987_v4  ;;  %v1465_v48 = vadd.f32 %v1457_v50, %v1425_v59 }
 0x1d6   : > { %5796 = vst [vmem:[#allocation71_spill] sm:$0xff] %v4091_v14  ;;  %v1466_v36 = vadd.f32 %v1458_v55, %v1426_v29  ;;  %v751_v5 = vmul.f32 %v4091_v14, %v3467_v57  ;;  %v4103_v11 = vrot.slane %v3920_v32, %v3987_v4  ;;  %v1497_v17 = vmul.f32 %v4071_v33, %v3882_v39  ;;  %v5799_v29 = vld [vmem:[#allocation13_spill] sm:$0xff] }
 0x1d7   : > { %5797 = vst [vmem:[#allocation72_spill] sm:$0xff] %v4097_v46  ;;  %1688 = vrot.lane.b32.xlu1 %v4035_v9, %s3217_s12  ;;  %v760_v52 = vadd.f32 %v752_v20, %v720_v44  ;;  %v1498_v25 = vmul.f32 %v4075_v10, %v3882_v39  ;;  %v792_v57 = vmul.f32 %v4097_v46, %v5799_v29  ;;  %v4208_v46 = vld [vmem:[%s5565_s5 + $0x8] sm:$0xff] }
 0x1d8   : > { %1698 = vrot.lane.b32.xlu0 %v3951_v53, %s3218_s13  ;;  %5798 = vst [vmem:[#allocation73_spill] sm:$0xff] %v4103_v11  ;;  %v759_v59 = vadd.f32 %v751_v5, %v719_v28  ;;  %v791_v26 = vmul.f32 %v4103_v11, %v5799_v29  ;;  %v1505_v50 = vadd.f32 %v1497_v17, %v1465_v48 }
 0x1d9   : > { %v1506_v55 = vadd.f32 %v1498_v25, %v1466_v36  ;;  %v800_v49 = vadd.f32 %v792_v57, %v760_v52  ;;  %v4121_v39 = vrot.slane %v3922_v62, %v4004_v63  ;;  %v4125_v28 = vrot.slane %v3922_v62, %v4033_v0  ;;  %v5804_v36 = vld [vmem:[#allocation15_spill] sm:$0xff] }
 0x1da   : > { %v799_v44 = vadd.f32 %v791_v26, %v759_v59  ;;  %v4129_v20 = vrot.slane %v3920_v32, %v4004_v63  ;;  %v4135_v48 = vrot.slane %v3920_v32, %v4033_v0  ;;  %v1521_v17 = vmul.f32 0.70710677, %v1505_v50  ;;  %v5805_v59 = vld [vmem:[#allocation18_spill] sm:$0xff] }
 0x1db   : > { %1700 = vrot.lane.b32.xlu1 %v4035_v9, %s3218_s13  ;;  %5800 = vst [vmem:[#allocation13_spill] sm:$0xff] %v4121_v39  ;;  %5801 = vst [vmem:[#allocation74_spill] sm:$0xff] %v4125_v28  ;;  %v832_v5 = vmul.f32 %v4121_v39, %v5804_v36  ;;  %v1522_v62 = vmul.f32 0.70710677, %v1506_v55  ;;  %v872_v29 = vmul.f32 %v4125_v28, %v5805_v59  ;;  %v4152_v26 = vld [vmem:[%s5564_s4] sm:$0xff]  ;;  %v1514_v7 = vmul.f32 0.5, %v1506_v55 }
 0x1dc   : > { %1710 = vrot.lane.b32.xlu0 %v3951_v53, %s3219_s14  ;;  %5802 = vst [vmem:[#allocation75_spill] sm:$0xff] %v4129_v20  ;;  %5803 = vst [vmem:[#allocation76_spill] sm:$0xff] %v4135_v48  ;;  %v831_v52 = vmul.f32 %v4129_v20, %v5804_v36  ;;  %v871_v32 = vmul.f32 %v4135_v48, %v5805_v59  ;;  %v5810_v55 = vmov 5   ;;  %v1661_v27 = vmul.f32 %v5817_v3, %v4035_v9 }
 0x1dd   : > { %v840_v25 = vadd.f32 %v832_v5, %v800_v49  ;;  %3088 = verf.f32 %v1522_v62  ;;  %v4160_v5 = vld [vmem:[%s5566_s6 + $0x10] sm:$0xff] }
 0x1de   : > { %v839_v57 = vadd.f32 %v831_v52, %v799_v44  ;;  %3090 = verf.f32 %v1521_v17  ;;  %v4168_v52 = vld [vmem:[%s5565_s5] sm:$0xff]  ;;  %v4181_v62 = vld [vmem:[%s5565_s5 + $0x10] sm:$0xff] }
 0x1df   : > { %1712 = vrot.lane.b32.xlu1 %v4035_v9, %s3219_s14  ;;  %v880_v36 = vadd.f32 %v872_v29, %v840_v25  ;;  %v4175_v17 = vld [vmem:[%s5566_s6] sm:$0xff]  ;;  %v4187_v29 = vld [vmem:[%s5566_s6 + $0x8] sm:$0xff] }
 0x1e0   : > { %1722 = vrot.lane.b32.xlu0 %v3951_v53, %s3220_s16  ;;  %v879_v39 = vadd.f32 %v871_v32, %v839_v57 }
 0x1e1   : > { %v896_v49 = vmul.f32 0.70710677, %v880_v36  ;;  %v888_v20 = vmul.f32 0.5, %v880_v36  ;;  %v1513_v36 = vmul.f32 0.5, %v1505_v50  ;;  %v5807_v50 = vmov 2  }
 0x1e2   : > { %v895_v44 = vmul.f32 0.70710677, %v879_v39 }
 0x1e3   : > { %1724 = vrot.lane.b32.xlu1 %v4035_v9, %s3220_s16  ;;  %3092 = verf.f32 %v896_v49 }
 0x1e4   : > { %1734 = vrot.lane.b32.xlu0 %v3951_v53, %s3221_s17  ;;  %3094 = verf.f32 %v895_v44 }
 0x1e7   : > { %1736 = vrot.lane.b32.xlu1 %v4035_v9, %s3221_s17 }
 0x1e8   : > { %1746 = vrot.lane.b32.xlu0 %v3951_v53, %s3222_s18 }
 0x1ea   : > { %v3089_v25 = vpop.eup %3088 }
 0x1eb   : > { %1748 = vrot.lane.b32.xlu1 %v4035_v9, %s3222_s18  ;;  %v3091_v59 = vpop.eup %3090  ;;  %v1538_v32 = vadd.f32 1.0, %v3089_v25  ;;  %v4201_v25 = vld [vmem:[%s5566_s6 + $0x18] sm:$0xff] }
 0x1ec   : > { %1761 = vperm.xlu0 %3026, %v4152_v26   ;;  %v1537_v44 = vadd.f32 1.0, %v3091_v59  ;;  %v887_v59 = vmul.f32 0.5, %v879_v39  ;;  %v2195_v39 = vld [vmem:[%s5562_s2] sm:$0xff] }
 0x1ed   : > { %v1546_v28 = vmul.f32 %v1538_v32, %v1514_v7  ;;  %v5806_v7 = vmov 1   ;;  %v5812_v32 = vmov 6  }
 0x1ee   : > { %v1545_v11 = vmul.f32 %v1537_v44, %v1513_v36 }
 0x1ef   : > { %1782 = vperm.xlu1 %3043, %v4175_v17   ;;  %2928 = vst [vmem:[%s4196_s29 + $0x68] sm:$0xff] %v1546_v28  ;;  %v5811_v28 = vmov 0  }
 0x1f0   : > { %1792 = vperm.xlu0 %3026, %v4160_v5   ;;  %v3093_v57 = vpop.eup %3092  ;;  %2927 = vst [vmem:[%s4196_s29 + $0x60] sm:$0xff] %v1545_v11  ;;  %v5809_v11 = vmov 4  }
 0x1f1   : > { %v3095_v49 = vpop.eup %3094  ;;  %v912_v34 = vadd.f32 1.0, %v3093_v57 }
 0x1f2   : > { %v911_v48 = vadd.f32 1.0, %v3095_v49 }
 0x1f3   : > { %1787 = vperm.xlu1 %3043, %v4187_v29   ;;  %v920_v57 = vmul.f32 %v912_v34, %v888_v20  ;;  %v4217_v34 = vld [vmem:[%s5565_s5 + $0x18] sm:$0xff] }
 0x1f4   : > { %1814 = vperm.xlu0 %3026, %v4168_v52   ;;  %v919_v41 = vmul.f32 %v911_v48, %v887_v59 }
 0x1f5   : > { %928 = vst [vmem:[%s4196_s29 + $0x28] sm:$0xff] %v920_v57  ;;  %v5813_v57 = vmov 7  }
 0x1f6   : > { %927 = vst [vmem:[%s4196_s29 + $0x20] sm:$0xff] %v919_v41  ;;  %v5808_v41 = vmov 3  }
 0x1f7   : > { %1797 = vperm.xlu1 %3043, %v4201_v25  }
 0x1f8   : > { %1824 = vperm.xlu0 %3026, %v4181_v62  }
 0x1fb   : > { %1819 = vperm.xlu1 %3043, %v4208_v46  }
 0x1ff   : > { %1829 = vperm.xlu1 %3043, %v4217_v34  }
 0x203   : > { %3044 = vset.pattern.permute.xlu1 %v5806_v7 }
 0x204   : > { %1861 = vperm.xlu1 %3044, %v4208_v46  }
 0x208   : > { %1865 = vperm.xlu1 %3044, %v4181_v62  }
 0x20c   : > { %3045 = vset.pattern.permute.xlu1 %v5807_v50 }
 0x20d   : > { %1897 = vperm.xlu1 %3045, %v4168_v52  }
 0x211   : > { %1905 = vperm.xlu1 %3045, %v4181_v62  }
 0x215   : > { %1909 = vperm.xlu1 %3045, %v4217_v34  }
 0x219   : > { %3046 = vset.pattern.permute.xlu1 %v5808_v41 }
 0x21a   : > { %1941 = vperm.xlu1 %3046, %v4208_v46  }
 0x21e   : > { %1945 = vperm.xlu1 %3046, %v4181_v62  }
 0x222   : > { %3047 = vset.pattern.permute.xlu1 %v5809_v11 }
 0x223   : > { %1977 = vperm.xlu1 %3047, %v4168_v52  }
 0x227   : > { %1985 = vperm.xlu1 %3047, %v4181_v62  }
 0x22b   : > { %1989 = vperm.xlu1 %3047, %v4217_v34  }
 0x22f   : > { %3048 = vset.pattern.permute.xlu1 %v5810_v55 }
 0x230   : > { %2021 = vperm.xlu1 %3048, %v4208_v46  }
 0x234   : > { %3049 = vset.pattern.permute.xlu1 %v5811_v28 }
 0x235   : > { %2198 = vperm.xlu1 %3049, %v2195_v39  }
 0x239   : > { %3050 = vset.pattern.permute.xlu1 %v5810_v55 }
 0x23a   : > { %2029 = vperm.xlu1 %3050, %v4217_v34  }
 0x23e   : > { %v1663_v20 = vpop.permute.xlu0 %1662  ;;  %3051 = vset.pattern.permute.xlu1 %v5812_v32 }
 0x23f   : > { %2061 = vperm.xlu1 %3051, %v4208_v46  }
 0x241   : > { %v1665_v44 = vpop.permute.xlu1 %1664 }
 0x242   : > { %v1675_v48 = vpop.permute.xlu0 %1674  ;;  %v1666_v14 = vsel %vm398_vm1, %v1663_v20, %v1665_v44  ;;  %v1667_v15 = vsel %vm398_vm1, %v1665_v44, %v1663_v20  ;;  %v5816_v44 = vld [vmem:[#allocation36_spill] sm:$0xff] }
 0x243   : > { %2065 = vperm.xlu1 %3051, %v4181_v62   ;;  %v1670_v56 = vmul.f32 %v1667_v15, %v5814_v43  ;;  %v1671_v31 = vmul.f32 %v1666_v14, %v5815_v1  ;;  %v1660_v61 = vmul.f32 %v5816_v44, %v3951_v53 }
 0x245   : > { %v1677_v36 = vpop.permute.xlu1 %1676 }
 0x246   : > { %v1687_v49 = vpop.permute.xlu0 %1686  ;;  %v1678_v33 = vsel %vm411_vm2, %v1675_v48, %v1677_v36  ;;  %v1679_v35 = vsel %vm411_vm2, %v1677_v36, %v1675_v48  ;;  %v5818_v48 = vld [vmem:[#allocation39_spill] sm:$0xff] }
 0x247   : > { %3052 = vset.pattern.permute.xlu1 %v5813_v57  ;;  %v1682_v36 = vmul.f32 %v5818_v48, %v1679_v35  ;;  %v1683_v43 = vmul.f32 %v3686_v45, %v1678_v33 }
 0x248   : > { %2097 = vperm.xlu1 %3052, %v4168_v52  }
 0x249   : > { %v1689_v39 = vpop.permute.xlu1 %1688 }
 0x24a   : > { %v1699_v59 = vpop.permute.xlu0 %1698  ;;  %v1690_v12 = vsel %vm425_vm3, %v1687_v49, %v1689_v39  ;;  %v1691_v20 = vsel %vm425_vm3, %v1689_v39, %v1687_v49  ;;  %v1672_v49 = vadd.f32 %v1670_v56, %v1660_v61  ;;  %v1673_v39 = vadd.f32 %v1671_v31, %v1661_v27 }
 0x24b   : > { %v1694_v37 = vmul.f32 %v3709_v30, %v1691_v20  ;;  %v1695_v53 = vmul.f32 %v3714_v21, %v1690_v12 }
 0x24c   : > { %2105 = vperm.xlu1 %3052, %v4181_v62   ;;  %v1684_v45 = vadd.f32 %v1682_v36, %v1672_v49  ;;  %v1685_v35 = vadd.f32 %v1683_v43, %v1673_v39 }
 0x24d   : > { %v1701_v10 = vpop.permute.xlu1 %1700 }
 0x24e   : > { %v1711_v16 = vpop.permute.xlu0 %1710  ;;  %v1702_v15 = vsel %vm439_vm4, %v1699_v59, %v1701_v10  ;;  %v1703_v14 = vsel %vm439_vm4, %v1701_v10, %v1699_v59  ;;  %v1696_v27 = vadd.f32 %v1694_v37, %v1684_v45  ;;  %v1697_v56 = vadd.f32 %v1695_v53, %v1685_v35 }
 0x24f   : > { %v1706_v33 = vmul.f32 %v3729_v60, %v1703_v14  ;;  %v1707_v10 = vmul.f32 %v3738_v47, %v1702_v15 }
 0x250   : > { %2109 = vperm.xlu1 %3052, %v4217_v34  }
 0x251   : > { %v1713_v1 = vpop.permute.xlu1 %1712  ;;  %v1709_v59 = vadd.f32 %v1707_v10, %v1697_v56 }
 0x252   : > { %v1723_v23 = vpop.permute.xlu0 %1722  ;;  %v1714_v3 = vsel %vm453_vm5, %v1711_v16, %v1713_v1  ;;  %v1715_v9 = vsel %vm453_vm5, %v1713_v1, %v1711_v16 }
 0x253   : > { %v1718_v12 = vmul.f32 %v3751_v2, %v1714_v3  ;;  %v1719_v16 = vmul.f32 %v3760_v8, %v1715_v9 }
 0x254   : > { %3053 = vset.pattern.permute.xlu1 %v5811_v28  ;;  %v1708_v28 = vadd.f32 %v1706_v33, %v1696_v27 }
 0x255   : > { %v1725_v61 = vpop.permute.xlu1 %1724  ;;  %v1721_v37 = vadd.f32 %v1719_v16, %v1709_v59 }
 0x256   : > { %v1735_v31 = vpop.permute.xlu0 %1734  ;;  %v1726_v30 = vsel %vm467_vm6, %v1723_v23, %v1725_v61  ;;  %v1727_v21 = vsel %vm467_vm6, %v1725_v61, %v1723_v23  ;;  %v1720_v23 = vadd.f32 %v1718_v12, %v1708_v28 }
 0x257   : > { %v1730_v60 = vmul.f32 %v3774_v51, %v1726_v30  ;;  %v1731_v47 = vmul.f32 %v3779_v24, %v1727_v21 }
 0x259   : > { %v1737_v20 = vpop.permute.xlu1 %1736  ;;  %v1732_v43 = vadd.f32 %v1730_v60, %v1720_v23  ;;  %v1733_v1 = vadd.f32 %v1731_v47, %v1721_v37  ;;  %v3165_v37 = vld [vmem:[%s3304_s15 + $0x98] sm:$0xff] }
 0x25a   : > { %v1738_v44 = vsel %vm481_vm7, %v1735_v31, %v1737_v20  ;;  %v1739_v48 = vsel %vm481_vm7, %v1737_v20, %v1735_v31  ;;  %v1747_v8 = vpop.permute.xlu0 %1746 }
 0x25b   : > { %v1742_v36 = vmul.f32 %v3798_v42, %v1738_v44  ;;  %v1743_v2 = vmul.f32 %v3803_v22, %v1739_v48  ;;  %v3164_v48 = vld [vmem:[%s3304_s15 + $0x90] sm:$0xff] }
 0x25d   : > { %v1749_v15 = vpop.permute.xlu1 %1748  ;;  %v1744_v14 = vadd.f32 %v1742_v36, %v1732_v43  ;;  %v1745_v49 = vadd.f32 %v1743_v2, %v1733_v1 }
 0x25e   : > { %v1750_v51 = vsel %vm495_vm8, %v1747_v8, %v1749_v15  ;;  %v1751_v24 = vsel %vm495_vm8, %v1749_v15, %v1747_v8 }
 0x25f   : > { %v1754_v39 = vmul.f32 %v3831_v38, %v1750_v51  ;;  %v1755_v53 = vmul.f32 %v3836_v40, %v1751_v24 }
 0x261   : > { %v1756_v42 = vadd.f32 %v1754_v39, %v1744_v14  ;;  %v1757_v9 = vadd.f32 %v1755_v53, %v1745_v49 }
 0x267   : > { %v1762_v3 = vpop.permute.xlu0 %1761 }
 0x268   : > { %v1764_v22 = vadd.f32 %v1762_v3, %v1756_v42  ;;  %v1765_v45 = vadd.f32 %v1762_v3, %v1757_v9  ;;  %v3166_v42 = vld [vmem:[%s3304_s15 + $0xa0] sm:$0xff] }
 0x26a   : > { %v1768_v35 = vmul.f32 0.70710677, %v1764_v22  ;;  %v1769_v33 = vmul.f32 0.70710677, %v1765_v45  ;;  %v4302_v10 = vpop.permute.xlu1 %1782  ;;  %v1766_v40 = vmul.f32 0.5, %v1764_v22  ;;  %v1767_v56 = vmul.f32 0.5, %v1765_v45 }
 0x26b   : > { %v1793_v31 = vpop.permute.xlu0 %1792  ;;  %v3167_v22 = vld [vmem:[%s3304_s15 + $0xa8] sm:$0xff] }
 0x26c   : > { %3096 = verf.f32 %v1768_v35  ;;  %v1804_v9 = vadd.f32 %v3166_v42, %v1793_v31  ;;  %v1805_v45 = vadd.f32 %v3167_v22, %v1793_v31 }
 0x26d   : > { %3098 = verf.f32 %v1769_v33 }
 0x26e   : > { %v1788_v61 = vpop.permute.xlu1 %1787 }
 0x26f   : > { %v4308_v59 = vpop.permute.xlu0 %1814  ;;  %v1802_v23 = vadd.f32 %v3164_v48, %v1788_v61  ;;  %v1803_v36 = vadd.f32 %v3165_v37, %v1788_v61 }
 0x272   : > { %v4304_v30 = vpop.permute.xlu1 %1797 }
 0x273   : > { %v1825_v24 = vpop.permute.xlu0 %1824 }
 0x276   : > { %v1820_v16 = vpop.permute.xlu1 %1819 }
 0x279   : > { %v3097_v38 = vpop.eup %3096 }
 0x27a   : > { %v3099_v21 = vpop.eup %3098  ;;  %v1772_v27 = vadd.f32 1.0, %v3097_v38  ;;  %v1830_v44 = vpop.permute.xlu1 %1829 }
 0x27b   : > { %v1773_v12 = vadd.f32 1.0, %v3099_v21 }
 0x27c   : > { %v4306_v28 = vmul.f32 %v1772_v27, %v1766_v40 }
 0x27d   : > { %v4310_v60 = vmul.f32 %v1773_v12, %v1767_v56 }
 0x27e   : > { %v4314_v47 = vrot.slane %v4306_v28, %v3890_v54  ;;  %v4332_v15 = vrot.slane %v4306_v28, %v3903_v58  ;;  %v4352_v31 = vrot.slane %v4306_v28, %v3912_v13  ;;  %v4374_v42 = vrot.slane %v4306_v28, %v3929_v19 }
 0x27f   : > { %v4318_v20 = vrot.slane %v4310_v60, %v3890_v54  ;;  %v4336_v51 = vrot.slane %v4310_v60, %v3903_v58  ;;  %v1862_v3 = vpop.permute.xlu1 %1861  ;;  %v4356_v48 = vrot.slane %v4310_v60, %v3912_v13 }
 0x280   : > { %v1842_v2 = vmul.f32 %v4314_v47, %v1820_v16  ;;  %v4324_v8 = vmul.f32 %v4314_v47, %v1830_v44  ;;  %v1844_v39 = vmul.f32 %v4314_v47, %v1825_v24  ;;  %v1882_v35 = vmul.f32 %v4332_v15, %v1862_v3  ;;  %5821 = vst [vmem:[#allocation37_spill] sm:$0xff] %v4352_v31 }
 0x281   : > { %v1843_v43 = vmul.f32 %v4318_v20, %v1820_v16  ;;  %v4328_v1 = vmul.f32 %v4318_v20, %v1830_v44  ;;  %v1845_v53 = vmul.f32 %v4318_v20, %v1825_v24  ;;  %v1883_v33 = vmul.f32 %v4336_v51, %v1862_v3  ;;  %5822 = vst [vmem:[#allocation38_spill] sm:$0xff] %v4356_v48 }
 0x282   : > { %v1850_v14 = vadd.f32 %v1842_v2, %v1802_v23  ;;  %v1852_v61 = vadd.f32 %v1844_v39, %v1804_v9  ;;  %5823 = vst [vmem:[#allocation36_spill] sm:$0xff] %v4374_v42  ;;  %v4378_v9 = vrot.slane %v4310_v60, %v3929_v19 }
 0x283   : > { %v1851_v49 = vadd.f32 %v1843_v43, %v1803_v36  ;;  %v1853_v38 = vadd.f32 %v1845_v53, %v1805_v45  ;;  %v1866_v27 = vpop.permute.xlu1 %1865 }
 0x284   : > { %v4344_v21 = vadd.f32 %v1882_v35, %v1850_v14  ;;  %v1884_v56 = vmul.f32 %v4332_v15, %v1866_v27  ;;  %v1885_v12 = vmul.f32 %v4336_v51, %v1866_v27  ;;  %5824 = vst [vmem:[#allocation40_spill] sm:$0xff] %v4378_v9 }
 0x285   : > { %v4346_v40 = vadd.f32 %v1883_v33, %v1851_v49 }
 0x286   : > { %5819 = vst [vmem:[#allocation15_spill] sm:$0xff] %v4344_v21  ;;  %v1892_v16 = vadd.f32 %v1884_v56, %v1852_v61  ;;  %v1893_v44 = vadd.f32 %v1885_v12, %v1853_v38  ;;  %v4390_v12 = vrot.slane %v4306_v28, %v3954_v6 }
 0x287   : > { %5820 = vst [vmem:[#allocation18_spill] sm:$0xff] %v4346_v40 }
 0x288   : > { %v1898_v23 = vpop.permute.xlu1 %1897  ;;  %5827 = vst [vmem:[#allocation78_spill] sm:$0xff] %v4390_v12 }
 0x289   : > { %v4359_v37 = vmul.f32 %v4352_v31, %v1898_v23  ;;  %v4362_v36 = vmul.f32 %v4356_v48, %v1898_v23 }
 0x28c   : > { %v1906_v2 = vpop.permute.xlu1 %1905 }
 0x28d   : > { %v1924_v43 = vmul.f32 %v4352_v31, %v1906_v2  ;;  %v1925_v24 = vmul.f32 %v4356_v48, %v1906_v2 }
 0x28f   : > { %v1932_v14 = vadd.f32 %v1924_v43, %v1892_v16  ;;  %v1933_v49 = vadd.f32 %v1925_v24, %v1893_v44  ;;  %v4394_v16 = vrot.slane %v4310_v60, %v3954_v6 }
 0x290   : > { %v1910_v39 = vpop.permute.xlu1 %1909 }
 0x291   : > { %v4367_v53 = vmul.f32 %v4352_v31, %v1910_v39  ;;  %v4370_v3 = vmul.f32 %v4356_v48, %v1910_v39  ;;  %5828 = vst [vmem:[#allocation79_spill] sm:$0xff] %v4394_v16  ;;  %v5867_v48 = vld [vmem:[#allocation21_spill] sm:$0xff] }
 0x295   : > { %v1942_v22 = vpop.permute.xlu1 %1941 }
 0x296   : > { %v4381_v45 = vmul.f32 %v4374_v42, %v1942_v22  ;;  %v4384_v35 = vmul.f32 %v4378_v9, %v1942_v22 }
 0x298   : > { %5825 = vst [vmem:[#allocation39_spill] sm:$0xff] %v4381_v45  ;;  %5826 = vst [vmem:[#allocation77_spill] sm:$0xff] %v4384_v35  ;;  %v3175_v35 = vld [vmem:[%s3304_s15 + $0x40] sm:$0xff]  ;;  %v5866_v45 = vld [vmem:[#allocation19_spill] sm:$0xff] }
 0x299   : > { %v1946_v33 = vpop.permute.xlu1 %1945  ;;  %v1173_v40 = vadd.f32 %v3175_v35, %v5866_v45 }
 0x29a   : > { %v1964_v61 = vmul.f32 %v4374_v42, %v1946_v33  ;;  %v1965_v38 = vmul.f32 %v4378_v9, %v1946_v33 }
 0x29c   : > { %v1972_v27 = vadd.f32 %v1964_v61, %v1932_v14  ;;  %v1973_v56 = vadd.f32 %v1965_v38, %v1933_v49  ;;  %v4416_v38 = vrot.slane %v4306_v28, %v3987_v4 }
 0x29e   : > { %v1978_v44 = vpop.permute.xlu1 %1977  ;;  %5835 = vst [vmem:[#allocation86_spill] sm:$0xff] %v4416_v38 }
 0x29f   : > { %v4397_v23 = vmul.f32 %v4390_v12, %v1978_v44  ;;  %v4400_v2 = vmul.f32 %v4394_v16, %v1978_v44  ;;  %v4420_v44 = vrot.slane %v4310_v60, %v3987_v4 }
 0x2a1   : > { %5829 = vst [vmem:[#allocation80_spill] sm:$0xff] %v4397_v23  ;;  %5830 = vst [vmem:[#allocation81_spill] sm:$0xff] %v4400_v2 }
 0x2a2   : > { %v1986_v43 = vpop.permute.xlu1 %1985  ;;  %5836 = vst [vmem:[#allocation87_spill] sm:$0xff] %v4420_v44 }
 0x2a3   : > { %v2004_v24 = vmul.f32 %v4390_v12, %v1986_v43  ;;  %v2005_v14 = vmul.f32 %v4394_v16, %v1986_v43  ;;  %v2270_v43 = vpop.f32.mrf.mxu1 }
 0x2a5   : > { %v4404_v49 = vadd.f32 %v2004_v24, %v1972_v27  ;;  %v4406_v39 = vadd.f32 %v2005_v14, %v1973_v56  ;;  %v2272_v14 = vpop.f32.mrf.mxu1 }
 0x2a6   : > { %v1990_v22 = vpop.permute.xlu1 %1989 }
 0x2a7   : > { %5831 = vst [vmem:[#allocation82_spill] sm:$0xff] %v4404_v49  ;;  %5832 = vst [vmem:[#allocation83_spill] sm:$0xff] %v4406_v39  ;;  %v4409_v33 = vmul.f32 %v4390_v12, %v1990_v22  ;;  %v4412_v61 = vmul.f32 %v4394_v16, %v1990_v22 }
 0x2a9   : > { %5833 = vst [vmem:[#allocation84_spill] sm:$0xff] %v4409_v33  ;;  %5834 = vst [vmem:[#allocation85_spill] sm:$0xff] %v4412_v61 }
 0x2ab   : > { %v2022_v27 = vpop.permute.xlu1 %2021 }
 0x2ac   : > { %v4423_v56 = vmul.f32 %v4416_v38, %v2022_v27  ;;  %v4426_v24 = vmul.f32 %v4420_v44, %v2022_v27  ;;  %v4440_v27 = vrot.slane %v4310_v60, %v4004_v63 }
 0x2ae   : > { %5837 = vst [vmem:[#allocation88_spill] sm:$0xff] %v4423_v56  ;;  %5838 = vst [vmem:[#allocation89_spill] sm:$0xff] %v4426_v24  ;;  %v4436_v56 = vrot.slane %v4306_v28, %v4004_v63  ;;  %v4460_v24 = vrot.slane %v4310_v60, %v4033_v0 }
 0x2af   : > { %5842 = vst [vmem:[#allocation93_spill] sm:$0xff] %v4440_v27 }
 0x2b0   : > { %v2199_v39 = vpop.permute.xlu1 %2198  ;;  %5841 = vst [vmem:[#allocation92_spill] sm:$0xff] %v4436_v56  ;;  %5848 = vst [vmem:[#allocation99_spill] sm:$0xff] %v4460_v24 }
 0x2b1   : > { %v2271_v22 = vadd.f32 %v2270_v43, %v2199_v39  ;;  %v2273_v49 = vadd.f32 %v2272_v14, %v2199_v39 }
 0x2b3   : > { %v2277_v16 = vmul.f32 0.70710677, %v2271_v22  ;;  %v2278_v12 = vmul.f32 0.70710677, %v2273_v49 }
 0x2b5   : > { %3100 = verf.f32 %v2277_v16  ;;  %v2030_v61 = vpop.permute.xlu1 %2029 }
 0x2b6   : > { %3102 = verf.f32 %v2278_v12  ;;  %v4429_v33 = vmul.f32 %v4416_v38, %v2030_v61  ;;  %v4432_v2 = vmul.f32 %v4420_v44, %v2030_v61  ;;  %v4456_v38 = vrot.slane %v4306_v28, %v4033_v0 }
 0x2b8   : > { %5839 = vst [vmem:[#allocation90_spill] sm:$0xff] %v4429_v33  ;;  %5840 = vst [vmem:[#allocation91_spill] sm:$0xff] %v4432_v2  ;;  %v2275_v2 = vmul.f32 0.5, %v2271_v22  ;;  %v2276_v33 = vmul.f32 0.5, %v2273_v49 }
 0x2b9   : > { %5847 = vst [vmem:[#allocation98_spill] sm:$0xff] %v4456_v38 }
 0x2ba   : > { %v2062_v39 = vpop.permute.xlu1 %2061 }
 0x2bb   : > { %v4443_v43 = vmul.f32 %v4436_v56, %v2062_v39  ;;  %v4446_v12 = vmul.f32 %v4440_v27, %v2062_v39 }
 0x2bd   : > { %5843 = vst [vmem:[#allocation94_spill] sm:$0xff] %v4443_v43  ;;  %5844 = vst [vmem:[#allocation95_spill] sm:$0xff] %v4446_v12 }
 0x2be   : > { %v2066_v16 = vpop.permute.xlu1 %2065 }
 0x2bf   : > { %v4449_v14 = vmul.f32 %v4436_v56, %v2066_v16  ;;  %v4452_v61 = vmul.f32 %v4440_v27, %v2066_v16 }
 0x2c1   : > { %5845 = vst [vmem:[#allocation96_spill] sm:$0xff] %v4449_v14  ;;  %5846 = vst [vmem:[#allocation97_spill] sm:$0xff] %v4452_v61 }
 0x2c2   : > { %v3101_v44 = vpop.eup %3100 }
 0x2c3   : > { %v3103_v43 = vpop.eup %3102  ;;  %v2281_v39 = vadd.f32 1.0, %v3101_v44  ;;  %v2098_v12 = vpop.permute.xlu1 %2097  ;;  %v2296_v44 = vld [vmem:[%s5563_s3 + $0x8] sm:$0xff] }
 0x2c4   : > { %v2282_v23 = vadd.f32 1.0, %v3103_v43  ;;  %v4463_v56 = vmul.f32 %v4456_v38, %v2098_v12  ;;  %v4466_v16 = vmul.f32 %v4460_v24, %v2098_v12 }
 0x2c5   : > { %v4468_v27 = vmul.f32 %v2281_v39, %v2275_v2 }
 0x2c6   : > { %5849 = vst [vmem:[#allocation100_spill] sm:$0xff] %v4463_v56  ;;  %5850 = vst [vmem:[#allocation101_spill] sm:$0xff] %v4466_v16  ;;  %v4470_v28 = vmul.f32 %v2282_v23, %v2276_v33  ;;  %v2295_v33 = vld [vmem:[%s5563_s3] sm:$0xff]  ;;  %v2974_v16 = vld [vmem:[%s5563_s3 + $0x48] sm:$0xff] }
 0x2c7   : > { %v2106_v61 = vpop.permute.xlu1 %2105  ;;  %2289 = vrot.lane.b32.xlu0 %v4468_v27, %s3216_s11  ;;  %v2975_v56 = vld [vmem:[%s5563_s3 + $0x10] sm:$0xff] }
 0x2c8   : > { %2291 = vrot.lane.b32.xlu1 %v4470_v28, %s3216_s11  ;;  %v4477_v60 = vmul.f32 %v4456_v38, %v2106_v61  ;;  %v4480_v49 = vmul.f32 %v4460_v24, %v2106_v61  ;;  %v2973_v61 = vld [vmem:[%s5563_s3 + $0x40] sm:$0xff] }
 0x2c9   : > { %v2287_v42 = vmul.f32 %v2973_v61, %v4468_v27 }
 0x2ca   : > { %5851 = vst [vmem:[#allocation102_spill] sm:$0xff] %v4477_v60  ;;  %5852 = vst [vmem:[#allocation103_spill] sm:$0xff] %v4480_v49  ;;  %v2977_v49 = vld [vmem:[%s5563_s3 + $0x20] sm:$0xff]  ;;  %v2978_v60 = vld [vmem:[%s5563_s3 + $0x28] sm:$0xff] }
 0x2cb   : > { %2301 = vrot.lane.b32.xlu0 %v4468_v27, %s3215_s9 }
 0x2cc   : > { %2303 = vrot.lane.b32.xlu1 %v4470_v28, %s3215_s9 }
 0x2cf   : > { %2313 = vrot.lane.b32.xlu0 %v4468_v27, %s3217_s12 }
 0x2d0   : > { %2315 = vrot.lane.b32.xlu1 %v4470_v28, %s3217_s12 }
 0x2d3   : > { %2325 = vrot.lane.b32.xlu0 %v4468_v27, %s3218_s13 }
 0x2d4   : > { %2327 = vrot.lane.b32.xlu1 %v4470_v28, %s3218_s13 }
 0x2d7   : > { %2337 = vrot.lane.b32.xlu0 %v4468_v27, %s3219_s14 }
 0x2d8   : > { %2339 = vrot.lane.b32.xlu1 %v4470_v28, %s3219_s14 }
 0x2db   : > { %2349 = vrot.lane.b32.xlu0 %v4468_v27, %s3220_s16 }
 0x2dc   : > { %2351 = vrot.lane.b32.xlu1 %v4470_v28, %s3220_s16 }
 0x2df   : > { %2361 = vrot.lane.b32.xlu0 %v4468_v27, %s3221_s17 }
 0x2e0   : > { %2363 = vrot.lane.b32.xlu1 %v4470_v28, %s3221_s17 }
 0x2e3   : > { %2373 = vrot.lane.b32.xlu0 %v4468_v27, %s3222_s18 }
 0x2e4   : > { %2375 = vrot.lane.b32.xlu1 %v4470_v28, %s3222_s18 }
 0x2e7   : > { %2388 = vperm.xlu0 %3026, %v4152_v26   ;;  %v4523_v26 = vld [vmem:[%s5565_s5] sm:$0xff] }
 0x2e8   : > { %2409 = vperm.xlu1 %3053, %v4175_v17   ;;  %5853 = vst [vmem:[#allocation104_spill] sm:$0xff] %v4523_v26  ;;  %v4552_v17 = vld [vmem:[%s5565_s5 + $0x8] sm:$0xff] }
 0x2eb   : > { %2419 = vperm.xlu0 %3026, %v4160_v5   ;;  %v4530_v5 = vld [vmem:[%s5565_s5 + $0x18] sm:$0xff] }
 0x2ec   : > { %2414 = vperm.xlu1 %3053, %v4187_v29   ;;  %5854 = vst [vmem:[#allocation105_spill] sm:$0xff] %v4530_v5  ;;  %v4571_v29 = vpop.permute.xlu1 %2109 }
 0x2ed   : > { %5855 = vst [vmem:[#allocation106_spill] sm:$0xff] %v4571_v29 }
 0x2ef   : > { %2441 = vperm.xlu0 %3026, %v4168_v52  }
 0x2f0   : > { %2424 = vperm.xlu1 %3053, %v4201_v25  }
 0x2f3   : > { %2451 = vperm.xlu0 %3026, %v4181_v62  }
 0x2f4   : > { %2446 = vperm.xlu1 %3053, %v4208_v46  }
 0x2f7   : > { %3054 = vset.pattern.permute.xlu0 %v5806_v7 }
 0x2f8   : > { %2456 = vperm.xlu1 %3053, %v4217_v34   ;;  %604 = vperm.xlu0 %3054, %v4523_v26  }
 0x2fc   : > { %3055 = vset.pattern.permute.xlu1 %v5806_v7  ;;  %616 = vperm.xlu0 %3054, %v4530_v5  }
 0x2fd   : > { %2488 = vperm.xlu1 %3055, %v4208_v46  }
 0x300   : > { %1230 = vperm.xlu0 %3054, %v4523_v26  }
 0x301   : > { %2492 = vperm.xlu1 %3055, %v4181_v62  }
 0x304   : > { %1242 = vperm.xlu0 %3054, %v4530_v5  }
 0x305   : > { %3057 = vset.pattern.permute.xlu1 %v5807_v50 }
 0x306   : > { %2524 = vperm.xlu1 %3057, %v4168_v52  }
 0x308   : > { %1857 = vperm.xlu0 %3054, %v4168_v52  }
 0x30a   : > { %2532 = vperm.xlu1 %3057, %v4181_v62  }
 0x30c   : > { %1869 = vperm.xlu0 %3054, %v4217_v34  }
 0x30e   : > { %2536 = vperm.xlu1 %3057, %v4217_v34  }
 0x310   : > { %2484 = vperm.xlu0 %3054, %v4168_v52  }
 0x312   : > { %3059 = vset.pattern.permute.xlu1 %v5808_v41 }
 0x313   : > { %2568 = vperm.xlu1 %3059, %v4208_v46  }
 0x314   : > { %2496 = vperm.xlu0 %3054, %v4217_v34  }
 0x317   : > { %2572 = vperm.xlu1 %3059, %v4181_v62  }
 0x318   : > { %3056 = vset.pattern.permute.xlu0 %v5807_v50 }
 0x319   : > { %648 = vperm.xlu0 %3056, %v4552_v17  }
 0x31b   : > { %3061 = vset.pattern.permute.xlu1 %v5809_v11 }
 0x31c   : > { %2604 = vperm.xlu1 %3061, %v4168_v52  }
 0x31d   : > { %1274 = vperm.xlu0 %3056, %v4552_v17  }
 0x320   : > { %2612 = vperm.xlu1 %3061, %v4181_v62  }
 0x321   : > { %1901 = vperm.xlu0 %3056, %v4208_v46  }
 0x324   : > { %2616 = vperm.xlu1 %3061, %v4217_v34  }
 0x325   : > { %2528 = vperm.xlu0 %3056, %v4208_v46  }
 0x328   : > { %3063 = vset.pattern.permute.xlu1 %v5810_v55 }
 0x329   : > { %2648 = vperm.xlu1 %3063, %v4208_v46   ;;  %3058 = vset.pattern.permute.xlu0 %v5808_v41 }
 0x32a   : > { %684 = vperm.xlu0 %3058, %v4523_v26  }
 0x32d   : > { %2652 = vperm.xlu1 %3063, %v4181_v62  }
 0x32e   : > { %696 = vperm.xlu0 %3058, %v4530_v5  }
 0x331   : > { %3065 = vset.pattern.permute.xlu1 %v5812_v32 }
 0x332   : > { %2684 = vperm.xlu1 %3065, %v4168_v52   ;;  %1310 = vperm.xlu0 %3058, %v4523_v26  }
 0x336   : > { %2692 = vperm.xlu1 %3065, %v4181_v62   ;;  %1322 = vperm.xlu0 %3058, %v4530_v5  }
 0x339   : > { %v2290_v25 = vpop.permute.xlu0 %2289 }
 0x33a   : > { %2696 = vperm.xlu1 %3065, %v4217_v34   ;;  %v2292_v7 = vpop.permute.xlu1 %2291  ;;  %1937 = vperm.xlu0 %3058, %v4168_v52  }
 0x33b   : > { %v2293_v22 = vsel %vm398_vm1, %v2290_v25, %v2292_v7  ;;  %v2294_v43 = vsel %vm398_vm1, %v2292_v7, %v2290_v25  ;;  %v2976_v25 = vld [vmem:[%s5563_s3 + $0x18] sm:$0xff] }
 0x33c   : > { %v2297_v38 = vmul.f32 %v2295_v33, %v2294_v43  ;;  %v2298_v29 = vmul.f32 %v2296_v44, %v2293_v22  ;;  %v2979_v22 = vld [vmem:[%s5563_s3 + $0x30] sm:$0xff]  ;;  %v2980_v43 = vld [vmem:[%s5563_s3 + $0x38] sm:$0xff] }
 0x33d   : > { %v2302_v50 = vpop.permute.xlu0 %2301 }
 0x33e   : > { %3067 = vset.pattern.permute.xlu1 %v5813_v57  ;;  %v2304_v41 = vpop.permute.xlu1 %2303  ;;  %1949 = vperm.xlu0 %3058, %v4217_v34  }
 0x33f   : > { %2728 = vperm.xlu1 %3067, %v4208_v46   ;;  %v2305_v7 = vsel %vm411_vm2, %v2302_v50, %v2304_v41  ;;  %v2306_v24 = vsel %vm411_vm2, %v2304_v41, %v2302_v50  ;;  %v2288_v50 = vmul.f32 %v2974_v16, %v4470_v28  ;;  %v2981_v28 = vld [vmem:[%s5563_s3 + $0x50] sm:$0xff] }
 0x340   : > { %v2309_v41 = vmul.f32 %v2975_v56, %v2306_v24  ;;  %v2310_v33 = vmul.f32 %v2976_v25, %v2305_v7  ;;  %v2299_v56 = vadd.f32 %v2297_v38, %v2287_v42 }
 0x341   : > { %v2314_v23 = vpop.permute.xlu0 %2313  ;;  %v2300_v24 = vadd.f32 %v2298_v29, %v2288_v50 }
 0x342   : > { %v2316_v2 = vpop.permute.xlu1 %2315  ;;  %2564 = vperm.xlu0 %3058, %v4168_v52   ;;  %v2311_v25 = vadd.f32 %v2309_v41, %v2299_v56 }
 0x343   : > { %2732 = vperm.xlu1 %3067, %v4181_v62   ;;  %v2317_v14 = vsel %vm425_vm3, %v2314_v23, %v2316_v2  ;;  %v2318_v0 = vsel %vm425_vm3, %v2316_v2, %v2314_v23  ;;  %v2982_v2 = vld [vmem:[%s5563_s3 + $0x58] sm:$0xff]  ;;  %v2312_v42 = vadd.f32 %v2310_v33, %v2300_v24 }
 0x344   : > { %v2321_v16 = vmul.f32 %v2977_v49, %v2318_v0  ;;  %v2984_v49 = vld [vmem:[%s5563_s3 + $0x68] sm:$0xff] }
 0x345   : > { %v2326_v12 = vpop.permute.xlu0 %2325 }
 0x346   : > { %v2328_v39 = vpop.permute.xlu1 %2327  ;;  %2576 = vperm.xlu0 %3058, %v4217_v34   ;;  %v2323_v7 = vadd.f32 %v2321_v16, %v2311_v25  ;;  %v2987_v25 = vld [vmem:[%s5563_s3 + $0x80] sm:$0xff] }
 0x347   : > { %v2329_v23 = vsel %vm439_vm4, %v2326_v12, %v2328_v39  ;;  %v2330_v27 = vsel %vm439_vm4, %v2328_v39, %v2326_v12 }
 0x348   : > { %v2333_v38 = vmul.f32 %v2979_v22, %v2330_v27  ;;  %v2334_v0 = vmul.f32 %v2980_v43, %v2329_v23  ;;  %v2986_v22 = vld [vmem:[%s5563_s3 + $0x78] sm:$0xff] }
 0x349   : > { %v2338_v9 = vpop.permute.xlu0 %2337 }
 0x34a   : > { %v2340_v44 = vpop.permute.xlu1 %2339  ;;  %3060 = vset.pattern.permute.xlu0 %v5809_v11  ;;  %v2322_v11 = vmul.f32 %v2978_v60, %v2317_v14  ;;  %v2983_v60 = vld [vmem:[%s5563_s3 + $0x60] sm:$0xff]  ;;  %v2335_v23 = vadd.f32 %v2333_v38, %v2323_v7 }
 0x34b   : > { %728 = vperm.xlu0 %3060, %v4552_v17   ;;  %v2341_v61 = vsel %vm453_vm5, %v2338_v9, %v2340_v44  ;;  %v2342_v12 = vsel %vm453_vm5, %v2340_v44, %v2338_v9  ;;  %v2985_v44 = vld [vmem:[%s5563_s3 + $0x70] sm:$0xff] }
 0x34c   : > { %v2324_v50 = vadd.f32 %v2322_v11, %v2312_v42  ;;  %v2345_v41 = vmul.f32 %v2981_v28, %v2341_v61  ;;  %v2346_v33 = vmul.f32 %v2982_v2, %v2342_v12  ;;  %v2988_v42 = vld [vmem:[%s5563_s3 + $0x88] sm:$0xff] }
 0x34d   : > { %v2350_v39 = vpop.permute.xlu0 %2349 }
 0x34e   : > { %v2352_v14 = vpop.permute.xlu1 %2351  ;;  %v2336_v27 = vadd.f32 %v2334_v0, %v2324_v50  ;;  %v2347_v28 = vadd.f32 %v2345_v41, %v2335_v23 }
 0x34f   : > { %v2353_v29 = vsel %vm467_vm6, %v2350_v39, %v2352_v14  ;;  %v2354_v9 = vsel %vm467_vm6, %v2352_v14, %v2350_v39  ;;  %1354 = vperm.xlu0 %3060, %v4552_v17  }
 0x350   : > { %v2357_v56 = vmul.f32 %v2983_v60, %v2353_v29  ;;  %v2358_v24 = vmul.f32 %v2984_v49, %v2354_v9  ;;  %v2348_v2 = vadd.f32 %v2346_v33, %v2336_v27 }
 0x351   : > { %v2362_v43 = vpop.permute.xlu0 %2361 }
 0x352   : > { %v2364_v39 = vpop.permute.xlu1 %2363  ;;  %v2359_v0 = vadd.f32 %v2357_v56, %v2347_v28  ;;  %v2360_v14 = vadd.f32 %v2358_v24, %v2348_v2  ;;  %v5858_v2 = vld [vmem:[#allocation49_spill] sm:$0xff] }
 0x353   : > { %v2365_v16 = vsel %vm481_vm7, %v2362_v43, %v2364_v39  ;;  %v2366_v11 = vsel %vm481_vm7, %v2364_v39, %v2362_v43  ;;  %1981 = vperm.xlu0 %3060, %v4208_v46  }
 0x354   : > { %v2369_v61 = vmul.f32 %v2985_v44, %v2365_v16  ;;  %v2370_v12 = vmul.f32 %v2986_v22, %v2366_v11  ;;  %v5856_v16 = vld [vmem:[#allocation32_spill] sm:$0xff] }
 0x355   : > { %v2374_v38 = vpop.permute.xlu0 %2373  ;;  %v5857_v11 = vld [vmem:[#allocation48_spill] sm:$0xff] }
 0x356   : > { %v2376_v60 = vpop.permute.xlu1 %2375  ;;  %v2371_v9 = vadd.f32 %v2369_v61, %v2359_v0  ;;  %v2372_v7 = vadd.f32 %v2370_v12, %v2360_v14  ;;  %v588_v28 = vmul.f32 %v5857_v11, %v5856_v16  ;;  %v587_v61 = vmul.f32 %v5858_v2, %v5856_v16  ;;  %v5859_v12 = vld [vmem:[#allocation5_spill] sm:$0xff]  ;;  %v5860_v0 = vld [vmem:[#allocation35_spill] sm:$0xff]  ;;  %v5861_v14 = vld [vmem:[#allocation42_spill] sm:$0xff] }
 0x357   : > { %v2377_v49 = vsel %vm495_vm8, %v2374_v38, %v2376_v60  ;;  %v2378_v29 = vsel %vm495_vm8, %v2376_v60, %v2374_v38  ;;  %2608 = vperm.xlu0 %3060, %v4208_v46   ;;  %v593_v38 = vmul.f32 %v5858_v2, %v5859_v12  ;;  %v1213_v60 = vmul.f32 %v5861_v14, %v5860_v0 }
 0x358   : > { %v2381_v50 = vmul.f32 %v2987_v25, %v2377_v49  ;;  %v2382_v41 = vmul.f32 %v2988_v42, %v2378_v29  ;;  %v594_v25 = vmul.f32 %v5857_v11, %v5859_v12  ;;  %v5862_v49 = vld [vmem:[#allocation43_spill] sm:$0xff] }
 0x359   : > { %v1214_v29 = vmul.f32 %v5862_v49, %v5860_v0  ;;  %v3174_v0 = vld [vmem:[%s3304_s15 + $0x30] sm:$0xff]  ;;  %v4735_v6 = vadd.f32 %v1213_v60, %v1173_v40  ;;  %v5869_v60 = vld [vmem:[#allocation53_spill] sm:$0xff] }
 0x35a   : > { %v2383_v33 = vadd.f32 %v2381_v50, %v2371_v9  ;;  %v2384_v44 = vadd.f32 %v2382_v41, %v2372_v7  ;;  %v5863_v9 = vld [vmem:[#allocation23_spill] sm:$0xff]  ;;  %v3171_v50 = vld [vmem:[%s3304_s15 + $0x38] sm:$0xff] }
 0x35b   : > { %3062 = vset.pattern.permute.xlu0 %v5810_v55  ;;  %v1219_v7 = vmul.f32 %v5861_v14, %v5863_v9  ;;  %v5864_v41 = vld [vmem:[#allocation3_spill] sm:$0xff]  ;;  %v1220_v63 = vmul.f32 %v5862_v49, %v5863_v9 }
 0x35c   : > { %764 = vperm.xlu0 %3062, %v4523_v26   ;;  %v553_v4 = vadd.f32 %v3174_v0, %v5864_v41 }
 0x35e   : > { %v601_v0 = vadd.f32 %v593_v38, %v553_v4 }
 0x360   : > { %776 = vperm.xlu0 %3062, %v4530_v5  }
 0x362   : > { %v2389_v22 = vpop.permute.xlu0 %2388 }
 0x363   : > { %v4679_v43 = vadd.f32 %v2389_v22, %v2383_v33  ;;  %v4681_v23 = vadd.f32 %v2389_v22, %v2384_v44  ;;  %v4683_v18 = vpop.permute.xlu1 %2409  ;;  %v554_v33 = vadd.f32 %v3171_v50, %v5864_v41  ;;  %v3172_v44 = vld [vmem:[%s3304_s15] sm:$0xff]  ;;  %v5865_v22 = vld [vmem:[#allocation29_spill] sm:$0xff]  ;;  %v3176_v50 = vld [vmem:[%s3304_s15 + $0x48] sm:$0xff] }
 0x364   : > { %1390 = vperm.xlu0 %3062, %v4523_v26   ;;  %v1174_v21 = vadd.f32 %v3176_v50, %v5866_v45  ;;  %v3179_v45 = vld [vmem:[%s3304_s15 + $0x80] sm:$0xff] }
 0x365   : > { %v2395_v46 = vmul.f32 0.70710677, %v4679_v43  ;;  %v2396_v27 = vmul.f32 0.70710677, %v4681_v23  ;;  %v602_v41 = vadd.f32 %v594_v25, %v554_v33  ;;  %v4743_v50 = vadd.f32 %v3179_v45, %v4302_v10 }
 0x366   : > { %v4688_v56 = vpop.permute.xlu0 %2419  ;;  %v4737_v35 = vadd.f32 %v1214_v29, %v1174_v21 }
 0x367   : > { %3104 = verf.f32 %v2395_v46  ;;  %v4690_v55 = vpop.permute.xlu1 %2414  ;;  %v547_v46 = vadd.f32 %v3172_v44, %v5865_v22  ;;  %v3177_v44 = vld [vmem:[%s3304_s15 + $0x70] sm:$0xff] }
 0x368   : > { %3106 = verf.f32 %v2396_v27  ;;  %1402 = vperm.xlu0 %3062, %v4530_v5   ;;  %v3173_v27 = vld [vmem:[%s3304_s15 + $0x8] sm:$0xff]  ;;  %v1179_v31 = vadd.f32 %v3177_v44, %v5867_v48 }
 0x369   : > { %v548_v16 = vadd.f32 %v3173_v27, %v5865_v22  ;;  %v3178_v22 = vld [vmem:[%s3304_s15 + $0x78] sm:$0xff]  ;;  %v595_v5 = vadd.f32 %v587_v61, %v547_v46  ;;  %v3180_v44 = vld [vmem:[%s3304_s15 + $0x88] sm:$0xff]  ;;  %v3181_v61 = vld [vmem:[%s3304_s15 + $0xc0] sm:$0xff] }
 0x36a   : > { %v4693_v24 = vpop.permute.xlu0 %2441  ;;  %v1180_v27 = vadd.f32 %v3178_v22, %v5867_v48  ;;  %v4739_v26 = vadd.f32 %v1219_v7, %v1179_v31  ;;  %v4751_v48 = vmul.f32 %v4314_v47, %v4308_v59  ;;  %v2427_v25 = vadd.f32 %v3181_v61, %v4683_v18 }
 0x36b   : > { %v4695_v39 = vpop.permute.xlu1 %2424  ;;  %v596_v9 = vadd.f32 %v588_v28, %v548_v16  ;;  %v4757_v28 = vmul.f32 %v4318_v20, %v4308_v59  ;;  %v2394_v7 = vmul.f32 0.5, %v4681_v23  ;;  %v3182_v59 = vld [vmem:[%s3304_s15 + $0xc8] sm:$0xff]  ;;  %v3183_v16 = vld [vmem:[%s3304_s15 + $0xe0] sm:$0xff]  ;;  %v3185_v23 = vld [vmem:[%s3304_s15 + $0xd0] sm:$0xff] }
 0x36c   : > { %2017 = vperm.xlu0 %3062, %v4168_v52   ;;  %v4753_v21 = vadd.f32 %v1220_v63, %v1180_v27  ;;  %v2393_v63 = vmul.f32 0.5, %v4679_v43  ;;  %v2428_v20 = vadd.f32 %v3182_v59, %v4683_v18  ;;  %v2431_v22 = vadd.f32 %v3183_v16, %v4688_v56  ;;  %v3187_v59 = vld [vmem:[%s3304_s15 + $0xf0] sm:$0xff] }
 0x36e   : > { %v4704_v42 = vpop.permute.xlu0 %2451 }
 0x36f   : > { %v4720_v12 = vpop.permute.xlu1 %2446 }
 0x370   : > { %2025 = vperm.xlu0 %3062, %v4181_v62   ;;  %v4747_v62 = vadd.f32 %v3180_v44, %v4302_v10  ;;  %v5868_v10 = vld [vmem:[#allocation54_spill] sm:$0xff]  ;;  %v3184_v44 = vld [vmem:[%s3304_s15 + $0xe8] sm:$0xff] }
 0x371   : > { %v2432_v43 = vadd.f32 %v3184_v44, %v4688_v56 }
 0x373   : > { %v2457_v4 = vpop.permute.xlu1 %2456  ;;  %v605_v40 = vpop.permute.xlu0 %604 }
 0x374   : > { %v3105_v31 = vpop.eup %3104  ;;  %v627_v38 = vmul.f32 %v5868_v10, %v605_v40  ;;  %v628_v29 = vmul.f32 %v5869_v60, %v605_v40  ;;  %2644 = vperm.xlu0 %3062, %v4168_v52   ;;  %v2429_v40 = vadd.f32 %v3185_v23, %v4690_v55 }
 0x375   : > { %v3107_v47 = vpop.eup %3106  ;;  %v2399_v33 = vadd.f32 1.0, %v3105_v31  ;;  %v3186_v31 = vld [vmem:[%s3304_s15 + $0xd8] sm:$0xff] }
 0x376   : > { %v2400_v46 = vadd.f32 1.0, %v3107_v47  ;;  %v4770_v27 = vadd.f32 %v627_v38, %v595_v5  ;;  %v4772_v45 = vadd.f32 %v628_v29, %v596_v9  ;;  %v2430_v18 = vadd.f32 %v3186_v31, %v4690_v55 }
 0x377   : > { %v4774_v52 = vmul.f32 %v2399_v33, %v2393_v63  ;;  %v617_v61 = vpop.permute.xlu0 %616  ;;  %v2433_v5 = vadd.f32 %v3187_v59, %v4695_v39  ;;  %v3188_v63 = vld [vmem:[%s3304_s15 + $0xf8] sm:$0xff] }
 0x378   : > { %5870 = vst [vmem:[#allocation32_spill] sm:$0xff] %v4770_v27  ;;  %5871 = vst [vmem:[#allocation48_spill] sm:$0xff] %v4772_v45  ;;  %v4782_v47 = vmul.f32 %v2400_v46, %v2394_v7  ;;  %v2489_v9 = vpop.permute.xlu1 %2488  ;;  %v633_v38 = vmul.f32 %v5868_v10, %v617_v61  ;;  %v634_v29 = vmul.f32 %v5869_v60, %v617_v61  ;;  %2656 = vperm.xlu0 %3062, %v4217_v34  }
 0x379   : > { %v2462_v56 = vrot.slane %v4774_v52, %v3890_v54  ;;  %v2434_v33 = vadd.f32 %v3188_v63, %v4695_v39  ;;  %v4795_v55 = vrot.slane %v4774_v52, %v3903_v58  ;;  %v4799_v7 = vrot.slane %v4774_v52, %v3912_v13 }
 0x37a   : > { %v2466_v46 = vrot.slane %v4782_v47, %v3890_v54  ;;  %v4805_v34 = vrot.slane %v4782_v47, %v3903_v58  ;;  %v4807_v16 = vadd.f32 %v633_v38, %v601_v0  ;;  %v4809_v44 = vadd.f32 %v634_v29, %v602_v41 }
 0x37b   : > { %v2467_v39 = vmul.f32 %v2462_v56, %v4693_v24  ;;  %v2471_v23 = vmul.f32 %v2462_v56, %v4704_v42  ;;  %v2469_v31 = vmul.f32 %v2462_v56, %v4720_v12  ;;  %v2473_v61 = vmul.f32 %v2462_v56, %v2457_v4  ;;  %v1231_v59 = vpop.permute.xlu0 %1230 }
 0x37c   : > { %5872 = vst [vmem:[#allocation49_spill] sm:$0xff] %v4807_v16  ;;  %5873 = vst [vmem:[#allocation5_spill] sm:$0xff] %v4809_v44  ;;  %v2468_v63 = vmul.f32 %v2466_v46, %v4693_v24  ;;  %v2472_v54 = vmul.f32 %v2466_v46, %v4704_v42  ;;  %v2470_v27 = vmul.f32 %v2466_v46, %v4720_v12  ;;  %v2493_v45 = vpop.permute.xlu1 %2492  ;;  %3064 = vset.pattern.permute.xlu0 %v5812_v32 }
 0x37d   : > { %v2474_v58 = vmul.f32 %v2466_v46, %v2457_v4  ;;  %v4818_v41 = vadd.f32 %v2467_v39, %v2427_v25  ;;  %v2479_v0 = vadd.f32 %v2471_v23, %v2431_v22  ;;  %v2477_v38 = vadd.f32 %v2469_v31, %v2429_v40  ;;  %808 = vperm.xlu0 %3064, %v4552_v17   ;;  %v5874_v22 = vld [vmem:[#allocation44_spill] sm:$0xff] }
 0x37e   : > { %v4820_v29 = vadd.f32 %v2473_v61, %v2433_v5  ;;  %v4823_v56 = vadd.f32 %v2468_v63, %v2428_v20  ;;  %v2480_v16 = vadd.f32 %v2472_v54, %v2432_v43  ;;  %v2478_v24 = vadd.f32 %v2470_v27, %v2430_v18  ;;  %v5875_v5 = vld [vmem:[#allocation45_spill] sm:$0xff]  ;;  %v3189_v54 = vld [vmem:[%s3304_s15 + $0xb0] sm:$0xff] }
 0x37f   : > { %v4825_v44 = vadd.f32 %v2474_v58, %v2434_v33  ;;  %v2509_v42 = vmul.f32 %v4795_v55, %v2489_v9  ;;  %v2510_v12 = vmul.f32 %v4805_v34, %v2489_v9  ;;  %v2511_v32 = vmul.f32 %v4795_v55, %v2493_v45  ;;  %v1243_v25 = vpop.permute.xlu0 %1242  ;;  %v3190_v58 = vld [vmem:[%s3304_s15 + $0xb8] sm:$0xff] }
 0x380   : > { %v2512_v4 = vmul.f32 %v4805_v34, %v2493_v45  ;;  %v1253_v40 = vmul.f32 %v5874_v22, %v1231_v59  ;;  %v1254_v46 = vmul.f32 %v5875_v5, %v1231_v59  ;;  %v1259_v20 = vmul.f32 %v5874_v22, %v1243_v25 }
 0x381   : > { %v1260_v43 = vmul.f32 %v5875_v5, %v1243_v25  ;;  %v4835_v27 = vadd.f32 %v2509_v42, %v2477_v38  ;;  %v4837_v18 = vadd.f32 %v2510_v12, %v2478_v24  ;;  %v2519_v33 = vadd.f32 %v2511_v32, %v2479_v0  ;;  %v2525_v39 = vpop.permute.xlu1 %2524  ;;  %1434 = vperm.xlu0 %3064, %v4552_v17  }
 0x382   : > { %v2520_v9 = vadd.f32 %v2512_v4, %v2480_v16  ;;  %v4841_v45 = vadd.f32 %v1253_v40, %v4735_v6  ;;  %v4844_v23 = vadd.f32 %v1254_v46, %v4737_v35  ;;  %v4847_v31 = vadd.f32 %v1259_v20, %v4739_v26  ;;  %v4883_v20 = vld [vmem:[%s5565_s5 + $0x18] sm:$0xff] }
 0x383   : > { %v4850_v61 = vadd.f32 %v1260_v43, %v4753_v21  ;;  %v4854_v59 = vrot.slane %v4782_v47, %v3912_v13  ;;  %v2547_v16 = vmul.f32 %v4799_v7, %v2525_v39  ;;  %v1858_v63 = vpop.permute.xlu0 %1857  ;;  %v1848_v6 = vadd.f32 %v4751_v48, %v4743_v50  ;;  %v4871_v50 = vld [vmem:[%s5565_s5] sm:$0xff] }
 0x384   : > { %v1849_v17 = vadd.f32 %v4757_v28, %v4747_v62  ;;  %v1880_v35 = vmul.f32 %v4332_v15, %v1858_v63  ;;  %v1881_v26 = vmul.f32 %v4336_v51, %v1858_v63  ;;  %v1806_v21 = vadd.f32 %v3189_v54, %v4304_v30  ;;  %v3193_v63 = vld [vmem:[%s3304_s15 + $0x10] sm:$0xff] }
 0x385   : > { %v1807_v13 = vadd.f32 %v3190_v58, %v4304_v30  ;;  %v2548_v0 = vmul.f32 %v4854_v59, %v2525_v39  ;;  %v2533_v38 = vpop.permute.xlu1 %2532  ;;  %2057 = vperm.xlu0 %3064, %v4871_v50  }
 0x386   : > { %v1888_v62 = vadd.f32 %v1880_v35, %v1848_v6  ;;  %v1889_v48 = vadd.f32 %v1881_v26, %v1849_v17  ;;  %v2551_v28 = vmul.f32 %v4799_v7, %v2533_v38  ;;  %v2552_v24 = vmul.f32 %v4854_v59, %v2533_v38  ;;  %v5877_v6 = vld [vmem:[#allocation2_spill] sm:$0xff]  ;;  %v3194_v35 = vld [vmem:[%s3304_s15 + $0x18] sm:$0xff] }
 0x387   : > { %v1854_v42 = vadd.f32 %v4324_v8, %v1806_v21  ;;  %v1855_v30 = vadd.f32 %v4328_v1, %v1807_v13  ;;  %v1870_v12 = vpop.permute.xlu0 %1869  ;;  %v5876_v8 = vld [vmem:[#allocation4_spill] sm:$0xff]  ;;  %v549_v17 = vadd.f32 %v3193_v63, %v5877_v6  ;;  %v550_v26 = vadd.f32 %v3194_v35, %v5877_v6 }
 0x388   : > { %v2559_v32 = vadd.f32 %v2551_v28, %v2519_v33  ;;  %v2560_v4 = vadd.f32 %v2552_v24, %v2520_v9  ;;  %v1886_v25 = vmul.f32 %v4332_v15, %v1870_v12  ;;  %v1887_v40 = vmul.f32 %v4336_v51, %v1870_v12  ;;  %v5881_v63 = vld [vmem:[#allocation104_spill] sm:$0xff] }
 0x389   : > { %v2537_v46 = vpop.permute.xlu1 %2536  ;;  %2069 = vperm.xlu0 %3064, %v4883_v20   ;;  %v590_v1 = vmul.f32 %v5857_v11, %v5876_v8  ;;  %v589_v43 = vmul.f32 %v5858_v2, %v5876_v8  ;;  %v4891_v33 = vadd.f32 %v4359_v37, %v1888_v62  ;;  %v4900_v11 = vadd.f32 %v4362_v36, %v1889_v48  ;;  %v4921_v36 = vld [vmem:[%s5565_s5 + $0x8] sm:$0xff]  ;;  %v5879_v8 = vld [vmem:[#allocation6_spill] sm:$0xff] }
 0x38a   : > { %v1894_v15 = vadd.f32 %v1886_v25, %v1854_v42  ;;  %v1895_v9 = vadd.f32 %v1887_v40, %v1855_v30  ;;  %v2553_v51 = vmul.f32 %v4799_v7, %v2537_v46  ;;  %v2554_v39 = vmul.f32 %v4854_v59, %v2537_v46  ;;  %v5878_v30 = vld [vmem:[#allocation22_spill] sm:$0xff] }
 0x38b   : > { %v2485_v54 = vpop.permute.xlu0 %2484  ;;  %v4912_v13 = vrot.slane %v4774_v52, %v3929_v19  ;;  %v4916_v38 = vrot.slane %v4782_v47, %v3929_v19  ;;  %v598_v48 = vadd.f32 %v590_v1, %v550_v26  ;;  %v597_v28 = vadd.f32 %v589_v43, %v549_v17 }
 0x38c   : > { %v2507_v2 = vmul.f32 %v4795_v55, %v2485_v54  ;;  %v2508_v37 = vmul.f32 %v4805_v34, %v2485_v54  ;;  %v4905_v21 = vadd.f32 %v4367_v53, %v1894_v15  ;;  %v4908_v58 = vadd.f32 %v4370_v3, %v1895_v9  ;;  %v5880_v15 = vld [vmem:[#allocation20_spill] sm:$0xff] }
 0x38d   : > { %2688 = vperm.xlu0 %3064, %v4921_v36   ;;  %v1215_v12 = vmul.f32 %v5861_v14, %v5878_v30  ;;  %v630_v1 = vmul.f32 %v5869_v60, %v5879_v8  ;;  %v629_v43 = vmul.f32 %v5868_v10, %v5879_v8  ;;  %v3196_v14 = vld [vmem:[%s3304_s15 + $0x50] sm:$0xff] }
 0x38e   : > { %v2515_v53 = vadd.f32 %v2507_v2, %v4818_v41  ;;  %v2516_v3 = vadd.f32 %v2508_v37, %v4823_v56  ;;  %v2569_v62 = vpop.permute.xlu1 %2568  ;;  %v1216_v41 = vmul.f32 %v5862_v49, %v5878_v30  ;;  %v1175_v9 = vadd.f32 %v3196_v14, %v5880_v15  ;;  %v3197_v49 = vld [vmem:[%s3304_s15 + $0x58] sm:$0xff]  ;;  %v5887_v14 = vld [vmem:[#allocation46_spill] sm:$0xff] }
 0x38f   : > { %v4927_v24 = vmul.f32 %v4912_v13, %v2569_v62  ;;  %v4930_v19 = vmul.f32 %v4916_v38, %v2569_v62  ;;  %v2497_v42 = vpop.permute.xlu0 %2496  ;;  %v638_v6 = vadd.f32 %v630_v1, %v598_v48  ;;  %v637_v17 = vadd.f32 %v629_v43, %v597_v28  ;;  %v5885_v28 = vld [vmem:[#allocation105_spill] sm:$0xff] }
 0x390   : > { %v2513_v56 = vmul.f32 %v4795_v55, %v2497_v42  ;;  %v2514_v25 = vmul.f32 %v4805_v34, %v2497_v42  ;;  %v4938_v40 = vadd.f32 %v2547_v16, %v2515_v53  ;;  %v4940_v46 = vadd.f32 %v2548_v0, %v2516_v3  ;;  %v5882_v53 = vld [vmem:[#allocation62_spill] sm:$0xff]  ;;  %v5883_v3 = vld [vmem:[#allocation59_spill] sm:$0xff] }
 0x391   : > { %3066 = vset.pattern.permute.xlu0 %v5813_v57  ;;  %v1176_v55 = vadd.f32 %v3197_v49, %v5880_v15  ;;  %v1223_v35 = vadd.f32 %v1215_v12, %v1175_v9  ;;  %v5884_v42 = vld [vmem:[#allocation50_spill] sm:$0xff]  ;;  %v5888_v9 = vld [vmem:[#allocation47_spill] sm:$0xff] }
 0x392   : > { %v2521_v34 = vadd.f32 %v2513_v56, %v4820_v29  ;;  %v2522_v16 = vadd.f32 %v2514_v25, %v4825_v44  ;;  %v2573_v0 = vpop.permute.xlu1 %2572  ;;  %844 = vperm.xlu0 %3066, %v5881_v63   ;;  %v4964_v30 = vrot.slane %v4774_v52, %v5884_v42  ;;  %v4968_v48 = vrot.slane %v4782_v47, %v5884_v42 }
 0x393   : > { %v2591_v57 = vmul.f32 %v4912_v13, %v2573_v0  ;;  %v2592_v60 = vmul.f32 %v4916_v38, %v2573_v0  ;;  %v1224_v26 = vadd.f32 %v1216_v41, %v1176_v55 }
 0x394   : > { %v649_v10 = vpop.permute.xlu0 %648  ;;  %v4956_v54 = vadd.f32 %v2553_v51, %v2521_v34  ;;  %v4958_v2 = vadd.f32 %v2554_v39, %v2522_v16 }
 0x395   : > { %v2599_v37 = vadd.f32 %v2591_v57, %v2559_v32  ;;  %v2600_v29 = vadd.f32 %v2592_v60, %v2560_v4  ;;  %v669_v44 = vmul.f32 %v5882_v53, %v649_v10  ;;  %v670_v62 = vmul.f32 %v5883_v3, %v649_v10  ;;  %v5886_v4 = vld [vmem:[#allocation24_spill] sm:$0xff]  ;;  %v5889_v57 = vld [vmem:[#allocation37_spill] sm:$0xff] }
 0x396   : > { %856 = vperm.xlu0 %3066, %v5885_v28   ;;  %v1255_v12 = vmul.f32 %v5874_v22, %v5886_v4  ;;  %v1256_v41 = vmul.f32 %v5875_v5, %v5886_v4 }
 0x397   : > { %v4971_v51 = vadd.f32 %v669_v44, %v637_v17  ;;  %v4973_v39 = vadd.f32 %v670_v62, %v638_v6  ;;  %v2605_v32 = vpop.permute.xlu1 %2604  ;;  %v5890_v6 = vld [vmem:[#allocation38_spill] sm:$0xff] }
 0x398   : > { %v4980_v56 = vmul.f32 %v4964_v30, %v2605_v32  ;;  %v4983_v25 = vmul.f32 %v4968_v48, %v2605_v32  ;;  %v1275_v8 = vpop.permute.xlu0 %1274  ;;  %v1263_v1 = vadd.f32 %v1255_v12, %v1223_v35  ;;  %v1264_v43 = vadd.f32 %v1256_v41, %v1224_v26  ;;  %v5891_v26 = vld [vmem:[#allocation15_spill] sm:$0xff]  ;;  %v5892_v44 = vld [vmem:[#allocation18_spill] sm:$0xff] }
 0x399   : > { %v1295_v15 = vmul.f32 %v5887_v14, %v1275_v8  ;;  %v1296_v49 = vmul.f32 %v5888_v9, %v1275_v8 }
 0x39a   : > { %1470 = vperm.xlu0 %3066, %v5881_v63  }
 0x39b   : > { %v4988_v55 = vadd.f32 %v1295_v15, %v1263_v1  ;;  %v4990_v22 = vadd.f32 %v1296_v49, %v1264_v43  ;;  %v2613_v5 = vpop.permute.xlu1 %2612  ;;  %v5895_v49 = vld [vmem:[#allocation55_spill] sm:$0xff] }
 0x39c   : > { %v2631_v34 = vmul.f32 %v4964_v30, %v2613_v5  ;;  %v2632_v16 = vmul.f32 %v4968_v48, %v2613_v5  ;;  %v1902_v0 = vpop.permute.xlu0 %1901  ;;  %v5018_v5 = vrot.slane %v4774_v52, %v5895_v49 }
 0x39d   : > { %v1922_v60 = vmul.f32 %v5889_v57, %v1902_v0  ;;  %v1923_v17 = vmul.f32 %v5890_v6, %v1902_v0  ;;  %v5897_v6 = vld [vmem:[#allocation48_spill] sm:$0xff] }
 0x39e   : > { %v2639_v10 = vadd.f32 %v2631_v34, %v2599_v37  ;;  %v2640_v35 = vadd.f32 %v2632_v16, %v2600_v29  ;;  %1482 = vperm.xlu0 %3066, %v5885_v28   ;;  %v5893_v37 = vld [vmem:[#allocation39_spill] sm:$0xff]  ;;  %v5894_v28 = vld [vmem:[#allocation77_spill] sm:$0xff] }
 0x39f   : > { %v1930_v63 = vadd.f32 %v1922_v60, %v5891_v26  ;;  %v1931_v62 = vadd.f32 %v1923_v17, %v5892_v44  ;;  %v2617_v42 = vpop.permute.xlu1 %2616  ;;  %v5896_v34 = vld [vmem:[#allocation7_spill] sm:$0xff]  ;;  %v5898_v26 = vld [vmem:[#allocation32_spill] sm:$0xff] }
 0x3a0   : > { %v5000_v32 = vmul.f32 %v4964_v30, %v2617_v42  ;;  %v5003_v4 = vmul.f32 %v4968_v48, %v2617_v42  ;;  %v2529_v12 = vpop.permute.xlu0 %2528  ;;  %v668_v16 = vmul.f32 %v5883_v3, %v5896_v34  ;;  %v667_v0 = vmul.f32 %v5882_v53, %v5896_v34  ;;  %v5899_v44 = vld [vmem:[#allocation67_spill] sm:$0xff]  ;;  %v5900_v42 = vld [vmem:[#allocation66_spill] sm:$0xff] }
 0x3a1   : > { %v2549_v41 = vmul.f32 %v4799_v7, %v2529_v12  ;;  %v2550_v8 = vmul.f32 %v4854_v59, %v2529_v12  ;;  %v5008_v29 = vadd.f32 %v5893_v37, %v1930_v63  ;;  %v5011_v1 = vadd.f32 %v5894_v28, %v1931_v62 }
 0x3a2   : > { %2101 = vperm.xlu0 %3066, %v4921_v36   ;;  %v5022_v7 = vrot.slane %v4782_v47, %v5895_v49  ;;  %v676_v17 = vadd.f32 %v668_v16, %v5897_v6  ;;  %v675_v63 = vadd.f32 %v667_v0, %v5898_v26  ;;  %v5903_v16 = vld [vmem:[#allocation49_spill] sm:$0xff] }
 0x3a3   : > { %v2557_v43 = vadd.f32 %v2549_v41, %v4835_v27  ;;  %v2558_v15 = vadd.f32 %v2550_v8, %v4837_v18 }
 0x3a4   : > { %v2649_v59 = vpop.permute.xlu1 %2648 }
 0x3a5   : > { %v5029_v36 = vmul.f32 %v5018_v5, %v2649_v59  ;;  %v5032_v27 = vmul.f32 %v5022_v7, %v2649_v59  ;;  %v685_v18 = vpop.permute.xlu0 %684  ;;  %v5035_v57 = vadd.f32 %v4927_v24, %v2557_v43  ;;  %v5038_v60 = vadd.f32 %v4930_v19, %v2558_v15  ;;  %v5901_v24 = vld [vmem:[#allocation8_spill] sm:$0xff]  ;;  %v5902_v59 = vld [vmem:[#allocation5_spill] sm:$0xff] }
 0x3a6   : > { %v707_v62 = vmul.f32 %v5899_v44, %v685_v18  ;;  %v708_v12 = vmul.f32 %v5900_v42, %v685_v18  ;;  %2724 = vperm.xlu0 %3066, %v4871_v50   ;;  %v674_v28 = vmul.f32 %v5883_v3, %v5901_v24  ;;  %v673_v19 = vmul.f32 %v5882_v53, %v5901_v24 }
 0x3a8   : > { %v5045_v41 = vadd.f32 %v707_v62, %v675_v63  ;;  %v5047_v8 = vadd.f32 %v708_v12, %v676_v17  ;;  %v2653_v37 = vpop.permute.xlu1 %2652  ;;  %v682_v34 = vadd.f32 %v674_v28, %v5902_v59  ;;  %v681_v50 = vadd.f32 %v673_v19, %v5903_v16  ;;  %v5904_v17 = vld [vmem:[#allocation25_spill] sm:$0xff]  ;;  %v5906_v12 = vld [vmem:[#allocation58_spill] sm:$0xff]  ;;  %v5908_v59 = vld [vmem:[#allocation52_spill] sm:$0xff] }
 0x3a9   : > { %v2671_v43 = vmul.f32 %v5018_v5, %v2653_v37  ;;  %v2672_v15 = vmul.f32 %v5022_v7, %v2653_v37  ;;  %v697_v49 = vpop.permute.xlu0 %696  ;;  %v1293_v53 = vmul.f32 %v5887_v14, %v5904_v17  ;;  %v1294_v26 = vmul.f32 %v5888_v9, %v5904_v17  ;;  %v5909_v16 = vld [vmem:[#allocation26_spill] sm:$0xff] }
 0x3aa   : > { %v713_v0 = vmul.f32 %v5899_v44, %v697_v49  ;;  %v714_v18 = vmul.f32 %v5900_v42, %v697_v49  ;;  %2736 = vperm.xlu0 %3066, %v4883_v20   ;;  %v5070_v37 = vrot.slane %v4774_v52, %v5906_v12  ;;  %v5074_v24 = vrot.slane %v4782_v47, %v5906_v12 }
 0x3ab   : > { %v2679_v6 = vadd.f32 %v2671_v43, %v2639_v10  ;;  %v2680_v3 = vadd.f32 %v2672_v15, %v2640_v35  ;;  %v1301_v10 = vadd.f32 %v1293_v53, %v4841_v45  ;;  %v1302_v35 = vadd.f32 %v1294_v26, %v4844_v23  ;;  %v5907_v15 = vld [vmem:[#allocation51_spill] sm:$0xff] }
 0x3ac   : > { %v5064_v63 = vadd.f32 %v713_v0, %v681_v50  ;;  %v5066_v62 = vadd.f32 %v714_v18, %v682_v34  ;;  %v1299_v50 = vmul.f32 %v5887_v14, %v5909_v16  ;;  %v1300_v0 = vmul.f32 %v5888_v9, %v5909_v16  ;;  %v5915_v16 = vld [vmem:[#allocation40_spill] sm:$0xff] }
 0x3ad   : > { %v2685_v20 = vpop.permute.xlu1 %2684  ;;  %v1311_v28 = vpop.permute.xlu0 %1310 }
 0x3ae   : > { %5905 = vst [vmem:[#allocation35_spill] sm:$0xff] %v5064_v63  ;;  %v5079_v19 = vmul.f32 %v5070_v37, %v2685_v20  ;;  %v5082_v43 = vmul.f32 %v5074_v24, %v2685_v20  ;;  %v1333_v49 = vmul.f32 %v5907_v15, %v1311_v28  ;;  %v1334_v34 = vmul.f32 %v5908_v59, %v1311_v28 }
 0x3af   : > { %v1307_v17 = vadd.f32 %v1299_v50, %v4847_v31  ;;  %v1308_v53 = vadd.f32 %v1300_v0, %v4850_v61 }
 0x3b0   : > { %v5090_v45 = vadd.f32 %v1333_v49, %v1301_v10  ;;  %v5092_v23 = vadd.f32 %v1334_v34, %v1302_v35  ;;  %v5914_v34 = vld [vmem:[#allocation36_spill] sm:$0xff] }
 0x3b1   : > { %v2693_v18 = vpop.permute.xlu1 %2692  ;;  %v1323_v26 = vpop.permute.xlu0 %1322 }
 0x3b2   : > { %5910 = vst [vmem:[#allocation42_spill] sm:$0xff] %v5090_v45  ;;  %5911 = vst [vmem:[#allocation43_spill] sm:$0xff] %v5092_v23  ;;  %v2711_v12 = vmul.f32 %v5070_v37, %v2693_v18  ;;  %v2712_v20 = vmul.f32 %v5074_v24, %v2693_v18  ;;  %v1339_v28 = vmul.f32 %v5907_v15, %v1323_v26 }
 0x3b3   : > { %v1340_v14 = vmul.f32 %v5908_v59, %v1323_v26  ;;  %v5917_v26 = vld [vmem:[#allocation81_spill] sm:$0xff] }
 0x3b4   : > { %v2719_v63 = vadd.f32 %v2711_v12, %v2679_v6  ;;  %v2720_v9 = vadd.f32 %v2712_v20, %v2680_v3  ;;  %v5100_v10 = vadd.f32 %v1339_v28, %v1307_v17  ;;  %v5916_v17 = vld [vmem:[#allocation80_spill] sm:$0xff] }
 0x3b5   : > { %v5102_v35 = vadd.f32 %v1340_v14, %v1308_v53  ;;  %v5104_v49 = vpop.permute.xlu1 %2696  ;;  %v1938_v31 = vpop.permute.xlu0 %1937  ;;  %v5918_v14 = vld [vmem:[#allocation63_spill] sm:$0xff] }
 0x3b6   : > { %5912 = vst [vmem:[#allocation23_spill] sm:$0xff] %v5100_v10  ;;  %v1960_v61 = vmul.f32 %v5914_v34, %v1938_v31  ;;  %v1961_v50 = vmul.f32 %v5915_v16, %v1938_v31  ;;  %v5960_v10 = vld [vmem:[#allocation72_spill] sm:$0xff] }
 0x3b7   : > { %5913 = vst [vmem:[#allocation3_spill] sm:$0xff] %v5102_v35  ;;  %v5959_v35 = vld [vmem:[#allocation12_spill] sm:$0xff] }
 0x3b8   : > { %v1968_v0 = vadd.f32 %v1960_v61, %v4891_v33  ;;  %v1969_v18 = vadd.f32 %v1961_v50, %v4900_v11  ;;  %v5120_v33 = vrot.slane %v4774_v52, %v5918_v14  ;;  %v5124_v11 = vrot.slane %v4782_v47, %v5918_v14  ;;  %v5922_v47 = vld [vmem:[#allocation90_spill] sm:$0xff] }
 0x3b9   : > { %v1950_v23 = vpop.permute.xlu0 %1949 }
 0x3ba   : > { %v5110_v45 = vpop.permute.xlu1 %2728  ;;  %v1966_v6 = vmul.f32 %v5914_v34, %v1950_v23  ;;  %v1967_v3 = vmul.f32 %v5915_v16, %v1950_v23  ;;  %v2008_v53 = vadd.f32 %v5916_v17, %v1968_v0  ;;  %v2009_v12 = vadd.f32 %v5917_v26, %v1969_v18  ;;  %5919 = vst [vmem:[#allocation29_spill] sm:$0xff] %v5124_v11  ;;  %v5920_v34 = vld [vmem:[#allocation84_spill] sm:$0xff]  ;;  %v5921_v23 = vld [vmem:[#allocation85_spill] sm:$0xff]  ;;  %v5924_v17 = vld [vmem:[#allocation91_spill] sm:$0xff] }
 0x3bc   : > { %v1974_v20 = vadd.f32 %v1966_v6, %v4905_v21  ;;  %v1975_v28 = vadd.f32 %v1967_v3, %v4908_v58 }
 0x3bd   : > { %v2565_v31 = vpop.permute.xlu0 %2564 }
 0x3be   : > { %v2014_v61 = vadd.f32 %v5920_v34, %v1974_v20  ;;  %v2015_v16 = vadd.f32 %v5921_v23, %v1975_v28  ;;  %v2733_v50 = vpop.permute.xlu1 %2732  ;;  %v2587_v0 = vmul.f32 %v4912_v13, %v2565_v31  ;;  %v2588_v21 = vmul.f32 %v4916_v38, %v2565_v31 }
 0x3bf   : > { %v2751_v58 = vmul.f32 %v5120_v33, %v2733_v50  ;;  %v2752_v18 = vmul.f32 %v5124_v11, %v2733_v50  ;;  %v5926_v50 = vld [vmem:[#allocation78_spill] sm:$0xff] }
 0x3c0   : > { %v2595_v52 = vadd.f32 %v2587_v0, %v4938_v40  ;;  %v2596_v6 = vadd.f32 %v2588_v21, %v4940_v46  ;;  %v5135_v3 = vadd.f32 %v5922_v47, %v2014_v61  ;;  %v5138_v26 = vadd.f32 %v5924_v17, %v2015_v16  ;;  %v5927_v0 = vld [vmem:[#allocation79_spill] sm:$0xff]  ;;  %v5930_v17 = vld [vmem:[#allocation94_spill] sm:$0xff] }
 0x3c1   : > { %v5140_v20 = vadd.f32 %v2751_v58, %v2719_v63  ;;  %v5142_v28 = vadd.f32 %v2752_v18, %v2720_v9  ;;  %v2577_v14 = vpop.permute.xlu0 %2576 }
 0x3c2   : > { %5923 = vst [vmem:[#allocation19_spill] sm:$0xff] %v5135_v3  ;;  %5925 = vst [vmem:[#allocation21_spill] sm:$0xff] %v5138_v26  ;;  %v2593_v31 = vmul.f32 %v4912_v13, %v2577_v14  ;;  %v2594_v34 = vmul.f32 %v4916_v38, %v2577_v14  ;;  %v5147_v23 = vadd.f32 %v4980_v56, %v2595_v52  ;;  %v5929_v52 = vld [vmem:[#allocation89_spill] sm:$0xff] }
 0x3c3   : > { %v5150_v40 = vadd.f32 %v4983_v25, %v2596_v6 }
 0x3c4   : > { %v2601_v46 = vadd.f32 %v2593_v31, %v4956_v54  ;;  %v2602_v61 = vadd.f32 %v2594_v34, %v4958_v2  ;;  %v5928_v2 = vld [vmem:[#allocation88_spill] sm:$0xff]  ;;  %v5932_v31 = vld [vmem:[#allocation95_spill] sm:$0xff] }
 0x3c6   : > { %v729_v16 = vpop.permute.xlu0 %728  ;;  %v5155_v63 = vadd.f32 %v5000_v32, %v2601_v46  ;;  %v5158_v9 = vadd.f32 %v5003_v4, %v2602_v61 }
 0x3ca   : > { %v5160_v13 = vpop.permute.xlu0 %1354 }
 0x3ce   : > { %v1982_v38 = vpop.permute.xlu0 %1981 }
 0x3cf   : > { %v2002_v56 = vmul.f32 %v5926_v50, %v1982_v38  ;;  %v2003_v21 = vmul.f32 %v5927_v0, %v1982_v38  ;;  %v5938_v50 = vld [vmem:[#allocation86_spill] sm:$0xff]  ;;  %v5939_v0 = vld [vmem:[#allocation87_spill] sm:$0xff] }
 0x3d1   : > { %v2010_v25 = vadd.f32 %v2002_v56, %v5008_v29  ;;  %v2011_v54 = vadd.f32 %v2003_v21, %v5011_v1 }
 0x3d2   : > { %v2609_v58 = vpop.permute.xlu0 %2608 }
 0x3d3   : > { %v2050_v18 = vadd.f32 %v5928_v2, %v2010_v25  ;;  %v2051_v32 = vadd.f32 %v5929_v52, %v2011_v54  ;;  %v2629_v6 = vmul.f32 %v4964_v30, %v2609_v58  ;;  %v2630_v4 = vmul.f32 %v4968_v48, %v2609_v58  ;;  %v5941_v25 = vld [vmem:[#allocation68_spill] sm:$0xff]  ;;  %v5944_v52 = vld [vmem:[#allocation27_spill] sm:$0xff] }
 0x3d5   : > { %v2637_v47 = vadd.f32 %v2629_v6, %v5035_v57  ;;  %v5172_v14 = vadd.f32 %v5930_v17, %v2050_v18  ;;  %v5175_v34 = vadd.f32 %v5932_v31, %v2051_v32  ;;  %v2638_v29 = vadd.f32 %v2630_v4, %v5038_v60  ;;  %v5940_v60 = vld [vmem:[#allocation41_spill] sm:$0xff]  ;;  %v5945_v31 = vld [vmem:[#allocation10_spill] sm:$0xff] }
 0x3d6   : > { %v5196_v54 = vmul.f32 %v5941_v25, %v5940_v60  ;;  %v1335_v32 = vmul.f32 %v5907_v15, %v5944_v52  ;;  %v1336_v17 = vmul.f32 %v5908_v59, %v5944_v52  ;;  %v5950_v52 = vld [vmem:[#allocation56_spill] sm:$0xff] }
 0x3d7   : > { %5931 = vst [vmem:[#allocation54_spill] sm:$0xff] %v5172_v14  ;;  %5933 = vst [vmem:[#allocation53_spill] sm:$0xff] %v5175_v34  ;;  %v5178_v1 = vpop.permute.xlu0 %764  ;;  %v5181_v46 = vadd.f32 %v5029_v36, %v2637_v47  ;;  %v5184_v61 = vadd.f32 %v5032_v27, %v2638_v29  ;;  %v5942_v36 = vld [vmem:[#allocation69_spill] sm:$0xff]  ;;  %v2775_v47 = vmul.f32 0.70710677, %v5140_v20  ;;  %v5946_v29 = vld [vmem:[#allocation70_spill] sm:$0xff] }
 0x3d8   : > { %v5200_v58 = vmul.f32 %v5942_v36, %v5940_v60  ;;  %v5943_v27 = vld [vmem:[#allocation9_spill] sm:$0xff]  ;;  %v5954_v36 = vld [vmem:[#allocation30_spill] sm:$0xff] }
 0x3d9   : > { %5934 = vst [vmem:[#allocation44_spill] sm:$0xff] %v5181_v46  ;;  %5935 = vst [vmem:[#allocation45_spill] sm:$0xff] %v5184_v61  ;;  %v710_v2 = vmul.f32 %v5900_v42, %v5943_v27  ;;  %v709_v18 = vmul.f32 %v5899_v44, %v5943_v27  ;;  %v5947_v42 = vld [vmem:[#allocation71_spill] sm:$0xff]  ;;  %v5244_v25 = vmul.f32 %v5950_v52, %v5954_v36  ;;  %3108 = verf.f32 %v2775_v47  ;;  %v5961_v46 = vld [vmem:[#allocation73_spill] sm:$0xff] }
 0x3da   : > { %v5221_v60 = vmul.f32 %v5947_v42, %v5945_v31  ;;  %v5948_v27 = vld [vmem:[#allocation11_spill] sm:$0xff]  ;;  %v790_v61 = vmul.f32 %v5960_v10, %v5959_v35 }
 0x3db   : > { %v5186_v30 = vpop.permute.xlu0 %776  ;;  %v5225_v15 = vmul.f32 %v5946_v29, %v5948_v27  ;;  %5955 = vst [vmem:[#allocation20_spill] sm:$0xff] %v5244_v25  ;;  %v789_v25 = vmul.f32 %v5961_v46, %v5959_v35  ;;  %v717_v47 = vadd.f32 %v709_v18, %v4971_v51  ;;  %v5967_v35 = vld [vmem:[#allocation103_spill] sm:$0xff] }
 0x3df   : > { %v5188_v48 = vpop.permute.xlu0 %1390 }
 0x3e0   : > { %5936 = vst [vmem:[#allocation4_spill] sm:$0xff] %v5188_v48  ;;  %v5962_v48 = vld [vmem:[#allocation96_spill] sm:$0xff] }
 0x3e3   : > { %v5190_v57 = vpop.permute.xlu0 %1402 }
 0x3e4   : > { %5937 = vst [vmem:[#allocation2_spill] sm:$0xff] %v5190_v57 }
 0x3e7   : > { %v2018_v38 = vpop.permute.xlu0 %2017 }
 0x3e8   : > { %v2040_v56 = vmul.f32 %v5938_v50, %v2018_v38  ;;  %v2041_v21 = vmul.f32 %v5939_v0, %v2018_v38  ;;  %v5217_v38 = vmul.f32 %v5946_v29, %v5945_v31  ;;  %v5952_v31 = vld [vmem:[#allocation57_spill] sm:$0xff] }
 0x3ea   : > { %v5208_v6 = vadd.f32 %v2040_v56, %v2008_v53  ;;  %v5210_v4 = vadd.f32 %v2041_v21, %v2009_v12  ;;  %v5229_v53 = vmul.f32 %v5947_v42, %v5948_v27  ;;  %v2776_v56 = vmul.f32 0.70710677, %v5142_v28  ;;  %v5949_v21 = vld [vmem:[#allocation28_spill] sm:$0xff] }
 0x3eb   : > { %v2026_v44 = vpop.permute.xlu0 %2025  ;;  %v5236_v34 = vmul.f32 %v5950_v52, %v5949_v21  ;;  %v5240_v14 = vmul.f32 %v5952_v31, %v5949_v21  ;;  %v5248_v27 = vmul.f32 %v5952_v31, %v5954_v36  ;;  %v750_v21 = vmul.f32 %v5946_v29, %v729_v16  ;;  %v5963_v36 = vld [vmem:[#allocation97_spill] sm:$0xff]  ;;  %v5966_v29 = vld [vmem:[#allocation102_spill] sm:$0xff] }
 0x3ec   : > { %v2044_v12 = vmul.f32 %v5938_v50, %v2026_v44  ;;  %v2045_v59 = vmul.f32 %v5939_v0, %v2026_v44  ;;  %v5957_v50 = vld [vmem:[#allocation82_spill] sm:$0xff]  ;;  %v5958_v44 = vld [vmem:[#allocation83_spill] sm:$0xff]  ;;  %3110 = verf.f32 %v2776_v56 }
 0x3ed   : > { %5951 = vst [vmem:[#allocation22_spill] sm:$0xff] %v5236_v34  ;;  %5953 = vst [vmem:[#allocation6_spill] sm:$0xff] %v5240_v14  ;;  %v749_v34 = vmul.f32 %v5947_v42, %v729_v16  ;;  %v5964_v42 = vld [vmem:[#allocation31_spill] sm:$0xff]  ;;  %v5969_v56 = vld [vmem:[#allocation74_spill] sm:$0xff] }
 0x3ee   : > { %5956 = vst [vmem:[#allocation104_spill] sm:$0xff] %v5248_v27  ;;  %v2052_v0 = vadd.f32 %v2044_v12, %v5957_v50  ;;  %v2053_v57 = vadd.f32 %v2045_v59, %v5958_v44  ;;  %v718_v50 = vadd.f32 %v710_v2, %v4973_v39  ;;  %v5965_v44 = vld [vmem:[#allocation60_spill] sm:$0xff]  ;;  %v5971_v2 = vld [vmem:[#allocation61_spill] sm:$0xff] }
 0x3ef   : > { %v2645_v14 = vpop.permute.xlu0 %2644  ;;  %v1415_v16 = vmul.f32 %v5965_v44, %v5964_v42  ;;  %v5970_v39 = vld [vmem:[#allocation76_spill] sm:$0xff]  ;;  %v1416_v18 = vmul.f32 %v5971_v2, %v5964_v42  ;;  %v5972_v44 = vld [vmem:[#allocation33_spill] sm:$0xff]  ;;  %v2713_v42 = vmul.f32 %v5070_v37, %v5104_v49 }
 0x3f0   : > { %v2092_v11 = vadd.f32 %v5962_v48, %v2052_v0  ;;  %v2093_v27 = vadd.f32 %v5963_v36, %v2053_v57  ;;  %v2667_v12 = vmul.f32 %v5018_v5, %v2645_v14  ;;  %v2668_v59 = vmul.f32 %v5022_v7, %v2645_v14  ;;  %v5968_v14 = vld [vmem:[#allocation17_spill] sm:$0xff] }
 0x3f1   : > { %v870_v36 = vmul.f32 %v5969_v56, %v5968_v14  ;;  %v869_v51 = vmul.f32 %v5970_v39, %v5968_v14 }
 0x3f2   : > { %v5267_v26 = vadd.f32 %v5966_v29, %v2092_v11  ;;  %v5270_v3 = vadd.f32 %v5967_v35, %v2093_v27  ;;  %v2675_v48 = vadd.f32 %v2667_v12, %v5147_v23  ;;  %v2676_v57 = vadd.f32 %v2668_v59, %v5150_v40  ;;  %v5973_v11 = vld [vmem:[#allocation64_spill] sm:$0xff] }
 0x3f3   : > { %v2657_v0 = vpop.permute.xlu0 %2656  ;;  %v5282_v29 = vmul.f32 %v5973_v11, %v5972_v44  ;;  %v757_v27 = vadd.f32 %v749_v34, %v717_v47  ;;  %v758_v35 = vadd.f32 %v750_v21, %v718_v50  ;;  %v1375_v34 = vmul.f32 %v5950_v52, %v5160_v13  ;;  %v5975_v52 = vld [vmem:[#allocation75_spill] sm:$0xff] }
 0x3f4   : > { %v2148_v23 = vmul.f32 0.70710677, %v5267_v26  ;;  %v2149_v40 = vmul.f32 0.70710677, %v5270_v3  ;;  %v2673_v12 = vmul.f32 %v5018_v5, %v2657_v0  ;;  %v2674_v59 = vmul.f32 %v5022_v7, %v2657_v0 }
 0x3f5   : > { %v5289_v56 = vadd.f32 %v5079_v19, %v2675_v48  ;;  %v5292_v14 = vadd.f32 %v5082_v43, %v2676_v57  ;;  %v1376_v21 = vmul.f32 %v5952_v31, %v5160_v13  ;;  %v2714_v5 = vmul.f32 %v5074_v24, %v5104_v49 }
 0x3f6   : > { %3112 = verf.f32 %v2148_v23  ;;  %v2681_v7 = vadd.f32 %v2673_v12, %v5155_v63  ;;  %v2682_v19 = vadd.f32 %v2674_v59, %v5158_v9  ;;  %v1343_v43 = vadd.f32 %v1335_v32, %v4988_v55  ;;  %v5977_v63 = vld [vmem:[#allocation14_spill] sm:$0xff] }
 0x3f7   : > { %5974 = vst [vmem:[#allocation62_spill] sm:$0xff] %v5292_v14  ;;  %3114 = verf.f32 %v2149_v40  ;;  %v1344_v50 = vadd.f32 %v1336_v17, %v4990_v22  ;;  %v798_v47 = vadd.f32 %v790_v61, %v758_v35  ;;  %v797_v57 = vadd.f32 %v789_v25, %v757_v27  ;;  %v5976_v14 = vld [vmem:[#allocation13_spill] sm:$0xff]  ;;  %v5978_v25 = vld [vmem:[#allocation16_spill] sm:$0xff]  ;;  %v3109_v27 = vpop.eup %3108  ;;  %v5979_v35 = vld [vmem:[#allocation106_spill] sm:$0xff] }
 0x3f8   : > { %v809_v48 = vpop.permute.xlu0 %808  ;;  %v5308_v31 = vadd.f32 %v2713_v42, %v2681_v7  ;;  %v5310_v23 = vadd.f32 %v2714_v5, %v2682_v19  ;;  %v1383_v49 = vadd.f32 %v1375_v34, %v1343_v43  ;;  %v5314_v9 = vmul.f32 %v5976_v14, %v5977_v63  ;;  %v5980_v12 = vld [vmem:[#allocation98_spill] sm:$0xff]  ;;  %v5981_v42 = vld [vmem:[#allocation99_spill] sm:$0xff] }
 0x3f9   : > { %v829_v0 = vmul.f32 %v5975_v52, %v809_v48  ;;  %v830_v13 = vmul.f32 %v5976_v14, %v809_v48  ;;  %v1384_v40 = vadd.f32 %v1376_v21, %v1344_v50  ;;  %v5318_v55 = vmul.f32 %v5975_v52, %v5977_v63  ;;  %v3111_v48 = vpop.eup %3110 }
 0x3fa   : > { %v5322_v32 = vmul.f32 %v5976_v14, %v5978_v25  ;;  %v5326_v17 = vmul.f32 %v5975_v52, %v5978_v25  ;;  %v5330_v59 = vmul.f32 %v5980_v12, %v5979_v35  ;;  %v5334_v34 = vmul.f32 %v5981_v42, %v5979_v35  ;;  %v5982_v14 = vld [vmem:[#allocation65_spill] sm:$0xff] }
 0x3fb   : > { %v837_v22 = vadd.f32 %v829_v0, %v797_v57  ;;  %v838_v61 = vadd.f32 %v830_v13, %v798_v47  ;;  %v5338_v21 = vadd.f32 %v5217_v38, %v5047_v8  ;;  %v5342_v7 = vmul.f32 %v5982_v14, %v5972_v44  ;;  %v5983_v44 = vld [vmem:[#allocation35_spill] sm:$0xff] }
 0x3fc   : > { %v1435_v5 = vpop.permute.xlu0 %1434  ;;  %v755_v57 = vadd.f32 %v5221_v60, %v5045_v41  ;;  %v762_v8 = vadd.f32 %v5225_v15, %v5066_v62  ;;  %v1423_v38 = vadd.f32 %v1415_v16, %v1383_v49  ;;  %v1424_v52 = vadd.f32 %v1416_v18, %v1384_v40  ;;  %v5984_v15 = vld [vmem:[#allocation92_spill] sm:$0xff]  ;;  %v5985_v18 = vld [vmem:[#allocation93_spill] sm:$0xff] }
 0x3fd   : > { %v5344_v19 = vadd.f32 %v869_v51, %v837_v22  ;;  %v5346_v43 = vadd.f32 %v870_v36, %v838_v61  ;;  %v1455_v50 = vmul.f32 %v5973_v11, %v1435_v5  ;;  %v1456_v47 = vmul.f32 %v5982_v14, %v1435_v5 }
 0x3fe   : > { %v2791_v0 = vadd.f32 1.0, %v3109_v27  ;;  %v761_v51 = vadd.f32 %v5229_v53, %v5983_v44  ;;  %v2749_v63 = vmul.f32 %v5120_v33, %v5110_v45  ;;  %v2767_v22 = vmul.f32 0.5, %v5140_v20  ;;  %v5986_v44 = vld [vmem:[#allocation100_spill] sm:$0xff] }
 0x3ff   : > { %v893_v36 = vmul.f32 0.70710677, %v5344_v19  ;;  %v894_v13 = vmul.f32 0.70710677, %v5346_v43  ;;  %v1463_v61 = vadd.f32 %v1455_v50, %v1423_v38  ;;  %v1464_v41 = vadd.f32 %v1456_v47, %v1424_v52 }
 0x400   : > { %v2058_v60 = vpop.permute.xlu0 %2057  ;;  %v2768_v62 = vmul.f32 0.5, %v5142_v28  ;;  %v2792_v53 = vadd.f32 1.0, %v3111_v48  ;;  %v2799_v20 = vmul.f32 %v2791_v0, %v2767_v22  ;;  %v787_v35 = vmul.f32 %v5961_v46, %v5178_v1 }
 0x401   : > { %3116 = verf.f32 %v893_v36  ;;  %v2080_v16 = vmul.f32 %v5984_v15, %v2058_v60  ;;  %v2081_v49 = vmul.f32 %v5985_v18, %v2058_v60  ;;  %v5365_v40 = vadd.f32 %v5196_v54, %v1463_v61 }
 0x402   : > { %3118 = verf.f32 %v894_v13  ;;  %v5368_v25 = vadd.f32 %v5200_v58, %v1464_v41  ;;  %v2140_v47 = vmul.f32 0.5, %v5267_v26  ;;  %v2141_v48 = vmul.f32 0.5, %v5270_v3  ;;  %v5987_v13 = vld [vmem:[#allocation101_spill] sm:$0xff]  ;;  %2993 = vst [vmem:[%s4196_s29 + $0xe0] sm:$0xff] %v2799_v20  ;;  %v5993_v20 = vld [vmem:[#allocation44_spill] sm:$0xff] }
 0x403   : > { %v3113_v27 = vpop.eup %3112  ;;  %v2088_v28 = vadd.f32 %v2080_v16, %v5208_v6  ;;  %v2089_v5 = vadd.f32 %v2081_v49, %v5210_v4  ;;  %v1519_v54 = vmul.f32 0.70710677, %v5365_v40  ;;  %v788_v22 = vmul.f32 %v5960_v10, %v5178_v1  ;;  %v5988_v49 = vld [vmem:[#allocation19_spill] sm:$0xff] }
 0x404   : > { %v3115_v50 = vpop.eup %3114  ;;  %v2164_v38 = vadd.f32 1.0, %v3113_v27  ;;  %v2070_v58 = vpop.permute.xlu0 %2069  ;;  %v1520_v0 = vmul.f32 0.70710677, %v5368_v25  ;;  %v794_v61 = vmul.f32 %v5960_v10, %v5186_v30  ;;  %v2800_v60 = vmul.f32 %v2792_v53, %v2768_v62  ;;  %v5991_v62 = vld [vmem:[#allocation4_spill] sm:$0xff] }
 0x405   : > { %v2165_v52 = vadd.f32 1.0, %v3115_v50  ;;  %v5379_v36 = vadd.f32 %v5986_v44, %v2088_v28  ;;  %v5382_v6 = vadd.f32 %v5987_v13, %v2089_v5  ;;  %3120 = verf.f32 %v1519_v54  ;;  %v5989_v28 = vld [vmem:[#allocation21_spill] sm:$0xff]  ;;  %v5992_v53 = vld [vmem:[#allocation60_spill] sm:$0xff]  ;;  %v5997_v44 = vld [vmem:[#allocation43_spill] sm:$0xff] }
 0x406   : > { %v2172_v4 = vmul.f32 %v2164_v38, %v2140_v47  ;;  %v2086_v3 = vmul.f32 %v5984_v15, %v2070_v58  ;;  %v2087_v26 = vmul.f32 %v5985_v18, %v2070_v58  ;;  %3122 = verf.f32 %v1520_v0  ;;  %v5990_v18 = vld [vmem:[#allocation29_spill] sm:$0xff]  ;;  %2994 = vst [vmem:[%s4196_s29 + $0xe8] sm:$0xff] %v2800_v60  ;;  %v5995_v58 = vld [vmem:[#allocation42_spill] sm:$0xff] }
 0x407   : > { %v2173_v41 = vmul.f32 %v2165_v52, %v2141_v48  ;;  %v793_v16 = vmul.f32 %v5961_v46, %v5186_v30  ;;  %v2750_v50 = vmul.f32 %v5990_v18, %v5110_v45  ;;  %v795_v1 = vadd.f32 %v787_v35, %v755_v57  ;;  %v5994_v35 = vld [vmem:[#allocation45_spill] sm:$0xff]  ;;  %v5996_v52 = vld [vmem:[#allocation22_spill] sm:$0xff] }
 0x408   : > { %2960 = vst [vmem:[%s4196_s29 + $0xa0] sm:$0xff] %v2172_v4  ;;  %v2094_v27 = vadd.f32 %v2086_v3, %v5988_v49  ;;  %v2095_v15 = vadd.f32 %v2087_v26, %v5989_v28  ;;  %v2689_v5 = vpop.permute.xlu0 %2688  ;;  %v1413_v48 = vmul.f32 %v5992_v53, %v5991_v62  ;;  %v1414_v46 = vmul.f32 %v5971_v2, %v5991_v62  ;;  %v5998_v13 = vld [vmem:[#allocation6_spill] sm:$0xff]  ;;  %v5999_v3 = vld [vmem:[#allocation23_spill] sm:$0xff] }
 0x409   : > { %2961 = vst [vmem:[%s4196_s29 + $0xa8] sm:$0xff] %v2173_v41  ;;  %v2709_v10 = vmul.f32 %v5070_v37, %v2689_v5  ;;  %v2710_v47 = vmul.f32 %v5074_v24, %v2689_v5  ;;  %v796_v45 = vadd.f32 %v788_v22, %v5338_v21  ;;  %v802_v57 = vadd.f32 %v794_v61, %v762_v8  ;;  %v6001_v41 = vld [vmem:[#allocation3_spill] sm:$0xff]  ;;  %v6003_v28 = vld [vmem:[#allocation74_spill] sm:$0xff] }
 0x40a   : > { %v5407_v30 = vadd.f32 %v5330_v59, %v2094_v27  ;;  %v5410_v38 = vadd.f32 %v5334_v34, %v2095_v15  ;;  %v801_v54 = vadd.f32 %v793_v16, %v761_v51  ;;  %v1381_v0 = vadd.f32 %v5996_v52, %v5995_v58  ;;  %v6000_v59 = vld [vmem:[#allocation20_spill] sm:$0xff] }
 0x40b   : > { %v2717_v37 = vadd.f32 %v2709_v10, %v5993_v20  ;;  %v2718_v24 = vadd.f32 %v2710_v47, %v5994_v35  ;;  %v1382_v4 = vadd.f32 %v5998_v13, %v5997_v44  ;;  %v1387_v26 = vadd.f32 %v6000_v59, %v5999_v3  ;;  %v6002_v34 = vld [vmem:[#allocation104_spill] sm:$0xff] }
 0x40c   : > { %v1388_v60 = vadd.f32 %v6002_v34, %v6001_v41  ;;  %v835_v22 = vadd.f32 %v5318_v55, %v795_v1  ;;  %v1421_v61 = vadd.f32 %v1413_v48, %v1381_v0  ;;  %v885_v10 = vmul.f32 0.5, %v5344_v19  ;;  %v6004_v48 = vld [vmem:[#allocation2_spill] sm:$0xff]  ;;  %v6006_v41 = vld [vmem:[#allocation69_spill] sm:$0xff] }
 0x40d   : > { %v5423_v49 = vadd.f32 %v2749_v63, %v2717_v37  ;;  %v5425_v21 = vadd.f32 %v2750_v50, %v2718_v24  ;;  %v845_v8 = vpop.permute.xlu0 %844  ;;  %v1422_v16 = vadd.f32 %v1414_v46, %v1382_v4  ;;  %v836_v62 = vadd.f32 %v5314_v9, %v796_v45 }
 0x40e   : > { %v3117_v51 = vpop.eup %3116  ;;  %v867_v27 = vmul.f32 %v5970_v39, %v845_v8  ;;  %v868_v15 = vmul.f32 %v6003_v28, %v845_v8  ;;  %v842_v63 = vadd.f32 %v5322_v32, %v802_v57  ;;  %v886_v50 = vmul.f32 0.5, %v5346_v43 }
 0x40f   : > { %v3119_v5 = vpop.eup %3118  ;;  %v909_v47 = vadd.f32 1.0, %v3117_v51  ;;  %v841_v1 = vadd.f32 %v5326_v17, %v801_v54  ;;  %v1419_v46 = vmul.f32 %v5992_v53, %v6004_v48  ;;  %v1420_v19 = vmul.f32 %v5971_v2, %v6004_v48 }
 0x410   : > { %v910_v20 = vadd.f32 1.0, %v3119_v5  ;;  %v5434_v55 = vadd.f32 %v867_v27, %v835_v22  ;;  %v5441_v35 = vadd.f32 %v868_v15, %v836_v62  ;;  %v1461_v43 = vadd.f32 %v5282_v29, %v1421_v61 }
 0x411   : > { %v917_v37 = vmul.f32 %v909_v47, %v885_v10  ;;  %v857_v9 = vpop.permute.xlu0 %856  ;;  %v1462_v57 = vadd.f32 %v5342_v7, %v1422_v16  ;;  %v1511_v17 = vmul.f32 0.5, %v5365_v40  ;;  %v2144_v53 = vmul.f32 0.70710677, %v5379_v36 }
 0x412   : > { %v918_v45 = vmul.f32 %v910_v20, %v886_v50  ;;  %v891_v32 = vmul.f32 0.70710677, %v5434_v55  ;;  %v3121_v24 = vpop.eup %3120  ;;  %v892_v54 = vmul.f32 0.70710677, %v5441_v35  ;;  %v873_v2 = vmul.f32 %v5970_v39, %v857_v9  ;;  %v6005_v39 = vld [vmem:[#allocation68_spill] sm:$0xff] }
 0x413   : > { %925 = vst [vmem:[%s4196_s29 + $0x10] sm:$0xff] %v917_v37  ;;  %v3123_v58 = vpop.eup %3122  ;;  %v1535_v52 = vadd.f32 1.0, %v3121_v24  ;;  %v2145_v0 = vmul.f32 0.70710677, %v5382_v6  ;;  %v874_v29 = vmul.f32 %v6003_v28, %v857_v9  ;;  %v1512_v7 = vmul.f32 0.5, %v5368_v25  ;;  %v6007_v28 = vld [vmem:[#allocation34_spill] sm:$0xff] }
 0x414   : > { %926 = vst [vmem:[%s4196_s29 + $0x18] sm:$0xff] %v918_v45  ;;  %3124 = verf.f32 %v891_v32  ;;  %v1536_v44 = vadd.f32 1.0, %v3123_v58  ;;  %v5455_v40 = vadd.f32 %v873_v2, %v841_v1  ;;  %v1427_v8 = vadd.f32 %v1419_v46, %v1387_v26 }
 0x415   : > { %3126 = verf.f32 %v892_v54  ;;  %v1471_v13 = vpop.permute.xlu0 %1470  ;;  %v1543_v4 = vmul.f32 %v1535_v52, %v1511_v17  ;;  %v5457_v3 = vadd.f32 %v874_v29, %v842_v63  ;;  %v1428_v61 = vadd.f32 %v1420_v19, %v1388_v60  ;;  %v6009_v17 = vld [vmem:[#allocation53_spill] sm:$0xff] }
 0x416   : > { %v1493_v59 = vmul.f32 %v6005_v39, %v1471_v13  ;;  %v1494_v34 = vmul.f32 %v6006_v41, %v1471_v13  ;;  %v1544_v22 = vmul.f32 %v1536_v44, %v1512_v7  ;;  %3128 = verf.f32 %v2144_v53 }
 0x417   : > { %v897_v51 = vmul.f32 0.70710677, %v5455_v40  ;;  %2925 = vst [vmem:[%s4196_s29 + $0x50] sm:$0xff] %v1543_v4  ;;  %3130 = verf.f32 %v2145_v0  ;;  %v898_v25 = vmul.f32 0.70710677, %v5457_v3  ;;  %v1459_v15 = vmul.f32 %v5973_v11, %v6007_v28 }
 0x418   : > { %v5464_v16 = vadd.f32 %v1493_v59, %v1461_v43  ;;  %2926 = vst [vmem:[%s4196_s29 + $0x58] sm:$0xff] %v1544_v22  ;;  %v5467_v27 = vadd.f32 %v1494_v34, %v1462_v57  ;;  %v2150_v26 = vmul.f32 0.70710677, %v5407_v30  ;;  %v1460_v60 = vmul.f32 %v5982_v14, %v6007_v28  ;;  %v6008_v43 = vld [vmem:[#allocation54_spill] sm:$0xff] }
 0x419   : > { %3132 = verf.f32 %v897_v51  ;;  %v1483_v5 = vpop.permute.xlu0 %1482  ;;  %v2151_v47 = vmul.f32 0.70710677, %v5410_v38  ;;  %v1467_v63 = vadd.f32 %v1459_v15, %v1427_v8  ;;  %v2773_v20 = vmul.f32 0.70710677, %v5423_v49  ;;  %v6010_v34 = vld [vmem:[#allocation62_spill] sm:$0xff] }
 0x41a   : > { %3134 = verf.f32 %v898_v25  ;;  %v1517_v10 = vmul.f32 0.70710677, %v5464_v16  ;;  %v1518_v62 = vmul.f32 0.70710677, %v5467_v27  ;;  %v1499_v50 = vmul.f32 %v6005_v39, %v1483_v5 }
 0x41b   : > { %v1468_v11 = vadd.f32 %v1460_v60, %v1428_v61  ;;  %v1500_v1 = vmul.f32 %v6006_v41, %v1483_v5  ;;  %v2774_v9 = vmul.f32 0.70710677, %v5425_v21  ;;  %v884_v58 = vmul.f32 0.5, %v5441_v35 }
 0x41c   : > { %3136 = verf.f32 %v1517_v10  ;;  %v5480_v48 = vadd.f32 %v1499_v50, %v1467_v63  ;;  %v889_v25 = vmul.f32 0.5, %v5455_v40  ;;  %v1509_v50 = vmul.f32 0.5, %v5464_v16 }
 0x41d   : > { %3138 = verf.f32 %v1518_v62  ;;  %v2102_v46 = vpop.permute.xlu0 %2101  ;;  %v5482_v19 = vadd.f32 %v1500_v1, %v1468_v11  ;;  %v2136_v11 = vmul.f32 0.5, %v5379_v36  ;;  %v1510_v1 = vmul.f32 0.5, %v5467_v27 }
 0x41e   : > { %3140 = verf.f32 %v2150_v26  ;;  %v2122_v14 = vmul.f32 %v5980_v12, %v2102_v46  ;;  %v2123_v37 = vmul.f32 %v5981_v42, %v2102_v46  ;;  %v1523_v45 = vmul.f32 0.70710677, %v5480_v48 }
 0x41f   : > { %3142 = verf.f32 %v2151_v47  ;;  %v1524_v32 = vmul.f32 0.70710677, %v5482_v19  ;;  %v883_v42 = vmul.f32 0.5, %v5434_v55  ;;  %v890_v26 = vmul.f32 0.5, %v5457_v3 }
 0x420   : > { %3144 = verf.f32 %v2773_v20  ;;  %v5490_v57 = vadd.f32 %v2122_v14, %v6008_v43  ;;  %v5493_v53 = vadd.f32 %v2123_v37, %v6009_v17 }
 0x421   : > { %v3125_v24 = vpop.eup %3124  ;;  %3146 = verf.f32 %v1523_v45  ;;  %v2725_v54 = vpop.permute.xlu0 %2724 }
 0x422   : > { %v3127_v12 = vpop.eup %3126  ;;  %v907_v2 = vadd.f32 1.0, %v3125_v24  ;;  %3148 = verf.f32 %v1524_v32  ;;  %v2146_v0 = vmul.f32 0.70710677, %v5490_v57  ;;  %v2147_v44 = vmul.f32 0.70710677, %v5493_v53 }
 0x423   : > { %3150 = verf.f32 %v2774_v9  ;;  %v908_v52 = vadd.f32 1.0, %v3127_v12  ;;  %v3129_v29 = vpop.eup %3128  ;;  %v2747_v13 = vmul.f32 %v5120_v33, %v2725_v54  ;;  %v2748_v4 = vmul.f32 %v5990_v18, %v2725_v54 }
 0x424   : > { %v915_v7 = vmul.f32 %v907_v2, %v883_v42  ;;  %v3131_v39 = vpop.eup %3130  ;;  %3152 = verf.f32 %v2146_v0  ;;  %v2160_v61 = vadd.f32 1.0, %v3129_v29  ;;  %v2142_v42 = vmul.f32 0.5, %v5407_v30 }
 0x425   : > { %v916_v55 = vmul.f32 %v908_v52, %v884_v58  ;;  %v2737_v59 = vpop.permute.xlu0 %2736  ;;  %3154 = verf.f32 %v2147_v44  ;;  %v5503_v35 = vadd.f32 %v2747_v13, %v5289_v56  ;;  %v5506_v8 = vadd.f32 %v2748_v4, %v6010_v34 }
 0x426   : > { %v3133_v41 = vpop.eup %3132  ;;  %923 = vst [vmem:[%s4196_s29] sm:$0xff] %v915_v7  ;;  %v2753_v22 = vmul.f32 %v5120_v33, %v2737_v59  ;;  %v2754_v15 = vmul.f32 %v5990_v18, %v2737_v59  ;;  %v2161_v5 = vadd.f32 1.0, %v3131_v39  ;;  %v2168_v45 = vmul.f32 %v2160_v61, %v2136_v11 }
 0x427   : > { %v3135_v51 = vpop.eup %3134  ;;  %924 = vst [vmem:[%s4196_s29 + $0x8] sm:$0xff] %v916_v55  ;;  %v913_v28 = vadd.f32 1.0, %v3133_v41  ;;  %v2771_v56 = vmul.f32 0.70710677, %v5503_v35  ;;  %v2772_v62 = vmul.f32 0.70710677, %v5506_v8 }
 0x428   : > { %v914_v10 = vadd.f32 1.0, %v3135_v51  ;;  %v5516_v33 = vadd.f32 %v2753_v22, %v5308_v31  ;;  %v5519_v40 = vadd.f32 %v2754_v15, %v5310_v23  ;;  %v2137_v23 = vmul.f32 0.5, %v5382_v6  ;;  %2956 = vst [vmem:[%s4196_s29 + $0x80] sm:$0xff] %v2168_v45 }
 0x429   : > { %v3137_v60 = vpop.eup %3136  ;;  %v921_v47 = vmul.f32 %v913_v28, %v889_v25  ;;  %3156 = verf.f32 %v2771_v56  ;;  %v1515_v6 = vmul.f32 0.5, %v5480_v48  ;;  %v1516_v2 = vmul.f32 0.5, %v5482_v19 }
 0x42a   : > { %v3139_v63 = vpop.eup %3138  ;;  %v922_v18 = vmul.f32 %v914_v10, %v890_v26  ;;  %v1533_v20 = vadd.f32 1.0, %v3137_v60  ;;  %3158 = verf.f32 %v2772_v62  ;;  %v2777_v16 = vmul.f32 0.70710677, %v5516_v33 }
 0x42b   : > { %v3141_v3 = vpop.eup %3140  ;;  %929 = vst [vmem:[%s4196_s29 + $0x30] sm:$0xff] %v921_v47  ;;  %v1534_v46 = vadd.f32 1.0, %v3139_v63  ;;  %v2778_v37 = vmul.f32 0.70710677, %v5519_v40  ;;  %v2169_v43 = vmul.f32 %v2161_v5, %v2137_v23  ;;  %v2143_v52 = vmul.f32 0.5, %v5410_v38 }
 0x42c   : > { %v3143_v31 = vpop.eup %3142  ;;  %930 = vst [vmem:[%s4196_s29 + $0x38] sm:$0xff] %v922_v18  ;;  %v1541_v14 = vmul.f32 %v1533_v20, %v1509_v50  ;;  %v2166_v27 = vadd.f32 1.0, %v3141_v3  ;;  %3160 = verf.f32 %v2777_v16  ;;  %v2138_v30 = vmul.f32 0.5, %v5490_v57 }
 0x42d   : > { %v3145_v9 = vpop.eup %3144  ;;  %v1542_v36 = vmul.f32 %v1534_v46, %v1510_v1  ;;  %v2167_v17 = vadd.f32 1.0, %v3143_v31  ;;  %3162 = verf.f32 %v2778_v37  ;;  %2957 = vst [vmem:[%s4196_s29 + $0x88] sm:$0xff] %v2169_v43  ;;  %v2765_v19 = vmul.f32 0.5, %v5423_v49 }
 0x42e   : > { %v3147_v32 = vpop.eup %3146  ;;  %2923 = vst [vmem:[%s4196_s29 + $0x40] sm:$0xff] %v1541_v14  ;;  %v2174_v7 = vmul.f32 %v2166_v27, %v2142_v42  ;;  %v2789_v44 = vadd.f32 1.0, %v3145_v9  ;;  %v2139_v38 = vmul.f32 0.5, %v5493_v53  ;;  %v2766_v41 = vmul.f32 0.5, %v5425_v21 }
 0x42f   : > { %v3149_v24 = vpop.eup %3148  ;;  %2924 = vst [vmem:[%s4196_s29 + $0x48] sm:$0xff] %v1542_v36  ;;  %v1539_v54 = vadd.f32 1.0, %v3147_v32  ;;  %v2175_v4 = vmul.f32 %v2167_v17, %v2143_v52  ;;  %v2763_v49 = vmul.f32 0.5, %v5503_v35  ;;  %v2764_v21 = vmul.f32 0.5, %v5506_v8 }
 0x430   : > { %v3151_v12 = vpop.eup %3150  ;;  %v1540_v58 = vadd.f32 1.0, %v3149_v24  ;;  %2962 = vst [vmem:[%s4196_s29 + $0xb0] sm:$0xff] %v2174_v7  ;;  %v2797_v22 = vmul.f32 %v2789_v44, %v2765_v19  ;;  %v2769_v56 = vmul.f32 0.5, %v5516_v33  ;;  %v2770_v47 = vmul.f32 0.5, %v5519_v40 }
 0x431   : > { %v1547_v0 = vmul.f32 %v1539_v54, %v1515_v6  ;;  %v3153_v29 = vpop.eup %3152  ;;  %v2790_v39 = vadd.f32 1.0, %v3151_v12  ;;  %2963 = vst [vmem:[%s4196_s29 + $0xb8] sm:$0xff] %v2175_v4 }
 0x432   : > { %v1548_v48 = vmul.f32 %v1540_v58, %v1516_v2  ;;  %v3155_v13 = vpop.eup %3154  ;;  %v2162_v55 = vadd.f32 1.0, %v3153_v29  ;;  %2991 = vst [vmem:[%s4196_s29 + $0xd0] sm:$0xff] %v2797_v22 }
 0x433   : > { %2929 = vst [vmem:[%s4196_s29 + $0x70] sm:$0xff] %v1547_v0  ;;  %v2163_v59 = vadd.f32 1.0, %v3155_v13  ;;  %v2798_v57 = vmul.f32 %v2790_v39, %v2766_v41 }
 0x434   : > { %2930 = vst [vmem:[%s4196_s29 + $0x78] sm:$0xff] %v1548_v48  ;;  %v2170_v34 = vmul.f32 %v2162_v55, %v2138_v30 }
 0x435   : > { %v2171_v51 = vmul.f32 %v2163_v59, %v2139_v38  ;;  %2992 = vst [vmem:[%s4196_s29 + $0xd8] sm:$0xff] %v2798_v57 }
 0x436   : > { %v3157_v61 = vpop.eup %3156  ;;  %2958 = vst [vmem:[%s4196_s29 + $0x90] sm:$0xff] %v2170_v34 }
 0x437   : > { %v3159_v25 = vpop.eup %3158  ;;  %2959 = vst [vmem:[%s4196_s29 + $0x98] sm:$0xff] %v2171_v51  ;;  %v2787_v28 = vadd.f32 1.0, %v3157_v61 }
 0x438   : > { %v2788_v53 = vadd.f32 1.0, %v3159_v25 }
 0x439   : > { %v2795_v15 = vmul.f32 %v2787_v28, %v2763_v49  ;;  %v3161_v5 = vpop.eup %3160 }
 0x43a   : > { %v2796_v26 = vmul.f32 %v2788_v53, %v2764_v21  ;;  %v3163_v10 = vpop.eup %3162  ;;  %v2793_v60 = vadd.f32 1.0, %v3161_v5 }
 0x43b   : > { %2989 = vst [vmem:[%s4196_s29 + $0xc0] sm:$0xff] %v2795_v15  ;;  %v2794_v62 = vadd.f32 1.0, %v3163_v10 }
 0x43c   : > { %2990 = vst [vmem:[%s4196_s29 + $0xc8] sm:$0xff] %v2796_v26  ;;  %v2801_v35 = vmul.f32 %v2793_v60, %v2769_v56 }
 0x43d   : > { %v2802_v63 = vmul.f32 %v2794_v62, %v2770_v47 }
 0x43e   : > { %2995 = vst [vmem:[%s4196_s29 + $0xf0] sm:$0xff] %v2801_v35 }
 0x43f   : > { %2996 = vst [vmem:[%s4196_s29 + $0xf8] sm:$0xff] %v2802_v63 }
 0x440 PF: > { %s17_s24 = sadd.s32 1, %s3204_s24  }
 0x441   : > { %p14_p4 = scmp.ge.s32.totalorder %s17_s24, 4  }
 0x443   :  { %16 = sbr.rel (!%p14_p4) target bundleno = 1 (0x1), region = 92 }

</bundles_post_ra>
